<compile_context>
chip_gen: v7x
topology: tpu7x:2x2x1
jax: 0.10.0
libtpu: 0.0.40
codegen_flags: <defaults>
</compile_context>

<pallas_src>
import functools
import math

import jax
import jax.numpy as jnp
from jax import lax
from jax.experimental import pallas as pl
from jax.experimental.pallas import tpu as pltpu


# ---------------------------------------------------------------------------
# Fused forward kernel: one batch element per grid step, everything resident.
# ---------------------------------------------------------------------------
def _decoder_fused_kernel(
        tok_ref,     # (S, 1)   int32 token ids for this batch element
        enc_ref,     # (S, E)   encoder output
        mask_ref,    # (S, S)   raw 0/1 decoder self-attention mask
        pe_ref,      # (S, E)   positional table
        emb_ref,     # (V, E)   embedding table
        sqkv_ref,    # (L, E, 3E) fused block-diag self-attn QKV (scale folded into Q)
        swoh_ref,    # (L, H, hd, E) self-attn out-projection, head-major
        sbo_ref,     # (L, 1, E)
        cwq_ref, cwk_ref, cwv_ref,   # (L, E, E) block-diag cross-attn (scale in Q)
        cwoh_ref,    # (L, H, hd, E) cross-attn out-projection, head-major
        cbo_ref,     # (L, 1, E)
        lng_ref, lnb_ref,            # (L, 3, 1, E)  LayerNorm gamma/beta (norm, norm1, norm2)
        w1_ref, b1_ref, w2_ref, b2_ref,   # FFN (L,E,4E),(L,1,4E),(L,4E,E),(L,1,E)
        fcw_ref, fcb_ref,            # (E, V), (1, V)
        out_ref,     # (S, V)
        *, n_heads):
    f32 = jnp.float32
    seq = enc_ref.shape[0]
    vocab, emb_dim = emb_ref.shape
    num_layers = sqkv_ref.shape[0]
    hd = emb_dim // n_heads

    enc = enc_ref[...]                                                    # (S, E)
    # Additive mask built in-kernel (== masked_fill(mask==0, -1e20)).
    add_mask = jnp.where(mask_ref[...] == 0.0, -1e20, 0.0).astype(f32)    # (S, S)

    # Embedding gather as a one-hot matmul (exact), then positional encoding.
    one_hot = (tok_ref[...] ==
               lax.broadcasted_iota(jnp.int32, (seq, vocab), 1)).astype(f32)   # (S, V)
    x = jnp.dot(one_hot, emb_ref[...], preferred_element_type=f32)             # (S, E)
    x = x * math.sqrt(emb_dim) + pe_ref[...]     # dropout = identity in eval

    def layer_norm(v, g, b):                     # over embed axis, eps = 1e-5
        mu = jnp.mean(v, axis=-1, keepdims=True)
        vc = v - mu
        var = jnp.mean(vc * vc, axis=-1, keepdims=True)
        return vc * lax.rsqrt(var + 1e-5) * g + b

    def split_heads(z, base):
        # (S, W) -> (H, S, hd) via static lane slices + leading-axis stack
        # (avoids minor-dim splitting reshapes; cheap, known-good relayouts).
        return jnp.stack(
            [z[:, base + h * hd: base + (h + 1) * hd] for h in range(n_heads)],
            axis=0)

    def attention(qh, kh, vh, woh, bo, masked):
        # qh/kh/vh: (H, S, hd).  One batched score matmul, ONE softmax over all
        # heads, one batched context matmul, head-batched out-projection.
        s = jnp.einsum('hqd,hkd->hqk', qh, kh, preferred_element_type=f32)  # (H,S,S)
        if masked:
            s = s + add_mask[None]
        s = s - jnp.max(s, axis=-1, keepdims=True)
        p = jnp.exp(s)
        p = p * pl.reciprocal(jnp.sum(p, axis=-1, keepdims=True), approx=True)
        ctx = jnp.einsum('hqk,hkd->hqd', p, vh, preferred_element_type=f32)  # (H,S,hd)
        per = jnp.einsum('hqd,hde->hqe', ctx, woh, preferred_element_type=f32)
        return jnp.sum(per, axis=0) + bo                                     # (S,E)

    for l in range(num_layers):                    # statically unrolled (L = 2)
        # --- DecoderBlock: masked self-attention over the encoder output ----
        qkv = jnp.dot(enc, sqkv_ref[l], preferred_element_type=f32)          # (S, 3E)
        a = attention(split_heads(qkv, 0),
                      split_heads(qkv, emb_dim),
                      split_heads(qkv, 2 * emb_dim),
                      swoh_ref[l], sbo_ref[l], masked=True)
        value = layer_norm(a + enc, lng_ref[l, 0], lnb_ref[l, 0])
        # --- TransformerBlock: cross attn (q = x, k = enc, v = value), unmasked
        q2 = jnp.dot(x, cwq_ref[l], preferred_element_type=f32)
        k2 = jnp.dot(enc, cwk_ref[l], preferred_element_type=f32)
        v2 = jnp.dot(value, cwv_ref[l], preferred_element_type=f32)
        a2 = attention(split_heads(q2, 0), split_heads(k2, 0), split_heads(v2, 0),
                       cwoh_ref[l], cbo_ref[l], masked=False)
        n1 = layer_norm(a2 + value, lng_ref[l, 1], lnb_ref[l, 1])
        hid = jnp.maximum(
            jnp.dot(n1, w1_ref[l], preferred_element_type=f32) + b1_ref[l], 0.0)
        ff = jnp.dot(hid, w2_ref[l], preferred_element_type=f32) + b2_ref[l]
        x = layer_norm(ff + n1, lng_ref[l, 2], lnb_ref[l, 2])

    # fc_out, then softmax over the SEQUENCE axis (torch dim=1).
    logits = jnp.dot(x, fcw_ref[...], preferred_element_type=f32) + fcb_ref[...]
    logits = logits - jnp.max(logits, axis=0, keepdims=True)
    e = jnp.exp(logits)
    out_ref[...] = e / jnp.sum(e, axis=0, keepdims=True)


# ---------------------------------------------------------------------------
# Wrapper: single fused pallas_call, grid-parallel over batch.
# ---------------------------------------------------------------------------
def transformer_decoder_forward(packed, tokens, enc_out, mask, *, n_heads):
    b, s = tokens.shape
    vocab, e = packed["emb"].shape

    tok3 = tokens.astype(jnp.int32).reshape(b, s, 1)   # metadata-only glue
    enc_f = enc_out.astype(jnp.float32)
    mask_f = mask.astype(jnp.float32)

    weights = (packed["emb"], packed["sqkv"], packed["swoh"], packed["sbo"],
               packed["cwq"], packed["cwk"], packed["cwv"], packed["cwoh"],
               packed["cbo"], packed["lng"], packed["lnb"],
               packed["w1"], packed["b1"], packed["w2"], packed["b2"],
               packed["fcw"], packed["fcb"])

    def per_batch_spec(a):          # squeeze batch dim, one block per grid step
        nd = a.ndim
        return pl.BlockSpec((None,) + tuple(a.shape[1:]),
                            lambda bb, _nd=nd: (bb,) + (0,) * (_nd - 1))

    def replicated_spec(a):         # full array, same block every grid step
        shp = tuple(a.shape)
        return pl.BlockSpec(shp, lambda bb, _nd=len(shp): (0,) * _nd)

    in_specs = ([per_batch_spec(tok3), per_batch_spec(enc_f), per_batch_spec(mask_f),
                 replicated_spec(packed["pe"])]
                + [replicated_spec(w) for w in weights])

    kern = functools.partial(_decoder_fused_kernel, n_heads=n_heads)

    return pl.pallas_call(
        kern,
        out_shape=jax.ShapeDtypeStruct((b, s, vocab), jnp.float32),
        grid=(b,),
        in_specs=in_specs,
        out_specs=pl.BlockSpec((None, s, vocab), lambda bb: (bb, 0, 0)),
        compiler_params=pltpu.CompilerParams(dimension_semantics=("parallel",)),
    )(tok3, enc_f, mask_f, packed["pe"], *weights)


# ---------------------------------------------------------------------------
# Host-side parameter packing (block-diag q/k/v, fused self-QKV, folded scale,
# head-major out-projection, layer stacking).
# ---------------------------------------------------------------------------
def pack_params(params, n_heads):
    embed = params["embedding"].shape[1]
    hd = embed // n_heads
    eye = jnp.eye(n_heads, dtype=jnp.float32)
    blk = lambda w: jnp.kron(eye, w)            # (hd,hd) -> block-diagonal (E,E)
    scale = 1.0 / math.sqrt(hd)                 # folded into the query weights

    def per_layer(lp):
        sa, ca = lp["self_attn"], lp["cross_attn"]
        return {
            "sqkv": jnp.concatenate(
                [blk(sa["wq"]) * scale, blk(sa["wk"]), blk(sa["wv"])], axis=1),
            "swoh": sa["wo"].reshape(n_heads, hd, embed),
            "sbo": sa["bo"],
            "cwq": blk(ca["wq"]) * scale,
            "cwk": blk(ca["wk"]),
            "cwv": blk(ca["wv"]),
            "cwoh": ca["wo"].reshape(n_heads, hd, embed),
            "cbo": ca["bo"],
            "lng": jnp.stack([lp["norm"]["gamma"], lp["norm1"]["gamma"],
                              lp["norm2"]["gamma"]]),
            "lnb": jnp.stack([lp["norm"]["beta"], lp["norm1"]["beta"],
                              lp["norm2"]["beta"]]),
            "w1": lp["ffn"]["w1"], "b1": lp["ffn"]["b1"],
            "w2": lp["ffn"]["w2"], "b2": lp["ffn"]["b2"],
        }

    per = [per_layer(lp) for lp in params["layers"]]
    packed = {k: jnp.stack([p[k] for p in per]) for k in per[0]}
    packed["emb"] = params["embedding"]
    packed["pe"] = params["pe"]
    packed["fcw"] = params["fc_out"]["w"]
    packed["fcb"] = params["fc_out"]["b"]
    return packed


# ---------------------------------------------------------------------------
# Deterministic parameter init (shapes follow the module's __init__)
# ---------------------------------------------------------------------------
def init_params(key, vocab, embed, seq_len, num_layers, n_heads, expansion):
    hd = embed // n_heads
    hidden = expansion * embed
    keys = iter(jax.random.split(key, 64))

    def nrm(shape, scale=0.1):
        return (scale * jax.random.normal(next(keys), shape)).astype(jnp.float32)

    def attn_params():
        return {"wq": nrm((hd, hd)), "wk": nrm((hd, hd)), "wv": nrm((hd, hd)),
                "wo": nrm((embed, embed)), "bo": nrm((1, embed))}

    def ln_params():
        return {"gamma": jnp.ones((1, embed), jnp.float32),
                "beta": jnp.zeros((1, embed), jnp.float32)}

    layers = []
    for _ in range(num_layers):
        layers.append({
            "self_attn": attn_params(),
            "norm": ln_params(),
            "cross_attn": attn_params(),
            "norm1": ln_params(),
            "norm2": ln_params(),
            "ffn": {"w1": nrm((embed, hidden)), "b1": nrm((1, hidden)),
                    "w2": nrm((hidden, embed)), "b2": nrm((1, embed))},
        })

    # sinusoidal table as in the reference PositionalEmbedding
    pos = jnp.arange(seq_len, dtype=jnp.float32)[:, None]
    i = jnp.arange(0, embed, 2, dtype=jnp.float32)[None, :]
    pe_sin = jnp.sin(pos / jnp.power(10000.0, (2.0 * i) / embed))
    pe_cos = jnp.cos(pos / jnp.power(10000.0, (2.0 * (i + 1.0)) / embed))
    pe = jnp.stack([pe_sin, pe_cos], axis=-1).reshape(seq_len, embed)

    return {
        "embedding": nrm((vocab, embed), 1.0),
        "pe": pe.astype(jnp.float32),
        "layers": layers,
        "fc_out": {"w": nrm((embed, vocab)), "b": nrm((1, vocab))},
    }


# ---------------------------------------------------------------------------
# Pure-JAX reference (mirrors the torch module, unfused) for a sanity check.
# ---------------------------------------------------------------------------
def reference_forward(params, tokens, enc_out, mask, n_heads):
    emb_tbl = params["embedding"]
    embed = emb_tbl.shape[1]
    hd = embed // n_heads
    b, s = tokens.shape
    x = emb_tbl[tokens] * math.sqrt(embed) + params["pe"][None, :s]

    def mha(key, query, value, p, m):
        def proj(z, w):
            zh = z.reshape(b, s, n_heads, hd)
            return jnp.einsum('bshd,de->bshe', zh, w)
        q, k, v = proj(query, p["wq"]), proj(key, p["wk"]), proj(value, p["wv"])
        sc = jnp.einsum('bqhd,bkhd->bhqk', q, k)
        if m is not None:
            sc = jnp.where(m[:, None] == 0, -1e20, sc)
        sc = sc / math.sqrt(hd)
        a = jax.nn.softmax(sc, axis=-1)
        ctx = jnp.einsum('bhqk,bkhd->bqhd', a, v).reshape(b, s, embed)
        return ctx @ p["wo"] + p["bo"]

    def ln(v, p):
        mu = v.mean(-1, keepdims=True)
        var = ((v - mu) ** 2).mean(-1, keepdims=True)
        return (v - mu) / jnp.sqrt(var + 1e-5) * p["gamma"] + p["beta"]

    for lp in params["layers"]:
        a = mha(enc_out, enc_out, enc_out, lp["self_attn"], mask)
        value = ln(a + enc_out, lp["norm"])
        a2 = mha(enc_out, x, value, lp["cross_attn"], None)
        n1 = ln(a2 + value, lp["norm1"])
        ff = jnp.maximum(n1 @ lp["ffn"]["w1"] + lp["ffn"]["b1"], 0.0)
        ff = ff @ lp["ffn"]["w2"] + lp["ffn"]["b2"]
        x = ln(ff + n1, lp["norm2"])
    logits = x @ params["fc_out"]["w"] + params["fc_out"]["b"]
    return jax.nn.softmax(logits, axis=1)


# ---------------------------------------------------------------------------
if __name__ == "__main__":
    B, S, E, H, V = 2, 8, 32, 8, 16
    NUM_LAYERS, EXPANSION = 2, 4

    root = jax.random.PRNGKey(0)
    kp, kt, ke = jax.random.split(root, 3)
    params = init_params(kp, V, E, S, NUM_LAYERS, H, EXPANSION)
    packed = pack_params(params, H)                                  # host-side precompute
    tokens = jax.random.randint(kt, (B, S), 0, V)                    # target token ids
    enc_out = jax.random.normal(ke, (B, S, E), dtype=jnp.float32)    # encoder output
    mask = jnp.broadcast_to(jnp.tril(jnp.ones((S, S), jnp.float32)), (B, S, S))

    fwd = jax.jit(functools.partial(transformer_decoder_forward, n_heads=H))
    out = jax.block_until_ready(fwd(packed, tokens, enc_out, mask))

    assert out.shape == (B, S, V)
    assert bool(jnp.all(jnp.isfinite(out)))
    # softmax over dim=1 (sequence axis) must sum to 1 along that axis
    assert bool(jnp.allclose(jnp.sum(out, axis=1), 1.0, atol=1e-3))

    # compare against the unfused pure-JAX reference (loose tol: approx recip)
    ref = reference_forward(params, tokens, enc_out, mask, H)
    assert bool(jnp.allclose(out, ref, atol=2e-2)), float(jnp.max(jnp.abs(out - ref)))
    print("KERNEL_OK")
</pallas_src>

<mosaic_0001>
module attributes {stable_mosaic.version = 11 : i64} {
  func.func @_decoder_fused_kernel(%arg0: i32, %arg1: memref<1x8x1xi32, #tpu.memory_space<vmem>>, %arg2: memref<1x8x32xf32, #tpu.memory_space<vmem>>, %arg3: memref<1x8x8xf32, #tpu.memory_space<vmem>>, %arg4: memref<8x32xf32, #tpu.memory_space<vmem>>, %arg5: memref<16x32xf32, #tpu.memory_space<vmem>>, %arg6: memref<2x32x96xf32, #tpu.memory_space<vmem>>, %arg7: memref<2x8x4x32xf32, #tpu.memory_space<vmem>>, %arg8: memref<2x1x32xf32, #tpu.memory_space<vmem>>, %arg9: memref<2x32x32xf32, #tpu.memory_space<vmem>>, %arg10: memref<2x32x32xf32, #tpu.memory_space<vmem>>, %arg11: memref<2x32x32xf32, #tpu.memory_space<vmem>>, %arg12: memref<2x8x4x32xf32, #tpu.memory_space<vmem>>, %arg13: memref<2x1x32xf32, #tpu.memory_space<vmem>>, %arg14: memref<2x3x1x32xf32, #tpu.memory_space<vmem>>, %arg15: memref<2x3x1x32xf32, #tpu.memory_space<vmem>>, %arg16: memref<2x32x128xf32, #tpu.memory_space<vmem>>, %arg17: memref<2x1x128xf32, #tpu.memory_space<vmem>>, %arg18: memref<2x128x32xf32, #tpu.memory_space<vmem>>, %arg19: memref<2x1x32xf32, #tpu.memory_space<vmem>>, %arg20: memref<32x16xf32, #tpu.memory_space<vmem>>, %arg21: memref<1x16xf32, #tpu.memory_space<vmem>>, %arg22: memref<1x8x16xf32, #tpu.memory_space<vmem>>) attributes {dimension_semantics = [#tpu.dimension_semantics<parallel>], iteration_bounds = array<i64: 2>, scalar_prefetch = 0 : i64, scratch_operands = 0 : i64, tpu.core_type = #tpu.core_type<tc>, window_params = [{transform_indices = @transform_0, window_bounds = array<i64: 1, 8, 1>}, {transform_indices = @transform_1, window_bounds = array<i64: 1, 8, 32>}, {transform_indices = @transform_2, window_bounds = array<i64: 1, 8, 8>}, {pipeline_mode = #tpu.pipeline_mode<synchronous>, transform_indices = @transform_3, window_bounds = array<i64: 8, 32>}, {pipeline_mode = #tpu.pipeline_mode<synchronous>, transform_indices = @transform_4, window_bounds = array<i64: 16, 32>}, {pipeline_mode = #tpu.pipeline_mode<synchronous>, transform_indices = @transform_5, window_bounds = array<i64: 2, 32, 96>}, {pipeline_mode = #tpu.pipeline_mode<synchronous>, transform_indices = @transform_6, window_bounds = array<i64: 2, 8, 4, 32>}, {pipeline_mode = #tpu.pipeline_mode<synchronous>, transform_indices = @transform_7, window_bounds = array<i64: 2, 1, 32>}, {pipeline_mode = #tpu.pipeline_mode<synchronous>, transform_indices = @transform_8, window_bounds = array<i64: 2, 32, 32>}, {pipeline_mode = #tpu.pipeline_mode<synchronous>, transform_indices = @transform_9, window_bounds = array<i64: 2, 32, 32>}, {pipeline_mode = #tpu.pipeline_mode<synchronous>, transform_indices = @transform_10, window_bounds = array<i64: 2, 32, 32>}, {pipeline_mode = #tpu.pipeline_mode<synchronous>, transform_indices = @transform_11, window_bounds = array<i64: 2, 8, 4, 32>}, {pipeline_mode = #tpu.pipeline_mode<synchronous>, transform_indices = @transform_12, window_bounds = array<i64: 2, 1, 32>}, {pipeline_mode = #tpu.pipeline_mode<synchronous>, transform_indices = @transform_13, window_bounds = array<i64: 2, 3, 1, 32>}, {pipeline_mode = #tpu.pipeline_mode<synchronous>, transform_indices = @transform_14, window_bounds = array<i64: 2, 3, 1, 32>}, {pipeline_mode = #tpu.pipeline_mode<synchronous>, transform_indices = @transform_15, window_bounds = array<i64: 2, 32, 128>}, {pipeline_mode = #tpu.pipeline_mode<synchronous>, transform_indices = @transform_16, window_bounds = array<i64: 2, 1, 128>}, {pipeline_mode = #tpu.pipeline_mode<synchronous>, transform_indices = @transform_17, window_bounds = array<i64: 2, 128, 32>}, {pipeline_mode = #tpu.pipeline_mode<synchronous>, transform_indices = @transform_18, window_bounds = array<i64: 2, 1, 32>}, {pipeline_mode = #tpu.pipeline_mode<synchronous>, transform_indices = @transform_19, window_bounds = array<i64: 32, 16>}, {pipeline_mode = #tpu.pipeline_mode<synchronous>, transform_indices = @transform_20, window_bounds = array<i64: 1, 16>}, {transform_indices = @transform_21, window_bounds = array<i64: 1, 8, 16>}]} {
    %c0 = arith.constant 0 : index
    %c0_0 = arith.constant 0 : index
    %c0_1 = arith.constant 0 : index
    %0 = vector.load %arg2[%c0, %c0_0, %c0_1] : memref<1x8x32xf32, #tpu.memory_space<vmem>>, vector<1x8x32xf32>
    %1 = vector.shape_cast %0 : vector<1x8x32xf32> to vector<8x32xf32>
    %c0_2 = arith.constant 0 : index
    %c0_3 = arith.constant 0 : index
    %c0_4 = arith.constant 0 : index
    %2 = vector.load %arg3[%c0_2, %c0_3, %c0_4] : memref<1x8x8xf32, #tpu.memory_space<vmem>>, vector<1x8x8xf32>
    %3 = vector.shape_cast %2 : vector<1x8x8xf32> to vector<8x8xf32>
    %cst = arith.constant 0.000000e+00 : f32
    %4 = vector.broadcast %cst : f32 to vector<8x8xf32>
    %5 = arith.cmpf oeq, %3, %4 : vector<8x8xf32>
    %cst_5 = arith.constant -1.000000e+20 : f32
    %cst_6 = arith.constant 0.000000e+00 : f32
    %6 = vector.broadcast %cst_5 : f32 to vector<8x8xf32>
    %7 = vector.broadcast %cst_6 : f32 to vector<8x8xf32>
    %8 = arith.select %5, %6, %7 : vector<8x8xi1>, vector<8x8xf32>
    %c0_7 = arith.constant 0 : index
    %c0_8 = arith.constant 0 : index
    %c0_9 = arith.constant 0 : index
    %9 = vector.load %arg1[%c0_7, %c0_8, %c0_9] : memref<1x8x1xi32, #tpu.memory_space<vmem>>, vector<1x8x1xi32>
    %10 = vector.shape_cast %9 : vector<1x8x1xi32> to vector<8x1xi32>
    %11 = tpu.iota {dimensions = array<i32: 1>} : vector<8x16xi32>
    %12 = vector.broadcast %10 : vector<8x1xi32> to vector<8x16xi32>
    %13 = arith.cmpi eq, %12, %11 : vector<8x16xi32>
    %14 = arith.extui %13 : vector<8x16xi1> to vector<8x16xi32>
    %15 = arith.sitofp %14 : vector<8x16xi32> to vector<8x16xf32>
    %c0_10 = arith.constant 0 : index
    %c0_11 = arith.constant 0 : index
    %16 = vector.load %arg5[%c0_10, %c0_11] : memref<16x32xf32, #tpu.memory_space<vmem>>, vector<16x32xf32>
    %cst_12 = arith.constant dense<0.000000e+00> : vector<8x32xf32>
    %17 = tpu.matmul %15, %16, %cst_12 {dimension_numbers = #tpu.dot_dimension_numbers<[1], [0], [0], [1], [0, 0, 1, 1], [], []>} : vector<8x16xf32>, vector<16x32xf32>, vector<8x32xf32> -> vector<8x32xf32>
    %cst_13 = arith.constant 5.65685415 : f32
    %18 = vector.broadcast %cst_13 : f32 to vector<8x32xf32>
    %19 = arith.mulf %17, %18 : vector<8x32xf32>
    %c0_14 = arith.constant 0 : index
    %c0_15 = arith.constant 0 : index
    %20 = vector.load %arg4[%c0_14, %c0_15] : memref<8x32xf32, #tpu.memory_space<vmem>>, vector<8x32xf32>
    %21 = arith.addf %19, %20 : vector<8x32xf32>
    %c0_16 = arith.constant 0 : index
    %c0_17 = arith.constant 0 : index
    %c0_18 = arith.constant 0 : index
    %22 = vector.load %arg6[%c0_16, %c0_17, %c0_18] : memref<2x32x96xf32, #tpu.memory_space<vmem>>, vector<1x32x96xf32>
    %23 = vector.shape_cast %22 : vector<1x32x96xf32> to vector<32x96xf32>
    %cst_19 = arith.constant dense<0.000000e+00> : vector<8x96xf32>
    %24 = tpu.matmul %1, %23, %cst_19 {dimension_numbers = #tpu.dot_dimension_numbers<[1], [0], [0], [1], [0, 0, 1, 1], [], []>} : vector<8x32xf32>, vector<32x96xf32>, vector<8x96xf32> -> vector<8x96xf32>
    %25 = vector.extract_strided_slice %24 {offsets = [0, 0], sizes = [8, 4], strides = [1, 1]} : vector<8x96xf32> to vector<8x4xf32>
    %26 = vector.extract_strided_slice %24 {offsets = [0, 4], sizes = [8, 4], strides = [1, 1]} : vector<8x96xf32> to vector<8x4xf32>
    %27 = vector.extract_strided_slice %24 {offsets = [0, 8], sizes = [8, 4], strides = [1, 1]} : vector<8x96xf32> to vector<8x4xf32>
    %28 = vector.extract_strided_slice %24 {offsets = [0, 12], sizes = [8, 4], strides = [1, 1]} : vector<8x96xf32> to vector<8x4xf32>
    %29 = vector.extract_strided_slice %24 {offsets = [0, 16], sizes = [8, 4], strides = [1, 1]} : vector<8x96xf32> to vector<8x4xf32>
    %30 = vector.extract_strided_slice %24 {offsets = [0, 20], sizes = [8, 4], strides = [1, 1]} : vector<8x96xf32> to vector<8x4xf32>
    %31 = vector.extract_strided_slice %24 {offsets = [0, 24], sizes = [8, 4], strides = [1, 1]} : vector<8x96xf32> to vector<8x4xf32>
    %32 = vector.extract_strided_slice %24 {offsets = [0, 28], sizes = [8, 4], strides = [1, 1]} : vector<8x96xf32> to vector<8x4xf32>
    %33 = vector.shape_cast %25 : vector<8x4xf32> to vector<1x8x4xf32>
    %34 = vector.shape_cast %26 : vector<8x4xf32> to vector<1x8x4xf32>
    %35 = vector.shape_cast %27 : vector<8x4xf32> to vector<1x8x4xf32>
    %36 = vector.shape_cast %28 : vector<8x4xf32> to vector<1x8x4xf32>
    %37 = vector.shape_cast %29 : vector<8x4xf32> to vector<1x8x4xf32>
    %38 = vector.shape_cast %30 : vector<8x4xf32> to vector<1x8x4xf32>
    %39 = vector.shape_cast %31 : vector<8x4xf32> to vector<1x8x4xf32>
    %40 = vector.shape_cast %32 : vector<8x4xf32> to vector<1x8x4xf32>
    %41 = tpu.concatenate %33, %34, %35, %36, %37, %38, %39, %40 in 0 : vector<1x8x4xf32>, vector<1x8x4xf32>, vector<1x8x4xf32>, vector<1x8x4xf32>, vector<1x8x4xf32>, vector<1x8x4xf32>, vector<1x8x4xf32>, vector<1x8x4xf32> -> vector<8x8x4xf32>
    %42 = vector.extract_strided_slice %24 {offsets = [0, 32], sizes = [8, 4], strides = [1, 1]} : vector<8x96xf32> to vector<8x4xf32>
    %43 = vector.extract_strided_slice %24 {offsets = [0, 36], sizes = [8, 4], strides = [1, 1]} : vector<8x96xf32> to vector<8x4xf32>
    %44 = vector.extract_strided_slice %24 {offsets = [0, 40], sizes = [8, 4], strides = [1, 1]} : vector<8x96xf32> to vector<8x4xf32>
    %45 = vector.extract_strided_slice %24 {offsets = [0, 44], sizes = [8, 4], strides = [1, 1]} : vector<8x96xf32> to vector<8x4xf32>
    %46 = vector.extract_strided_slice %24 {offsets = [0, 48], sizes = [8, 4], strides = [1, 1]} : vector<8x96xf32> to vector<8x4xf32>
    %47 = vector.extract_strided_slice %24 {offsets = [0, 52], sizes = [8, 4], strides = [1, 1]} : vector<8x96xf32> to vector<8x4xf32>
    %48 = vector.extract_strided_slice %24 {offsets = [0, 56], sizes = [8, 4], strides = [1, 1]} : vector<8x96xf32> to vector<8x4xf32>
    %49 = vector.extract_strided_slice %24 {offsets = [0, 60], sizes = [8, 4], strides = [1, 1]} : vector<8x96xf32> to vector<8x4xf32>
    %50 = vector.shape_cast %42 : vector<8x4xf32> to vector<1x8x4xf32>
    %51 = vector.shape_cast %43 : vector<8x4xf32> to vector<1x8x4xf32>
    %52 = vector.shape_cast %44 : vector<8x4xf32> to vector<1x8x4xf32>
    %53 = vector.shape_cast %45 : vector<8x4xf32> to vector<1x8x4xf32>
    %54 = vector.shape_cast %46 : vector<8x4xf32> to vector<1x8x4xf32>
    %55 = vector.shape_cast %47 : vector<8x4xf32> to vector<1x8x4xf32>
    %56 = vector.shape_cast %48 : vector<8x4xf32> to vector<1x8x4xf32>
    %57 = vector.shape_cast %49 : vector<8x4xf32> to vector<1x8x4xf32>
    %58 = tpu.concatenate %50, %51, %52, %53, %54, %55, %56, %57 in 0 : vector<1x8x4xf32>, vector<1x8x4xf32>, vector<1x8x4xf32>, vector<1x8x4xf32>, vector<1x8x4xf32>, vector<1x8x4xf32>, vector<1x8x4xf32>, vector<1x8x4xf32> -> vector<8x8x4xf32>
    %59 = vector.extract_strided_slice %24 {offsets = [0, 64], sizes = [8, 4], strides = [1, 1]} : vector<8x96xf32> to vector<8x4xf32>
    %60 = vector.extract_strided_slice %24 {offsets = [0, 68], sizes = [8, 4], strides = [1, 1]} : vector<8x96xf32> to vector<8x4xf32>
    %61 = vector.extract_strided_slice %24 {offsets = [0, 72], sizes = [8, 4], strides = [1, 1]} : vector<8x96xf32> to vector<8x4xf32>
    %62 = vector.extract_strided_slice %24 {offsets = [0, 76], sizes = [8, 4], strides = [1, 1]} : vector<8x96xf32> to vector<8x4xf32>
    %63 = vector.extract_strided_slice %24 {offsets = [0, 80], sizes = [8, 4], strides = [1, 1]} : vector<8x96xf32> to vector<8x4xf32>
    %64 = vector.extract_strided_slice %24 {offsets = [0, 84], sizes = [8, 4], strides = [1, 1]} : vector<8x96xf32> to vector<8x4xf32>
    %65 = vector.extract_strided_slice %24 {offsets = [0, 88], sizes = [8, 4], strides = [1, 1]} : vector<8x96xf32> to vector<8x4xf32>
    %66 = vector.extract_strided_slice %24 {offsets = [0, 92], sizes = [8, 4], strides = [1, 1]} : vector<8x96xf32> to vector<8x4xf32>
    %67 = vector.shape_cast %59 : vector<8x4xf32> to vector<1x8x4xf32>
    %68 = vector.shape_cast %60 : vector<8x4xf32> to vector<1x8x4xf32>
    %69 = vector.shape_cast %61 : vector<8x4xf32> to vector<1x8x4xf32>
    %70 = vector.shape_cast %62 : vector<8x4xf32> to vector<1x8x4xf32>
    %71 = vector.shape_cast %63 : vector<8x4xf32> to vector<1x8x4xf32>
    %72 = vector.shape_cast %64 : vector<8x4xf32> to vector<1x8x4xf32>
    %73 = vector.shape_cast %65 : vector<8x4xf32> to vector<1x8x4xf32>
    %74 = vector.shape_cast %66 : vector<8x4xf32> to vector<1x8x4xf32>
    %75 = tpu.concatenate %67, %68, %69, %70, %71, %72, %73, %74 in 0 : vector<1x8x4xf32>, vector<1x8x4xf32>, vector<1x8x4xf32>, vector<1x8x4xf32>, vector<1x8x4xf32>, vector<1x8x4xf32>, vector<1x8x4xf32>, vector<1x8x4xf32> -> vector<8x8x4xf32>
    %c0_20 = arith.constant 0 : index
    %c0_21 = arith.constant 0 : index
    %c0_22 = arith.constant 0 : index
    %c0_23 = arith.constant 0 : index
    %76 = vector.load %arg7[%c0_20, %c0_21, %c0_22, %c0_23] : memref<2x8x4x32xf32, #tpu.memory_space<vmem>>, vector<1x8x4x32xf32>
    %77 = vector.shape_cast %76 : vector<1x8x4x32xf32> to vector<8x4x32xf32>
    %c0_24 = arith.constant 0 : index
    %c0_25 = arith.constant 0 : index
    %c0_26 = arith.constant 0 : index
    %78 = vector.load %arg8[%c0_24, %c0_25, %c0_26] : memref<2x1x32xf32, #tpu.memory_space<vmem>>, vector<1x1x32xf32>
    %79 = vector.shape_cast %78 : vector<1x1x32xf32> to vector<1x32xf32>
    "tpu.trace_start"() <{level = 10 : i32, message = "hqd,hkd->hqk"}> : () -> ()
    %cst_27 = arith.constant dense<0.000000e+00> : vector<8x8x8xf32>
    %80 = tpu.matmul %41, %58, %cst_27 {dimension_numbers = #tpu.dot_dimension_numbers<[2], [2], [1], [1], [0, 0, 0, 1, 1, 1], [0], [0]>} : vector<8x8x4xf32>, vector<8x8x4xf32>, vector<8x8x8xf32> -> vector<8x8x8xf32>
    "tpu.trace_stop"() : () -> ()
    %81 = vector.shape_cast %8 : vector<8x8xf32> to vector<1x8x8xf32>
    %82 = vector.broadcast %81 : vector<1x8x8xf32> to vector<8x8x8xf32>
    %83 = arith.addf %80, %82 : vector<8x8x8xf32>
    %cst_28 = arith.constant dense<0xFF800000> : vector<8x8xf32>
    %84 = vector.multi_reduction <maximumf>, %83, %cst_28 [2] : vector<8x8x8xf32> to vector<8x8xf32>
    %85 = vector.shape_cast %84 : vector<8x8xf32> to vector<8x8x1xf32>
    %86 = vector.broadcast %85 : vector<8x8x1xf32> to vector<8x8x8xf32>
    %87 = arith.subf %83, %86 : vector<8x8x8xf32>
    %88 = math.exp %87 : vector<8x8x8xf32>
    %cst_29 = arith.constant dense<0.000000e+00> : vector<8x8xf32>
    %89 = vector.multi_reduction <add>, %88, %cst_29 [2] : vector<8x8x8xf32> to vector<8x8xf32>
    %90 = vector.shape_cast %89 : vector<8x8xf32> to vector<8x8x1xf32>
    %91 = tpu.reciprocal %90 {approx = true} : vector<8x8x1xf32> -> vector<8x8x1xf32>
    %92 = vector.broadcast %91 : vector<8x8x1xf32> to vector<8x8x8xf32>
    %93 = arith.mulf %88, %92 : vector<8x8x8xf32>
    "tpu.trace_start"() <{level = 10 : i32, message = "hqk,hkd->hqd"}> : () -> ()
    %cst_30 = arith.constant dense<0.000000e+00> : vector<8x8x4xf32>
    %94 = tpu.matmul %93, %75, %cst_30 {dimension_numbers = #tpu.dot_dimension_numbers<[2], [1], [1], [2], [0, 0, 0, 1, 1, 2], [0], [0]>} : vector<8x8x8xf32>, vector<8x8x4xf32>, vector<8x8x4xf32> -> vector<8x8x4xf32>
    "tpu.trace_stop"() : () -> ()
    "tpu.trace_start"() <{level = 10 : i32, message = "hqd,hde->hqe"}> : () -> ()
    %cst_31 = arith.constant dense<0.000000e+00> : vector<8x8x32xf32>
    %95 = tpu.matmul %94, %77, %cst_31 {dimension_numbers = #tpu.dot_dimension_numbers<[2], [1], [1], [2], [0, 0, 0, 1, 1, 2], [0], [0]>} : vector<8x8x4xf32>, vector<8x4x32xf32>, vector<8x8x32xf32> -> vector<8x8x32xf32>
    "tpu.trace_stop"() : () -> ()
    %cst_32 = arith.constant dense<0.000000e+00> : vector<8x32xf32>
    %96 = vector.multi_reduction <add>, %95, %cst_32 [0] : vector<8x8x32xf32> to vector<8x32xf32>
    %97 = vector.broadcast %79 : vector<1x32xf32> to vector<8x32xf32>
    %98 = arith.addf %96, %97 : vector<8x32xf32>
    %99 = arith.addf %98, %1 : vector<8x32xf32>
    %c0_33 = arith.constant 0 : index
    %c0_34 = arith.constant 0 : index
    %c0_35 = arith.constant 0 : index
    %c0_36 = arith.constant 0 : index
    %100 = vector.load %arg14[%c0_33, %c0_34, %c0_35, %c0_36] : memref<2x3x1x32xf32, #tpu.memory_space<vmem>>, vector<1x1x1x32xf32>
    %101 = vector.shape_cast %100 : vector<1x1x1x32xf32> to vector<1x32xf32>
    %c0_37 = arith.constant 0 : index
    %c0_38 = arith.constant 0 : index
    %c0_39 = arith.constant 0 : index
    %c0_40 = arith.constant 0 : index
    %102 = vector.load %arg15[%c0_37, %c0_38, %c0_39, %c0_40] : memref<2x3x1x32xf32, #tpu.memory_space<vmem>>, vector<1x1x1x32xf32>
    %103 = vector.shape_cast %102 : vector<1x1x1x32xf32> to vector<1x32xf32>
    %cst_41 = arith.constant dense<0.000000e+00> : vector<8xf32>
    %104 = vector.multi_reduction <add>, %99, %cst_41 [1] : vector<8x32xf32> to vector<8xf32>
    %105 = vector.shape_cast %104 : vector<8xf32> to vector<8x1xf32>
    %cst_42 = arith.constant 3.200000e+01 : f32
    %106 = vector.broadcast %cst_42 : f32 to vector<8x1xf32>
    %107 = arith.divf %105, %106 : vector<8x1xf32>
    %108 = vector.broadcast %107 : vector<8x1xf32> to vector<8x32xf32>
    %109 = arith.subf %99, %108 : vector<8x32xf32>
    %110 = arith.mulf %109, %109 : vector<8x32xf32>
    %cst_43 = arith.constant dense<0.000000e+00> : vector<8xf32>
    %111 = vector.multi_reduction <add>, %110, %cst_43 [1] : vector<8x32xf32> to vector<8xf32>
    %112 = vector.shape_cast %111 : vector<8xf32> to vector<8x1xf32>
    %cst_44 = arith.constant 3.200000e+01 : f32
    %113 = vector.broadcast %cst_44 : f32 to vector<8x1xf32>
    %114 = arith.divf %112, %113 : vector<8x1xf32>
    %cst_45 = arith.constant 9.99999974E-6 : f32
    %115 = vector.broadcast %cst_45 : f32 to vector<8x1xf32>
    %116 = arith.addf %114, %115 : vector<8x1xf32>
    %117 = math.rsqrt %116 : vector<8x1xf32>
    %118 = vector.broadcast %117 : vector<8x1xf32> to vector<8x32xf32>
    %119 = arith.mulf %109, %118 : vector<8x32xf32>
    %120 = vector.broadcast %101 : vector<1x32xf32> to vector<8x32xf32>
    %121 = arith.mulf %119, %120 : vector<8x32xf32>
    %122 = vector.broadcast %103 : vector<1x32xf32> to vector<8x32xf32>
    %123 = arith.addf %121, %122 : vector<8x32xf32>
    %c0_46 = arith.constant 0 : index
    %c0_47 = arith.constant 0 : index
    %c0_48 = arith.constant 0 : index
    %124 = vector.load %arg9[%c0_46, %c0_47, %c0_48] : memref<2x32x32xf32, #tpu.memory_space<vmem>>, vector<1x32x32xf32>
    %125 = vector.shape_cast %124 : vector<1x32x32xf32> to vector<32x32xf32>
    %cst_49 = arith.constant dense<0.000000e+00> : vector<8x32xf32>
    %126 = tpu.matmul %21, %125, %cst_49 {dimension_numbers = #tpu.dot_dimension_numbers<[1], [0], [0], [1], [0, 0, 1, 1], [], []>} : vector<8x32xf32>, vector<32x32xf32>, vector<8x32xf32> -> vector<8x32xf32>
    %c0_50 = arith.constant 0 : index
    %c0_51 = arith.constant 0 : index
    %c0_52 = arith.constant 0 : index
    %127 = vector.load %arg10[%c0_50, %c0_51, %c0_52] : memref<2x32x32xf32, #tpu.memory_space<vmem>>, vector<1x32x32xf32>
    %128 = vector.shape_cast %127 : vector<1x32x32xf32> to vector<32x32xf32>
    %cst_53 = arith.constant dense<0.000000e+00> : vector<8x32xf32>
    %129 = tpu.matmul %1, %128, %cst_53 {dimension_numbers = #tpu.dot_dimension_numbers<[1], [0], [0], [1], [0, 0, 1, 1], [], []>} : vector<8x32xf32>, vector<32x32xf32>, vector<8x32xf32> -> vector<8x32xf32>
    %c0_54 = arith.constant 0 : index
    %c0_55 = arith.constant 0 : index
    %c0_56 = arith.constant 0 : index
    %130 = vector.load %arg11[%c0_54, %c0_55, %c0_56] : memref<2x32x32xf32, #tpu.memory_space<vmem>>, vector<1x32x32xf32>
    %131 = vector.shape_cast %130 : vector<1x32x32xf32> to vector<32x32xf32>
    %cst_57 = arith.constant dense<0.000000e+00> : vector<8x32xf32>
    %132 = tpu.matmul %123, %131, %cst_57 {dimension_numbers = #tpu.dot_dimension_numbers<[1], [0], [0], [1], [0, 0, 1, 1], [], []>} : vector<8x32xf32>, vector<32x32xf32>, vector<8x32xf32> -> vector<8x32xf32>
    %133 = vector.extract_strided_slice %126 {offsets = [0, 0], sizes = [8, 4], strides = [1, 1]} : vector<8x32xf32> to vector<8x4xf32>
    %134 = vector.extract_strided_slice %126 {offsets = [0, 4], sizes = [8, 4], strides = [1, 1]} : vector<8x32xf32> to vector<8x4xf32>
    %135 = vector.extract_strided_slice %126 {offsets = [0, 8], sizes = [8, 4], strides = [1, 1]} : vector<8x32xf32> to vector<8x4xf32>
    %136 = vector.extract_strided_slice %126 {offsets = [0, 12], sizes = [8, 4], strides = [1, 1]} : vector<8x32xf32> to vector<8x4xf32>
    %137 = vector.extract_strided_slice %126 {offsets = [0, 16], sizes = [8, 4], strides = [1, 1]} : vector<8x32xf32> to vector<8x4xf32>
    %138 = vector.extract_strided_slice %126 {offsets = [0, 20], sizes = [8, 4], strides = [1, 1]} : vector<8x32xf32> to vector<8x4xf32>
    %139 = vector.extract_strided_slice %126 {offsets = [0, 24], sizes = [8, 4], strides = [1, 1]} : vector<8x32xf32> to vector<8x4xf32>
    %140 = vector.extract_strided_slice %126 {offsets = [0, 28], sizes = [8, 4], strides = [1, 1]} : vector<8x32xf32> to vector<8x4xf32>
    %141 = vector.shape_cast %133 : vector<8x4xf32> to vector<1x8x4xf32>
    %142 = vector.shape_cast %134 : vector<8x4xf32> to vector<1x8x4xf32>
    %143 = vector.shape_cast %135 : vector<8x4xf32> to vector<1x8x4xf32>
    %144 = vector.shape_cast %136 : vector<8x4xf32> to vector<1x8x4xf32>
    %145 = vector.shape_cast %137 : vector<8x4xf32> to vector<1x8x4xf32>
    %146 = vector.shape_cast %138 : vector<8x4xf32> to vector<1x8x4xf32>
    %147 = vector.shape_cast %139 : vector<8x4xf32> to vector<1x8x4xf32>
    %148 = vector.shape_cast %140 : vector<8x4xf32> to vector<1x8x4xf32>
    %149 = tpu.concatenate %141, %142, %143, %144, %145, %146, %147, %148 in 0 : vector<1x8x4xf32>, vector<1x8x4xf32>, vector<1x8x4xf32>, vector<1x8x4xf32>, vector<1x8x4xf32>, vector<1x8x4xf32>, vector<1x8x4xf32>, vector<1x8x4xf32> -> vector<8x8x4xf32>
    %150 = vector.extract_strided_slice %129 {offsets = [0, 0], sizes = [8, 4], strides = [1, 1]} : vector<8x32xf32> to vector<8x4xf32>
    %151 = vector.extract_strided_slice %129 {offsets = [0, 4], sizes = [8, 4], strides = [1, 1]} : vector<8x32xf32> to vector<8x4xf32>
    %152 = vector.extract_strided_slice %129 {offsets = [0, 8], sizes = [8, 4], strides = [1, 1]} : vector<8x32xf32> to vector<8x4xf32>
    %153 = vector.extract_strided_slice %129 {offsets = [0, 12], sizes = [8, 4], strides = [1, 1]} : vector<8x32xf32> to vector<8x4xf32>
    %154 = vector.extract_strided_slice %129 {offsets = [0, 16], sizes = [8, 4], strides = [1, 1]} : vector<8x32xf32> to vector<8x4xf32>
    %155 = vector.extract_strided_slice %129 {offsets = [0, 20], sizes = [8, 4], strides = [1, 1]} : vector<8x32xf32> to vector<8x4xf32>
    %156 = vector.extract_strided_slice %129 {offsets = [0, 24], sizes = [8, 4], strides = [1, 1]} : vector<8x32xf32> to vector<8x4xf32>
    %157 = vector.extract_strided_slice %129 {offsets = [0, 28], sizes = [8, 4], strides = [1, 1]} : vector<8x32xf32> to vector<8x4xf32>
    %158 = vector.shape_cast %150 : vector<8x4xf32> to vector<1x8x4xf32>
    %159 = vector.shape_cast %151 : vector<8x4xf32> to vector<1x8x4xf32>
    %160 = vector.shape_cast %152 : vector<8x4xf32> to vector<1x8x4xf32>
    %161 = vector.shape_cast %153 : vector<8x4xf32> to vector<1x8x4xf32>
    %162 = vector.shape_cast %154 : vector<8x4xf32> to vector<1x8x4xf32>
    %163 = vector.shape_cast %155 : vector<8x4xf32> to vector<1x8x4xf32>
    %164 = vector.shape_cast %156 : vector<8x4xf32> to vector<1x8x4xf32>
    %165 = vector.shape_cast %157 : vector<8x4xf32> to vector<1x8x4xf32>
    %166 = tpu.concatenate %158, %159, %160, %161, %162, %163, %164, %165 in 0 : vector<1x8x4xf32>, vector<1x8x4xf32>, vector<1x8x4xf32>, vector<1x8x4xf32>, vector<1x8x4xf32>, vector<1x8x4xf32>, vector<1x8x4xf32>, vector<1x8x4xf32> -> vector<8x8x4xf32>
    %167 = vector.extract_strided_slice %132 {offsets = [0, 0], sizes = [8, 4], strides = [1, 1]} : vector<8x32xf32> to vector<8x4xf32>
    %168 = vector.extract_strided_slice %132 {offsets = [0, 4], sizes = [8, 4], strides = [1, 1]} : vector<8x32xf32> to vector<8x4xf32>
    %169 = vector.extract_strided_slice %132 {offsets = [0, 8], sizes = [8, 4], strides = [1, 1]} : vector<8x32xf32> to vector<8x4xf32>
    %170 = vector.extract_strided_slice %132 {offsets = [0, 12], sizes = [8, 4], strides = [1, 1]} : vector<8x32xf32> to vector<8x4xf32>
    %171 = vector.extract_strided_slice %132 {offsets = [0, 16], sizes = [8, 4], strides = [1, 1]} : vector<8x32xf32> to vector<8x4xf32>
    %172 = vector.extract_strided_slice %132 {offsets = [0, 20], sizes = [8, 4], strides = [1, 1]} : vector<8x32xf32> to vector<8x4xf32>
    %173 = vector.extract_strided_slice %132 {offsets = [0, 24], sizes = [8, 4], strides = [1, 1]} : vector<8x32xf32> to vector<8x4xf32>
    %174 = vector.extract_strided_slice %132 {offsets = [0, 28], sizes = [8, 4], strides = [1, 1]} : vector<8x32xf32> to vector<8x4xf32>
    %175 = vector.shape_cast %167 : vector<8x4xf32> to vector<1x8x4xf32>
    %176 = vector.shape_cast %168 : vector<8x4xf32> to vector<1x8x4xf32>
    %177 = vector.shape_cast %169 : vector<8x4xf32> to vector<1x8x4xf32>
    %178 = vector.shape_cast %170 : vector<8x4xf32> to vector<1x8x4xf32>
    %179 = vector.shape_cast %171 : vector<8x4xf32> to vector<1x8x4xf32>
    %180 = vector.shape_cast %172 : vector<8x4xf32> to vector<1x8x4xf32>
    %181 = vector.shape_cast %173 : vector<8x4xf32> to vector<1x8x4xf32>
    %182 = vector.shape_cast %174 : vector<8x4xf32> to vector<1x8x4xf32>
    %183 = tpu.concatenate %175, %176, %177, %178, %179, %180, %181, %182 in 0 : vector<1x8x4xf32>, vector<1x8x4xf32>, vector<1x8x4xf32>, vector<1x8x4xf32>, vector<1x8x4xf32>, vector<1x8x4xf32>, vector<1x8x4xf32>, vector<1x8x4xf32> -> vector<8x8x4xf32>
    %c0_58 = arith.constant 0 : index
    %c0_59 = arith.constant 0 : index
    %c0_60 = arith.constant 0 : index
    %c0_61 = arith.constant 0 : index
    %184 = vector.load %arg12[%c0_58, %c0_59, %c0_60, %c0_61] : memref<2x8x4x32xf32, #tpu.memory_space<vmem>>, vector<1x8x4x32xf32>
    %185 = vector.shape_cast %184 : vector<1x8x4x32xf32> to vector<8x4x32xf32>
    %c0_62 = arith.constant 0 : index
    %c0_63 = arith.constant 0 : index
    %c0_64 = arith.constant 0 : index
    %186 = vector.load %arg13[%c0_62, %c0_63, %c0_64] : memref<2x1x32xf32, #tpu.memory_space<vmem>>, vector<1x1x32xf32>
    %187 = vector.shape_cast %186 : vector<1x1x32xf32> to vector<1x32xf32>
    "tpu.trace_start"() <{level = 10 : i32, message = "hqd,hkd->hqk"}> : () -> ()
    %cst_65 = arith.constant dense<0.000000e+00> : vector<8x8x8xf32>
    %188 = tpu.matmul %149, %166, %cst_65 {dimension_numbers = #tpu.dot_dimension_numbers<[2], [2], [1], [1], [0, 0, 0, 1, 1, 1], [0], [0]>} : vector<8x8x4xf32>, vector<8x8x4xf32>, vector<8x8x8xf32> -> vector<8x8x8xf32>
    "tpu.trace_stop"() : () -> ()
    %cst_66 = arith.constant dense<0xFF800000> : vector<8x8xf32>
    %189 = vector.multi_reduction <maximumf>, %188, %cst_66 [2] : vector<8x8x8xf32> to vector<8x8xf32>
    %190 = vector.shape_cast %189 : vector<8x8xf32> to vector<8x8x1xf32>
    %191 = vector.broadcast %190 : vector<8x8x1xf32> to vector<8x8x8xf32>
    %192 = arith.subf %188, %191 : vector<8x8x8xf32>
    %193 = math.exp %192 : vector<8x8x8xf32>
    %cst_67 = arith.constant dense<0.000000e+00> : vector<8x8xf32>
    %194 = vector.multi_reduction <add>, %193, %cst_67 [2] : vector<8x8x8xf32> to vector<8x8xf32>
    %195 = vector.shape_cast %194 : vector<8x8xf32> to vector<8x8x1xf32>
    %196 = tpu.reciprocal %195 {approx = true} : vector<8x8x1xf32> -> vector<8x8x1xf32>
    %197 = vector.broadcast %196 : vector<8x8x1xf32> to vector<8x8x8xf32>
    %198 = arith.mulf %193, %197 : vector<8x8x8xf32>
    "tpu.trace_start"() <{level = 10 : i32, message = "hqk,hkd->hqd"}> : () -> ()
    %cst_68 = arith.constant dense<0.000000e+00> : vector<8x8x4xf32>
    %199 = tpu.matmul %198, %183, %cst_68 {dimension_numbers = #tpu.dot_dimension_numbers<[2], [1], [1], [2], [0, 0, 0, 1, 1, 2], [0], [0]>} : vector<8x8x8xf32>, vector<8x8x4xf32>, vector<8x8x4xf32> -> vector<8x8x4xf32>
    "tpu.trace_stop"() : () -> ()
    "tpu.trace_start"() <{level = 10 : i32, message = "hqd,hde->hqe"}> : () -> ()
    %cst_69 = arith.constant dense<0.000000e+00> : vector<8x8x32xf32>
    %200 = tpu.matmul %199, %185, %cst_69 {dimension_numbers = #tpu.dot_dimension_numbers<[2], [1], [1], [2], [0, 0, 0, 1, 1, 2], [0], [0]>} : vector<8x8x4xf32>, vector<8x4x32xf32>, vector<8x8x32xf32> -> vector<8x8x32xf32>
    "tpu.trace_stop"() : () -> ()
    %cst_70 = arith.constant dense<0.000000e+00> : vector<8x32xf32>
    %201 = vector.multi_reduction <add>, %200, %cst_70 [0] : vector<8x8x32xf32> to vector<8x32xf32>
    %202 = vector.broadcast %187 : vector<1x32xf32> to vector<8x32xf32>
    %203 = arith.addf %201, %202 : vector<8x32xf32>
    %204 = arith.addf %203, %123 : vector<8x32xf32>
    %c0_71 = arith.constant 0 : index
    %c1 = arith.constant 1 : index
    %c0_72 = arith.constant 0 : index
    %c0_73 = arith.constant 0 : index
    %205 = vector.load %arg14[%c0_71, %c1, %c0_72, %c0_73] : memref<2x3x1x32xf32, #tpu.memory_space<vmem>>, vector<1x1x1x32xf32>
    %206 = vector.shape_cast %205 : vector<1x1x1x32xf32> to vector<1x32xf32>
    %c0_74 = arith.constant 0 : index
    %c1_75 = arith.constant 1 : index
    %c0_76 = arith.constant 0 : index
    %c0_77 = arith.constant 0 : index
    %207 = vector.load %arg15[%c0_74, %c1_75, %c0_76, %c0_77] : memref<2x3x1x32xf32, #tpu.memory_space<vmem>>, vector<1x1x1x32xf32>
    %208 = vector.shape_cast %207 : vector<1x1x1x32xf32> to vector<1x32xf32>
    %cst_78 = arith.constant dense<0.000000e+00> : vector<8xf32>
    %209 = vector.multi_reduction <add>, %204, %cst_78 [1] : vector<8x32xf32> to vector<8xf32>
    %210 = vector.shape_cast %209 : vector<8xf32> to vector<8x1xf32>
    %cst_79 = arith.constant 3.200000e+01 : f32
    %211 = vector.broadcast %cst_79 : f32 to vector<8x1xf32>
    %212 = arith.divf %210, %211 : vector<8x1xf32>
    %213 = vector.broadcast %212 : vector<8x1xf32> to vector<8x32xf32>
    %214 = arith.subf %204, %213 : vector<8x32xf32>
    %215 = arith.mulf %214, %214 : vector<8x32xf32>
    %cst_80 = arith.constant dense<0.000000e+00> : vector<8xf32>
    %216 = vector.multi_reduction <add>, %215, %cst_80 [1] : vector<8x32xf32> to vector<8xf32>
    %217 = vector.shape_cast %216 : vector<8xf32> to vector<8x1xf32>
    %cst_81 = arith.constant 3.200000e+01 : f32
    %218 = vector.broadcast %cst_81 : f32 to vector<8x1xf32>
    %219 = arith.divf %217, %218 : vector<8x1xf32>
    %cst_82 = arith.constant 9.99999974E-6 : f32
    %220 = vector.broadcast %cst_82 : f32 to vector<8x1xf32>
    %221 = arith.addf %219, %220 : vector<8x1xf32>
    %222 = math.rsqrt %221 : vector<8x1xf32>
    %223 = vector.broadcast %222 : vector<8x1xf32> to vector<8x32xf32>
    %224 = arith.mulf %214, %223 : vector<8x32xf32>
    %225 = vector.broadcast %206 : vector<1x32xf32> to vector<8x32xf32>
    %226 = arith.mulf %224, %225 : vector<8x32xf32>
    %227 = vector.broadcast %208 : vector<1x32xf32> to vector<8x32xf32>
    %228 = arith.addf %226, %227 : vector<8x32xf32>
    %c0_83 = arith.constant 0 : index
    %c0_84 = arith.constant 0 : index
    %c0_85 = arith.constant 0 : index
    %229 = vector.load %arg16[%c0_83, %c0_84, %c0_85] : memref<2x32x128xf32, #tpu.memory_space<vmem>>, vector<1x32x128xf32>
    %230 = vector.shape_cast %229 : vector<1x32x128xf32> to vector<32x128xf32>
    %cst_86 = arith.constant dense<0.000000e+00> : vector<8x128xf32>
    %231 = tpu.matmul %228, %230, %cst_86 {dimension_numbers = #tpu.dot_dimension_numbers<[1], [0], [0], [1], [0, 0, 1, 1], [], []>} : vector<8x32xf32>, vector<32x128xf32>, vector<8x128xf32> -> vector<8x128xf32>
    %c0_87 = arith.constant 0 : index
    %c0_88 = arith.constant 0 : index
    %c0_89 = arith.constant 0 : index
    %232 = vector.load %arg17[%c0_87, %c0_88, %c0_89] : memref<2x1x128xf32, #tpu.memory_space<vmem>>, vector<1x1x128xf32>
    %233 = vector.shape_cast %232 : vector<1x1x128xf32> to vector<1x128xf32>
    %234 = vector.broadcast %233 : vector<1x128xf32> to vector<8x128xf32>
    %235 = arith.addf %231, %234 : vector<8x128xf32>
    %cst_90 = arith.constant 0.000000e+00 : f32
    %236 = vector.broadcast %cst_90 : f32 to vector<8x128xf32>
    %237 = arith.maximumf %235, %236 : vector<8x128xf32>
    %c0_91 = arith.constant 0 : index
    %c0_92 = arith.constant 0 : index
    %c0_93 = arith.constant 0 : index
    %238 = vector.load %arg18[%c0_91, %c0_92, %c0_93] : memref<2x128x32xf32, #tpu.memory_space<vmem>>, vector<1x128x32xf32>
    %239 = vector.shape_cast %238 : vector<1x128x32xf32> to vector<128x32xf32>
    %cst_94 = arith.constant dense<0.000000e+00> : vector<8x32xf32>
    %240 = tpu.matmul %237, %239, %cst_94 {dimension_numbers = #tpu.dot_dimension_numbers<[1], [0], [0], [1], [0, 0, 1, 1], [], []>} : vector<8x128xf32>, vector<128x32xf32>, vector<8x32xf32> -> vector<8x32xf32>
    %c0_95 = arith.constant 0 : index
    %c0_96 = arith.constant 0 : index
    %c0_97 = arith.constant 0 : index
    %241 = vector.load %arg19[%c0_95, %c0_96, %c0_97] : memref<2x1x32xf32, #tpu.memory_space<vmem>>, vector<1x1x32xf32>
    %242 = vector.shape_cast %241 : vector<1x1x32xf32> to vector<1x32xf32>
    %243 = vector.broadcast %242 : vector<1x32xf32> to vector<8x32xf32>
    %244 = arith.addf %240, %243 : vector<8x32xf32>
    %245 = arith.addf %244, %228 : vector<8x32xf32>
    %c0_98 = arith.constant 0 : index
    %c2 = arith.constant 2 : index
    %c0_99 = arith.constant 0 : index
    %c0_100 = arith.constant 0 : index
    %246 = vector.load %arg14[%c0_98, %c2, %c0_99, %c0_100] : memref<2x3x1x32xf32, #tpu.memory_space<vmem>>, vector<1x1x1x32xf32>
    %247 = vector.shape_cast %246 : vector<1x1x1x32xf32> to vector<1x32xf32>
    %c0_101 = arith.constant 0 : index
    %c2_102 = arith.constant 2 : index
    %c0_103 = arith.constant 0 : index
    %c0_104 = arith.constant 0 : index
    %248 = vector.load %arg15[%c0_101, %c2_102, %c0_103, %c0_104] : memref<2x3x1x32xf32, #tpu.memory_space<vmem>>, vector<1x1x1x32xf32>
    %249 = vector.shape_cast %248 : vector<1x1x1x32xf32> to vector<1x32xf32>
    %cst_105 = arith.constant dense<0.000000e+00> : vector<8xf32>
    %250 = vector.multi_reduction <add>, %245, %cst_105 [1] : vector<8x32xf32> to vector<8xf32>
    %251 = vector.shape_cast %250 : vector<8xf32> to vector<8x1xf32>
    %cst_106 = arith.constant 3.200000e+01 : f32
    %252 = vector.broadcast %cst_106 : f32 to vector<8x1xf32>
    %253 = arith.divf %251, %252 : vector<8x1xf32>
    %254 = vector.broadcast %253 : vector<8x1xf32> to vector<8x32xf32>
    %255 = arith.subf %245, %254 : vector<8x32xf32>
    %256 = arith.mulf %255, %255 : vector<8x32xf32>
    %cst_107 = arith.constant dense<0.000000e+00> : vector<8xf32>
    %257 = vector.multi_reduction <add>, %256, %cst_107 [1] : vector<8x32xf32> to vector<8xf32>
    %258 = vector.shape_cast %257 : vector<8xf32> to vector<8x1xf32>
    %cst_108 = arith.constant 3.200000e+01 : f32
    %259 = vector.broadcast %cst_108 : f32 to vector<8x1xf32>
    %260 = arith.divf %258, %259 : vector<8x1xf32>
    %cst_109 = arith.constant 9.99999974E-6 : f32
    %261 = vector.broadcast %cst_109 : f32 to vector<8x1xf32>
    %262 = arith.addf %260, %261 : vector<8x1xf32>
    %263 = math.rsqrt %262 : vector<8x1xf32>
    %264 = vector.broadcast %263 : vector<8x1xf32> to vector<8x32xf32>
    %265 = arith.mulf %255, %264 : vector<8x32xf32>
    %266 = vector.broadcast %247 : vector<1x32xf32> to vector<8x32xf32>
    %267 = arith.mulf %265, %266 : vector<8x32xf32>
    %268 = vector.broadcast %249 : vector<1x32xf32> to vector<8x32xf32>
    %269 = arith.addf %267, %268 : vector<8x32xf32>
    %c1_110 = arith.constant 1 : index
    %c0_111 = arith.constant 0 : index
    %c0_112 = arith.constant 0 : index
    %270 = vector.load %arg6[%c1_110, %c0_111, %c0_112] : memref<2x32x96xf32, #tpu.memory_space<vmem>>, vector<1x32x96xf32>
    %271 = vector.shape_cast %270 : vector<1x32x96xf32> to vector<32x96xf32>
    %cst_113 = arith.constant dense<0.000000e+00> : vector<8x96xf32>
    %272 = tpu.matmul %1, %271, %cst_113 {dimension_numbers = #tpu.dot_dimension_numbers<[1], [0], [0], [1], [0, 0, 1, 1], [], []>} : vector<8x32xf32>, vector<32x96xf32>, vector<8x96xf32> -> vector<8x96xf32>
    %273 = vector.extract_strided_slice %272 {offsets = [0, 0], sizes = [8, 4], strides = [1, 1]} : vector<8x96xf32> to vector<8x4xf32>
    %274 = vector.extract_strided_slice %272 {offsets = [0, 4], sizes = [8, 4], strides = [1, 1]} : vector<8x96xf32> to vector<8x4xf32>
    %275 = vector.extract_strided_slice %272 {offsets = [0, 8], sizes = [8, 4], strides = [1, 1]} : vector<8x96xf32> to vector<8x4xf32>
    %276 = vector.extract_strided_slice %272 {offsets = [0, 12], sizes = [8, 4], strides = [1, 1]} : vector<8x96xf32> to vector<8x4xf32>
    %277 = vector.extract_strided_slice %272 {offsets = [0, 16], sizes = [8, 4], strides = [1, 1]} : vector<8x96xf32> to vector<8x4xf32>
    %278 = vector.extract_strided_slice %272 {offsets = [0, 20], sizes = [8, 4], strides = [1, 1]} : vector<8x96xf32> to vector<8x4xf32>
    %279 = vector.extract_strided_slice %272 {offsets = [0, 24], sizes = [8, 4], strides = [1, 1]} : vector<8x96xf32> to vector<8x4xf32>
    %280 = vector.extract_strided_slice %272 {offsets = [0, 28], sizes = [8, 4], strides = [1, 1]} : vector<8x96xf32> to vector<8x4xf32>
    %281 = vector.shape_cast %273 : vector<8x4xf32> to vector<1x8x4xf32>
    %282 = vector.shape_cast %274 : vector<8x4xf32> to vector<1x8x4xf32>
    %283 = vector.shape_cast %275 : vector<8x4xf32> to vector<1x8x4xf32>
    %284 = vector.shape_cast %276 : vector<8x4xf32> to vector<1x8x4xf32>
    %285 = vector.shape_cast %277 : vector<8x4xf32> to vector<1x8x4xf32>
    %286 = vector.shape_cast %278 : vector<8x4xf32> to vector<1x8x4xf32>
    %287 = vector.shape_cast %279 : vector<8x4xf32> to vector<1x8x4xf32>
    %288 = vector.shape_cast %280 : vector<8x4xf32> to vector<1x8x4xf32>
    %289 = tpu.concatenate %281, %282, %283, %284, %285, %286, %287, %288 in 0 : vector<1x8x4xf32>, vector<1x8x4xf32>, vector<1x8x4xf32>, vector<1x8x4xf32>, vector<1x8x4xf32>, vector<1x8x4xf32>, vector<1x8x4xf32>, vector<1x8x4xf32> -> vector<8x8x4xf32>
    %290 = vector.extract_strided_slice %272 {offsets = [0, 32], sizes = [8, 4], strides = [1, 1]} : vector<8x96xf32> to vector<8x4xf32>
    %291 = vector.extract_strided_slice %272 {offsets = [0, 36], sizes = [8, 4], strides = [1, 1]} : vector<8x96xf32> to vector<8x4xf32>
    %292 = vector.extract_strided_slice %272 {offsets = [0, 40], sizes = [8, 4], strides = [1, 1]} : vector<8x96xf32> to vector<8x4xf32>
    %293 = vector.extract_strided_slice %272 {offsets = [0, 44], sizes = [8, 4], strides = [1, 1]} : vector<8x96xf32> to vector<8x4xf32>
    %294 = vector.extract_strided_slice %272 {offsets = [0, 48], sizes = [8, 4], strides = [1, 1]} : vector<8x96xf32> to vector<8x4xf32>
    %295 = vector.extract_strided_slice %272 {offsets = [0, 52], sizes = [8, 4], strides = [1, 1]} : vector<8x96xf32> to vector<8x4xf32>
    %296 = vector.extract_strided_slice %272 {offsets = [0, 56], sizes = [8, 4], strides = [1, 1]} : vector<8x96xf32> to vector<8x4xf32>
    %297 = vector.extract_strided_slice %272 {offsets = [0, 60], sizes = [8, 4], strides = [1, 1]} : vector<8x96xf32> to vector<8x4xf32>
    %298 = vector.shape_cast %290 : vector<8x4xf32> to vector<1x8x4xf32>
    %299 = vector.shape_cast %291 : vector<8x4xf32> to vector<1x8x4xf32>
    %300 = vector.shape_cast %292 : vector<8x4xf32> to vector<1x8x4xf32>
    %301 = vector.shape_cast %293 : vector<8x4xf32> to vector<1x8x4xf32>
    %302 = vector.shape_cast %294 : vector<8x4xf32> to vector<1x8x4xf32>
    %303 = vector.shape_cast %295 : vector<8x4xf32> to vector<1x8x4xf32>
    %304 = vector.shape_cast %296 : vector<8x4xf32> to vector<1x8x4xf32>
    %305 = vector.shape_cast %297 : vector<8x4xf32> to vector<1x8x4xf32>
    %306 = tpu.concatenate %298, %299, %300, %301, %302, %303, %304, %305 in 0 : vector<1x8x4xf32>, vector<1x8x4xf32>, vector<1x8x4xf32>, vector<1x8x4xf32>, vector<1x8x4xf32>, vector<1x8x4xf32>, vector<1x8x4xf32>, vector<1x8x4xf32> -> vector<8x8x4xf32>
    %307 = vector.extract_strided_slice %272 {offsets = [0, 64], sizes = [8, 4], strides = [1, 1]} : vector<8x96xf32> to vector<8x4xf32>
    %308 = vector.extract_strided_slice %272 {offsets = [0, 68], sizes = [8, 4], strides = [1, 1]} : vector<8x96xf32> to vector<8x4xf32>
    %309 = vector.extract_strided_slice %272 {offsets = [0, 72], sizes = [8, 4], strides = [1, 1]} : vector<8x96xf32> to vector<8x4xf32>
    %310 = vector.extract_strided_slice %272 {offsets = [0, 76], sizes = [8, 4], strides = [1, 1]} : vector<8x96xf32> to vector<8x4xf32>
    %311 = vector.extract_strided_slice %272 {offsets = [0, 80], sizes = [8, 4], strides = [1, 1]} : vector<8x96xf32> to vector<8x4xf32>
    %312 = vector.extract_strided_slice %272 {offsets = [0, 84], sizes = [8, 4], strides = [1, 1]} : vector<8x96xf32> to vector<8x4xf32>
    %313 = vector.extract_strided_slice %272 {offsets = [0, 88], sizes = [8, 4], strides = [1, 1]} : vector<8x96xf32> to vector<8x4xf32>
    %314 = vector.extract_strided_slice %272 {offsets = [0, 92], sizes = [8, 4], strides = [1, 1]} : vector<8x96xf32> to vector<8x4xf32>
    %315 = vector.shape_cast %307 : vector<8x4xf32> to vector<1x8x4xf32>
    %316 = vector.shape_cast %308 : vector<8x4xf32> to vector<1x8x4xf32>
    %317 = vector.shape_cast %309 : vector<8x4xf32> to vector<1x8x4xf32>
    %318 = vector.shape_cast %310 : vector<8x4xf32> to vector<1x8x4xf32>
    %319 = vector.shape_cast %311 : vector<8x4xf32> to vector<1x8x4xf32>
    %320 = vector.shape_cast %312 : vector<8x4xf32> to vector<1x8x4xf32>
    %321 = vector.shape_cast %313 : vector<8x4xf32> to vector<1x8x4xf32>
    %322 = vector.shape_cast %314 : vector<8x4xf32> to vector<1x8x4xf32>
    %323 = tpu.concatenate %315, %316, %317, %318, %319, %320, %321, %322 in 0 : vector<1x8x4xf32>, vector<1x8x4xf32>, vector<1x8x4xf32>, vector<1x8x4xf32>, vector<1x8x4xf32>, vector<1x8x4xf32>, vector<1x8x4xf32>, vector<1x8x4xf32> -> vector<8x8x4xf32>
    %c1_114 = arith.constant 1 : index
    %c0_115 = arith.constant 0 : index
    %c0_116 = arith.constant 0 : index
    %c0_117 = arith.constant 0 : index
    %324 = vector.load %arg7[%c1_114, %c0_115, %c0_116, %c0_117] : memref<2x8x4x32xf32, #tpu.memory_space<vmem>>, vector<1x8x4x32xf32>
    %325 = vector.shape_cast %324 : vector<1x8x4x32xf32> to vector<8x4x32xf32>
    %c1_118 = arith.constant 1 : index
    %c0_119 = arith.constant 0 : index
    %c0_120 = arith.constant 0 : index
    %326 = vector.load %arg8[%c1_118, %c0_119, %c0_120] : memref<2x1x32xf32, #tpu.memory_space<vmem>>, vector<1x1x32xf32>
    %327 = vector.shape_cast %326 : vector<1x1x32xf32> to vector<1x32xf32>
    "tpu.trace_start"() <{level = 10 : i32, message = "hqd,hkd->hqk"}> : () -> ()
    %cst_121 = arith.constant dense<0.000000e+00> : vector<8x8x8xf32>
    %328 = tpu.matmul %289, %306, %cst_121 {dimension_numbers = #tpu.dot_dimension_numbers<[2], [2], [1], [1], [0, 0, 0, 1, 1, 1], [0], [0]>} : vector<8x8x4xf32>, vector<8x8x4xf32>, vector<8x8x8xf32> -> vector<8x8x8xf32>
    "tpu.trace_stop"() : () -> ()
    %329 = vector.shape_cast %8 : vector<8x8xf32> to vector<1x8x8xf32>
    %330 = vector.broadcast %329 : vector<1x8x8xf32> to vector<8x8x8xf32>
    %331 = arith.addf %328, %330 : vector<8x8x8xf32>
    %cst_122 = arith.constant dense<0xFF800000> : vector<8x8xf32>
    %332 = vector.multi_reduction <maximumf>, %331, %cst_122 [2] : vector<8x8x8xf32> to vector<8x8xf32>
    %333 = vector.shape_cast %332 : vector<8x8xf32> to vector<8x8x1xf32>
    %334 = vector.broadcast %333 : vector<8x8x1xf32> to vector<8x8x8xf32>
    %335 = arith.subf %331, %334 : vector<8x8x8xf32>
    %336 = math.exp %335 : vector<8x8x8xf32>
    %cst_123 = arith.constant dense<0.000000e+00> : vector<8x8xf32>
    %337 = vector.multi_reduction <add>, %336, %cst_123 [2] : vector<8x8x8xf32> to vector<8x8xf32>
    %338 = vector.shape_cast %337 : vector<8x8xf32> to vector<8x8x1xf32>
    %339 = tpu.reciprocal %338 {approx = true} : vector<8x8x1xf32> -> vector<8x8x1xf32>
    %340 = vector.broadcast %339 : vector<8x8x1xf32> to vector<8x8x8xf32>
    %341 = arith.mulf %336, %340 : vector<8x8x8xf32>
    "tpu.trace_start"() <{level = 10 : i32, message = "hqk,hkd->hqd"}> : () -> ()
    %cst_124 = arith.constant dense<0.000000e+00> : vector<8x8x4xf32>
    %342 = tpu.matmul %341, %323, %cst_124 {dimension_numbers = #tpu.dot_dimension_numbers<[2], [1], [1], [2], [0, 0, 0, 1, 1, 2], [0], [0]>} : vector<8x8x8xf32>, vector<8x8x4xf32>, vector<8x8x4xf32> -> vector<8x8x4xf32>
    "tpu.trace_stop"() : () -> ()
    "tpu.trace_start"() <{level = 10 : i32, message = "hqd,hde->hqe"}> : () -> ()
    %cst_125 = arith.constant dense<0.000000e+00> : vector<8x8x32xf32>
    %343 = tpu.matmul %342, %325, %cst_125 {dimension_numbers = #tpu.dot_dimension_numbers<[2], [1], [1], [2], [0, 0, 0, 1, 1, 2], [0], [0]>} : vector<8x8x4xf32>, vector<8x4x32xf32>, vector<8x8x32xf32> -> vector<8x8x32xf32>
    "tpu.trace_stop"() : () -> ()
    %cst_126 = arith.constant dense<0.000000e+00> : vector<8x32xf32>
    %344 = vector.multi_reduction <add>, %343, %cst_126 [0] : vector<8x8x32xf32> to vector<8x32xf32>
    %345 = vector.broadcast %327 : vector<1x32xf32> to vector<8x32xf32>
    %346 = arith.addf %344, %345 : vector<8x32xf32>
    %347 = arith.addf %346, %1 : vector<8x32xf32>
    %c1_127 = arith.constant 1 : index
    %c0_128 = arith.constant 0 : index
    %c0_129 = arith.constant 0 : index
    %c0_130 = arith.constant 0 : index
    %348 = vector.load %arg14[%c1_127, %c0_128, %c0_129, %c0_130] : memref<2x3x1x32xf32, #tpu.memory_space<vmem>>, vector<1x1x1x32xf32>
    %349 = vector.shape_cast %348 : vector<1x1x1x32xf32> to vector<1x32xf32>
    %c1_131 = arith.constant 1 : index
    %c0_132 = arith.constant 0 : index
    %c0_133 = arith.constant 0 : index
    %c0_134 = arith.constant 0 : index
    %350 = vector.load %arg15[%c1_131, %c0_132, %c0_133, %c0_134] : memref<2x3x1x32xf32, #tpu.memory_space<vmem>>, vector<1x1x1x32xf32>
    %351 = vector.shape_cast %350 : vector<1x1x1x32xf32> to vector<1x32xf32>
    %cst_135 = arith.constant dense<0.000000e+00> : vector<8xf32>
    %352 = vector.multi_reduction <add>, %347, %cst_135 [1] : vector<8x32xf32> to vector<8xf32>
    %353 = vector.shape_cast %352 : vector<8xf32> to vector<8x1xf32>
    %cst_136 = arith.constant 3.200000e+01 : f32
    %354 = vector.broadcast %cst_136 : f32 to vector<8x1xf32>
    %355 = arith.divf %353, %354 : vector<8x1xf32>
    %356 = vector.broadcast %355 : vector<8x1xf32> to vector<8x32xf32>
    %357 = arith.subf %347, %356 : vector<8x32xf32>
    %358 = arith.mulf %357, %357 : vector<8x32xf32>
    %cst_137 = arith.constant dense<0.000000e+00> : vector<8xf32>
    %359 = vector.multi_reduction <add>, %358, %cst_137 [1] : vector<8x32xf32> to vector<8xf32>
    %360 = vector.shape_cast %359 : vector<8xf32> to vector<8x1xf32>
    %cst_138 = arith.constant 3.200000e+01 : f32
    %361 = vector.broadcast %cst_138 : f32 to vector<8x1xf32>
    %362 = arith.divf %360, %361 : vector<8x1xf32>
    %cst_139 = arith.constant 9.99999974E-6 : f32
    %363 = vector.broadcast %cst_139 : f32 to vector<8x1xf32>
    %364 = arith.addf %362, %363 : vector<8x1xf32>
    %365 = math.rsqrt %364 : vector<8x1xf32>
    %366 = vector.broadcast %365 : vector<8x1xf32> to vector<8x32xf32>
    %367 = arith.mulf %357, %366 : vector<8x32xf32>
    %368 = vector.broadcast %349 : vector<1x32xf32> to vector<8x32xf32>
    %369 = arith.mulf %367, %368 : vector<8x32xf32>
    %370 = vector.broadcast %351 : vector<1x32xf32> to vector<8x32xf32>
    %371 = arith.addf %369, %370 : vector<8x32xf32>
    %c1_140 = arith.constant 1 : index
    %c0_141 = arith.constant 0 : index
    %c0_142 = arith.constant 0 : index
    %372 = vector.load %arg9[%c1_140, %c0_141, %c0_142] : memref<2x32x32xf32, #tpu.memory_space<vmem>>, vector<1x32x32xf32>
    %373 = vector.shape_cast %372 : vector<1x32x32xf32> to vector<32x32xf32>
    %cst_143 = arith.constant dense<0.000000e+00> : vector<8x32xf32>
    %374 = tpu.matmul %269, %373, %cst_143 {dimension_numbers = #tpu.dot_dimension_numbers<[1], [0], [0], [1], [0, 0, 1, 1], [], []>} : vector<8x32xf32>, vector<32x32xf32>, vector<8x32xf32> -> vector<8x32xf32>
    %c1_144 = arith.constant 1 : index
    %c0_145 = arith.constant 0 : index
    %c0_146 = arith.constant 0 : index
    %375 = vector.load %arg10[%c1_144, %c0_145, %c0_146] : memref<2x32x32xf32, #tpu.memory_space<vmem>>, vector<1x32x32xf32>
    %376 = vector.shape_cast %375 : vector<1x32x32xf32> to vector<32x32xf32>
    %cst_147 = arith.constant dense<0.000000e+00> : vector<8x32xf32>
    %377 = tpu.matmul %1, %376, %cst_147 {dimension_numbers = #tpu.dot_dimension_numbers<[1], [0], [0], [1], [0, 0, 1, 1], [], []>} : vector<8x32xf32>, vector<32x32xf32>, vector<8x32xf32> -> vector<8x32xf32>
    %c1_148 = arith.constant 1 : index
    %c0_149 = arith.constant 0 : index
    %c0_150 = arith.constant 0 : index
    %378 = vector.load %arg11[%c1_148, %c0_149, %c0_150] : memref<2x32x32xf32, #tpu.memory_space<vmem>>, vector<1x32x32xf32>
    %379 = vector.shape_cast %378 : vector<1x32x32xf32> to vector<32x32xf32>
    %cst_151 = arith.constant dense<0.000000e+00> : vector<8x32xf32>
    %380 = tpu.matmul %371, %379, %cst_151 {dimension_numbers = #tpu.dot_dimension_numbers<[1], [0], [0], [1], [0, 0, 1, 1], [], []>} : vector<8x32xf32>, vector<32x32xf32>, vector<8x32xf32> -> vector<8x32xf32>
    %381 = vector.extract_strided_slice %374 {offsets = [0, 0], sizes = [8, 4], strides = [1, 1]} : vector<8x32xf32> to vector<8x4xf32>
    %382 = vector.extract_strided_slice %374 {offsets = [0, 4], sizes = [8, 4], strides = [1, 1]} : vector<8x32xf32> to vector<8x4xf32>
    %383 = vector.extract_strided_slice %374 {offsets = [0, 8], sizes = [8, 4], strides = [1, 1]} : vector<8x32xf32> to vector<8x4xf32>
    %384 = vector.extract_strided_slice %374 {offsets = [0, 12], sizes = [8, 4], strides = [1, 1]} : vector<8x32xf32> to vector<8x4xf32>
    %385 = vector.extract_strided_slice %374 {offsets = [0, 16], sizes = [8, 4], strides = [1, 1]} : vector<8x32xf32> to vector<8x4xf32>
    %386 = vector.extract_strided_slice %374 {offsets = [0, 20], sizes = [8, 4], strides = [1, 1]} : vector<8x32xf32> to vector<8x4xf32>
    %387 = vector.extract_strided_slice %374 {offsets = [0, 24], sizes = [8, 4], strides = [1, 1]} : vector<8x32xf32> to vector<8x4xf32>
    %388 = vector.extract_strided_slice %374 {offsets = [0, 28], sizes = [8, 4], strides = [1, 1]} : vector<8x32xf32> to vector<8x4xf32>
    %389 = vector.shape_cast %381 : vector<8x4xf32> to vector<1x8x4xf32>
    %390 = vector.shape_cast %382 : vector<8x4xf32> to vector<1x8x4xf32>
    %391 = vector.shape_cast %383 : vector<8x4xf32> to vector<1x8x4xf32>
    %392 = vector.shape_cast %384 : vector<8x4xf32> to vector<1x8x4xf32>
    %393 = vector.shape_cast %385 : vector<8x4xf32> to vector<1x8x4xf32>
    %394 = vector.shape_cast %386 : vector<8x4xf32> to vector<1x8x4xf32>
    %395 = vector.shape_cast %387 : vector<8x4xf32> to vector<1x8x4xf32>
    %396 = vector.shape_cast %388 : vector<8x4xf32> to vector<1x8x4xf32>
    %397 = tpu.concatenate %389, %390, %391, %392, %393, %394, %395, %396 in 0 : vector<1x8x4xf32>, vector<1x8x4xf32>, vector<1x8x4xf32>, vector<1x8x4xf32>, vector<1x8x4xf32>, vector<1x8x4xf32>, vector<1x8x4xf32>, vector<1x8x4xf32> -> vector<8x8x4xf32>
    %398 = vector.extract_strided_slice %377 {offsets = [0, 0], sizes = [8, 4], strides = [1, 1]} : vector<8x32xf32> to vector<8x4xf32>
    %399 = vector.extract_strided_slice %377 {offsets = [0, 4], sizes = [8, 4], strides = [1, 1]} : vector<8x32xf32> to vector<8x4xf32>
    %400 = vector.extract_strided_slice %377 {offsets = [0, 8], sizes = [8, 4], strides = [1, 1]} : vector<8x32xf32> to vector<8x4xf32>
    %401 = vector.extract_strided_slice %377 {offsets = [0, 12], sizes = [8, 4], strides = [1, 1]} : vector<8x32xf32> to vector<8x4xf32>
    %402 = vector.extract_strided_slice %377 {offsets = [0, 16], sizes = [8, 4], strides = [1, 1]} : vector<8x32xf32> to vector<8x4xf32>
    %403 = vector.extract_strided_slice %377 {offsets = [0, 20], sizes = [8, 4], strides = [1, 1]} : vector<8x32xf32> to vector<8x4xf32>
    %404 = vector.extract_strided_slice %377 {offsets = [0, 24], sizes = [8, 4], strides = [1, 1]} : vector<8x32xf32> to vector<8x4xf32>
    %405 = vector.extract_strided_slice %377 {offsets = [0, 28], sizes = [8, 4], strides = [1, 1]} : vector<8x32xf32> to vector<8x4xf32>
    %406 = vector.shape_cast %398 : vector<8x4xf32> to vector<1x8x4xf32>
    %407 = vector.shape_cast %399 : vector<8x4xf32> to vector<1x8x4xf32>
    %408 = vector.shape_cast %400 : vector<8x4xf32> to vector<1x8x4xf32>
    %409 = vector.shape_cast %401 : vector<8x4xf32> to vector<1x8x4xf32>
    %410 = vector.shape_cast %402 : vector<8x4xf32> to vector<1x8x4xf32>
    %411 = vector.shape_cast %403 : vector<8x4xf32> to vector<1x8x4xf32>
    %412 = vector.shape_cast %404 : vector<8x4xf32> to vector<1x8x4xf32>
    %413 = vector.shape_cast %405 : vector<8x4xf32> to vector<1x8x4xf32>
    %414 = tpu.concatenate %406, %407, %408, %409, %410, %411, %412, %413 in 0 : vector<1x8x4xf32>, vector<1x8x4xf32>, vector<1x8x4xf32>, vector<1x8x4xf32>, vector<1x8x4xf32>, vector<1x8x4xf32>, vector<1x8x4xf32>, vector<1x8x4xf32> -> vector<8x8x4xf32>
    %415 = vector.extract_strided_slice %380 {offsets = [0, 0], sizes = [8, 4], strides = [1, 1]} : vector<8x32xf32> to vector<8x4xf32>
    %416 = vector.extract_strided_slice %380 {offsets = [0, 4], sizes = [8, 4], strides = [1, 1]} : vector<8x32xf32> to vector<8x4xf32>
    %417 = vector.extract_strided_slice %380 {offsets = [0, 8], sizes = [8, 4], strides = [1, 1]} : vector<8x32xf32> to vector<8x4xf32>
    %418 = vector.extract_strided_slice %380 {offsets = [0, 12], sizes = [8, 4], strides = [1, 1]} : vector<8x32xf32> to vector<8x4xf32>
    %419 = vector.extract_strided_slice %380 {offsets = [0, 16], sizes = [8, 4], strides = [1, 1]} : vector<8x32xf32> to vector<8x4xf32>
    %420 = vector.extract_strided_slice %380 {offsets = [0, 20], sizes = [8, 4], strides = [1, 1]} : vector<8x32xf32> to vector<8x4xf32>
    %421 = vector.extract_strided_slice %380 {offsets = [0, 24], sizes = [8, 4], strides = [1, 1]} : vector<8x32xf32> to vector<8x4xf32>
    %422 = vector.extract_strided_slice %380 {offsets = [0, 28], sizes = [8, 4], strides = [1, 1]} : vector<8x32xf32> to vector<8x4xf32>
    %423 = vector.shape_cast %415 : vector<8x4xf32> to vector<1x8x4xf32>
    %424 = vector.shape_cast %416 : vector<8x4xf32> to vector<1x8x4xf32>
    %425 = vector.shape_cast %417 : vector<8x4xf32> to vector<1x8x4xf32>
    %426 = vector.shape_cast %418 : vector<8x4xf32> to vector<1x8x4xf32>
    %427 = vector.shape_cast %419 : vector<8x4xf32> to vector<1x8x4xf32>
    %428 = vector.shape_cast %420 : vector<8x4xf32> to vector<1x8x4xf32>
    %429 = vector.shape_cast %421 : vector<8x4xf32> to vector<1x8x4xf32>
    %430 = vector.shape_cast %422 : vector<8x4xf32> to vector<1x8x4xf32>
    %431 = tpu.concatenate %423, %424, %425, %426, %427, %428, %429, %430 in 0 : vector<1x8x4xf32>, vector<1x8x4xf32>, vector<1x8x4xf32>, vector<1x8x4xf32>, vector<1x8x4xf32>, vector<1x8x4xf32>, vector<1x8x4xf32>, vector<1x8x4xf32> -> vector<8x8x4xf32>
    %c1_152 = arith.constant 1 : index
    %c0_153 = arith.constant 0 : index
    %c0_154 = arith.constant 0 : index
    %c0_155 = arith.constant 0 : index
    %432 = vector.load %arg12[%c1_152, %c0_153, %c0_154, %c0_155] : memref<2x8x4x32xf32, #tpu.memory_space<vmem>>, vector<1x8x4x32xf32>
    %433 = vector.shape_cast %432 : vector<1x8x4x32xf32> to vector<8x4x32xf32>
    %c1_156 = arith.constant 1 : index
    %c0_157 = arith.constant 0 : index
    %c0_158 = arith.constant 0 : index
    %434 = vector.load %arg13[%c1_156, %c0_157, %c0_158] : memref<2x1x32xf32, #tpu.memory_space<vmem>>, vector<1x1x32xf32>
    %435 = vector.shape_cast %434 : vector<1x1x32xf32> to vector<1x32xf32>
    "tpu.trace_start"() <{level = 10 : i32, message = "hqd,hkd->hqk"}> : () -> ()
    %cst_159 = arith.constant dense<0.000000e+00> : vector<8x8x8xf32>
    %436 = tpu.matmul %397, %414, %cst_159 {dimension_numbers = #tpu.dot_dimension_numbers<[2], [2], [1], [1], [0, 0, 0, 1, 1, 1], [0], [0]>} : vector<8x8x4xf32>, vector<8x8x4xf32>, vector<8x8x8xf32> -> vector<8x8x8xf32>
    "tpu.trace_stop"() : () -> ()
    %cst_160 = arith.constant dense<0xFF800000> : vector<8x8xf32>
    %437 = vector.multi_reduction <maximumf>, %436, %cst_160 [2] : vector<8x8x8xf32> to vector<8x8xf32>
    %438 = vector.shape_cast %437 : vector<8x8xf32> to vector<8x8x1xf32>
    %439 = vector.broadcast %438 : vector<8x8x1xf32> to vector<8x8x8xf32>
    %440 = arith.subf %436, %439 : vector<8x8x8xf32>
    %441 = math.exp %440 : vector<8x8x8xf32>
    %cst_161 = arith.constant dense<0.000000e+00> : vector<8x8xf32>
    %442 = vector.multi_reduction <add>, %441, %cst_161 [2] : vector<8x8x8xf32> to vector<8x8xf32>
    %443 = vector.shape_cast %442 : vector<8x8xf32> to vector<8x8x1xf32>
    %444 = tpu.reciprocal %443 {approx = true} : vector<8x8x1xf32> -> vector<8x8x1xf32>
    %445 = vector.broadcast %444 : vector<8x8x1xf32> to vector<8x8x8xf32>
    %446 = arith.mulf %441, %445 : vector<8x8x8xf32>
    "tpu.trace_start"() <{level = 10 : i32, message = "hqk,hkd->hqd"}> : () -> ()
    %cst_162 = arith.constant dense<0.000000e+00> : vector<8x8x4xf32>
    %447 = tpu.matmul %446, %431, %cst_162 {dimension_numbers = #tpu.dot_dimension_numbers<[2], [1], [1], [2], [0, 0, 0, 1, 1, 2], [0], [0]>} : vector<8x8x8xf32>, vector<8x8x4xf32>, vector<8x8x4xf32> -> vector<8x8x4xf32>
    "tpu.trace_stop"() : () -> ()
    "tpu.trace_start"() <{level = 10 : i32, message = "hqd,hde->hqe"}> : () -> ()
    %cst_163 = arith.constant dense<0.000000e+00> : vector<8x8x32xf32>
    %448 = tpu.matmul %447, %433, %cst_163 {dimension_numbers = #tpu.dot_dimension_numbers<[2], [1], [1], [2], [0, 0, 0, 1, 1, 2], [0], [0]>} : vector<8x8x4xf32>, vector<8x4x32xf32>, vector<8x8x32xf32> -> vector<8x8x32xf32>
    "tpu.trace_stop"() : () -> ()
    %cst_164 = arith.constant dense<0.000000e+00> : vector<8x32xf32>
    %449 = vector.multi_reduction <add>, %448, %cst_164 [0] : vector<8x8x32xf32> to vector<8x32xf32>
    %450 = vector.broadcast %435 : vector<1x32xf32> to vector<8x32xf32>
    %451 = arith.addf %449, %450 : vector<8x32xf32>
    %452 = arith.addf %451, %371 : vector<8x32xf32>
    %c1_165 = arith.constant 1 : index
    %c1_166 = arith.constant 1 : index
    %c0_167 = arith.constant 0 : index
    %c0_168 = arith.constant 0 : index
    %453 = vector.load %arg14[%c1_165, %c1_166, %c0_167, %c0_168] : memref<2x3x1x32xf32, #tpu.memory_space<vmem>>, vector<1x1x1x32xf32>
    %454 = vector.shape_cast %453 : vector<1x1x1x32xf32> to vector<1x32xf32>
    %c1_169 = arith.constant 1 : index
    %c1_170 = arith.constant 1 : index
    %c0_171 = arith.constant 0 : index
    %c0_172 = arith.constant 0 : index
    %455 = vector.load %arg15[%c1_169, %c1_170, %c0_171, %c0_172] : memref<2x3x1x32xf32, #tpu.memory_space<vmem>>, vector<1x1x1x32xf32>
    %456 = vector.shape_cast %455 : vector<1x1x1x32xf32> to vector<1x32xf32>
    %cst_173 = arith.constant dense<0.000000e+00> : vector<8xf32>
    %457 = vector.multi_reduction <add>, %452, %cst_173 [1] : vector<8x32xf32> to vector<8xf32>
    %458 = vector.shape_cast %457 : vector<8xf32> to vector<8x1xf32>
    %cst_174 = arith.constant 3.200000e+01 : f32
    %459 = vector.broadcast %cst_174 : f32 to vector<8x1xf32>
    %460 = arith.divf %458, %459 : vector<8x1xf32>
    %461 = vector.broadcast %460 : vector<8x1xf32> to vector<8x32xf32>
    %462 = arith.subf %452, %461 : vector<8x32xf32>
    %463 = arith.mulf %462, %462 : vector<8x32xf32>
    %cst_175 = arith.constant dense<0.000000e+00> : vector<8xf32>
    %464 = vector.multi_reduction <add>, %463, %cst_175 [1] : vector<8x32xf32> to vector<8xf32>
    %465 = vector.shape_cast %464 : vector<8xf32> to vector<8x1xf32>
    %cst_176 = arith.constant 3.200000e+01 : f32
    %466 = vector.broadcast %cst_176 : f32 to vector<8x1xf32>
    %467 = arith.divf %465, %466 : vector<8x1xf32>
    %cst_177 = arith.constant 9.99999974E-6 : f32
    %468 = vector.broadcast %cst_177 : f32 to vector<8x1xf32>
    %469 = arith.addf %467, %468 : vector<8x1xf32>
    %470 = math.rsqrt %469 : vector<8x1xf32>
    %471 = vector.broadcast %470 : vector<8x1xf32> to vector<8x32xf32>
    %472 = arith.mulf %462, %471 : vector<8x32xf32>
    %473 = vector.broadcast %454 : vector<1x32xf32> to vector<8x32xf32>
    %474 = arith.mulf %472, %473 : vector<8x32xf32>
    %475 = vector.broadcast %456 : vector<1x32xf32> to vector<8x32xf32>
    %476 = arith.addf %474, %475 : vector<8x32xf32>
    %c1_178 = arith.constant 1 : index
    %c0_179 = arith.constant 0 : index
    %c0_180 = arith.constant 0 : index
    %477 = vector.load %arg16[%c1_178, %c0_179, %c0_180] : memref<2x32x128xf32, #tpu.memory_space<vmem>>, vector<1x32x128xf32>
    %478 = vector.shape_cast %477 : vector<1x32x128xf32> to vector<32x128xf32>
    %cst_181 = arith.constant dense<0.000000e+00> : vector<8x128xf32>
    %479 = tpu.matmul %476, %478, %cst_181 {dimension_numbers = #tpu.dot_dimension_numbers<[1], [0], [0], [1], [0, 0, 1, 1], [], []>} : vector<8x32xf32>, vector<32x128xf32>, vector<8x128xf32> -> vector<8x128xf32>
    %c1_182 = arith.constant 1 : index
    %c0_183 = arith.constant 0 : index
    %c0_184 = arith.constant 0 : index
    %480 = vector.load %arg17[%c1_182, %c0_183, %c0_184] : memref<2x1x128xf32, #tpu.memory_space<vmem>>, vector<1x1x128xf32>
    %481 = vector.shape_cast %480 : vector<1x1x128xf32> to vector<1x128xf32>
    %482 = vector.broadcast %481 : vector<1x128xf32> to vector<8x128xf32>
    %483 = arith.addf %479, %482 : vector<8x128xf32>
    %cst_185 = arith.constant 0.000000e+00 : f32
    %484 = vector.broadcast %cst_185 : f32 to vector<8x128xf32>
    %485 = arith.maximumf %483, %484 : vector<8x128xf32>
    %c1_186 = arith.constant 1 : index
    %c0_187 = arith.constant 0 : index
    %c0_188 = arith.constant 0 : index
    %486 = vector.load %arg18[%c1_186, %c0_187, %c0_188] : memref<2x128x32xf32, #tpu.memory_space<vmem>>, vector<1x128x32xf32>
    %487 = vector.shape_cast %486 : vector<1x128x32xf32> to vector<128x32xf32>
    %cst_189 = arith.constant dense<0.000000e+00> : vector<8x32xf32>
    %488 = tpu.matmul %485, %487, %cst_189 {dimension_numbers = #tpu.dot_dimension_numbers<[1], [0], [0], [1], [0, 0, 1, 1], [], []>} : vector<8x128xf32>, vector<128x32xf32>, vector<8x32xf32> -> vector<8x32xf32>
    %c1_190 = arith.constant 1 : index
    %c0_191 = arith.constant 0 : index
    %c0_192 = arith.constant 0 : index
    %489 = vector.load %arg19[%c1_190, %c0_191, %c0_192] : memref<2x1x32xf32, #tpu.memory_space<vmem>>, vector<1x1x32xf32>
    %490 = vector.shape_cast %489 : vector<1x1x32xf32> to vector<1x32xf32>
    %491 = vector.broadcast %490 : vector<1x32xf32> to vector<8x32xf32>
    %492 = arith.addf %488, %491 : vector<8x32xf32>
    %493 = arith.addf %492, %476 : vector<8x32xf32>
    %c1_193 = arith.constant 1 : index
    %c2_194 = arith.constant 2 : index
    %c0_195 = arith.constant 0 : index
    %c0_196 = arith.constant 0 : index
    %494 = vector.load %arg14[%c1_193, %c2_194, %c0_195, %c0_196] : memref<2x3x1x32xf32, #tpu.memory_space<vmem>>, vector<1x1x1x32xf32>
    %495 = vector.shape_cast %494 : vector<1x1x1x32xf32> to vector<1x32xf32>
    %c1_197 = arith.constant 1 : index
    %c2_198 = arith.constant 2 : index
    %c0_199 = arith.constant 0 : index
    %c0_200 = arith.constant 0 : index
    %496 = vector.load %arg15[%c1_197, %c2_198, %c0_199, %c0_200] : memref<2x3x1x32xf32, #tpu.memory_space<vmem>>, vector<1x1x1x32xf32>
    %497 = vector.shape_cast %496 : vector<1x1x1x32xf32> to vector<1x32xf32>
    %cst_201 = arith.constant dense<0.000000e+00> : vector<8xf32>
    %498 = vector.multi_reduction <add>, %493, %cst_201 [1] : vector<8x32xf32> to vector<8xf32>
    %499 = vector.shape_cast %498 : vector<8xf32> to vector<8x1xf32>
    %cst_202 = arith.constant 3.200000e+01 : f32
    %500 = vector.broadcast %cst_202 : f32 to vector<8x1xf32>
    %501 = arith.divf %499, %500 : vector<8x1xf32>
    %502 = vector.broadcast %501 : vector<8x1xf32> to vector<8x32xf32>
    %503 = arith.subf %493, %502 : vector<8x32xf32>
    %504 = arith.mulf %503, %503 : vector<8x32xf32>
    %cst_203 = arith.constant dense<0.000000e+00> : vector<8xf32>
    %505 = vector.multi_reduction <add>, %504, %cst_203 [1] : vector<8x32xf32> to vector<8xf32>
    %506 = vector.shape_cast %505 : vector<8xf32> to vector<8x1xf32>
    %cst_204 = arith.constant 3.200000e+01 : f32
    %507 = vector.broadcast %cst_204 : f32 to vector<8x1xf32>
    %508 = arith.divf %506, %507 : vector<8x1xf32>
    %cst_205 = arith.constant 9.99999974E-6 : f32
    %509 = vector.broadcast %cst_205 : f32 to vector<8x1xf32>
    %510 = arith.addf %508, %509 : vector<8x1xf32>
    %511 = math.rsqrt %510 : vector<8x1xf32>
    %512 = vector.broadcast %511 : vector<8x1xf32> to vector<8x32xf32>
    %513 = arith.mulf %503, %512 : vector<8x32xf32>
    %514 = vector.broadcast %495 : vector<1x32xf32> to vector<8x32xf32>
    %515 = arith.mulf %513, %514 : vector<8x32xf32>
    %516 = vector.broadcast %497 : vector<1x32xf32> to vector<8x32xf32>
    %517 = arith.addf %515, %516 : vector<8x32xf32>
    %c0_206 = arith.constant 0 : index
    %c0_207 = arith.constant 0 : index
    %518 = vector.load %arg20[%c0_206, %c0_207] : memref<32x16xf32, #tpu.memory_space<vmem>>, vector<32x16xf32>
    %cst_208 = arith.constant dense<0.000000e+00> : vector<8x16xf32>
    %519 = tpu.matmul %517, %518, %cst_208 {dimension_numbers = #tpu.dot_dimension_numbers<[1], [0], [0], [1], [0, 0, 1, 1], [], []>} : vector<8x32xf32>, vector<32x16xf32>, vector<8x16xf32> -> vector<8x16xf32>
    %c0_209 = arith.constant 0 : index
    %c0_210 = arith.constant 0 : index
    %520 = vector.load %arg21[%c0_209, %c0_210] : memref<1x16xf32, #tpu.memory_space<vmem>>, vector<1x16xf32>
    %521 = vector.broadcast %520 : vector<1x16xf32> to vector<8x16xf32>
    %522 = arith.addf %519, %521 : vector<8x16xf32>
    %cst_211 = arith.constant dense<0xFF800000> : vector<16xf32>
    %523 = vector.multi_reduction <maximumf>, %522, %cst_211 [0] : vector<8x16xf32> to vector<16xf32>
    %524 = vector.shape_cast %523 : vector<16xf32> to vector<1x16xf32>
    %525 = vector.broadcast %524 : vector<1x16xf32> to vector<8x16xf32>
    %526 = arith.subf %522, %525 : vector<8x16xf32>
    %527 = math.exp %526 : vector<8x16xf32>
    %cst_212 = arith.constant dense<0.000000e+00> : vector<16xf32>
    %528 = vector.multi_reduction <add>, %527, %cst_212 [0] : vector<8x16xf32> to vector<16xf32>
    %529 = vector.shape_cast %528 : vector<16xf32> to vector<1x16xf32>
    %530 = vector.broadcast %529 : vector<1x16xf32> to vector<8x16xf32>
    %531 = arith.divf %527, %530 : vector<8x16xf32>
    %c0_213 = arith.constant 0 : index
    %c0_214 = arith.constant 0 : index
    %c0_215 = arith.constant 0 : index
    %532 = vector.load %arg22[%c0_213, %c0_214, %c0_215] : memref<1x8x16xf32, #tpu.memory_space<vmem>>, vector<1x8x16xf32>
    %533 = vector.shape_cast %532 : vector<1x8x16xf32> to vector<8x16xf32>
    %534 = vector.shape_cast %531 : vector<8x16xf32> to vector<1x8x16xf32>
    tpu.vector_store %arg22[%c0_213, %c0_214, %c0_215], %534 {strides = array<i32>} : memref<1x8x16xf32, #tpu.memory_space<vmem>>, vector<1x8x16xf32>,
    return
  }
  func.func @transform_0(%arg0: i32) -> (i32, i32, i32) {
    %c0_i32 = arith.constant 0 : i32
    %c0_i32_0 = arith.constant 0 : i32
    %c0_i32_1 = arith.constant 0 : i32
    return %arg0, %c0_i32, %c0_i32_0 : i32, i32, i32
  }
  func.func @transform_1(%arg0: i32) -> (i32, i32, i32) {
    %c0_i32 = arith.constant 0 : i32
    %c0_i32_0 = arith.constant 0 : i32
    %c0_i32_1 = arith.constant 0 : i32
    return %arg0, %c0_i32, %c0_i32_0 : i32, i32, i32
  }
  func.func @transform_2(%arg0: i32) -> (i32, i32, i32) {
    %c0_i32 = arith.constant 0 : i32
    %c0_i32_0 = arith.constant 0 : i32
    %c0_i32_1 = arith.constant 0 : i32
    return %arg0, %c0_i32, %c0_i32_0 : i32, i32, i32
  }
  func.func @transform_3(%arg0: i32) -> (i32, i32) {
    %c0_i32 = arith.constant 0 : i32
    %c0_i32_0 = arith.constant 0 : i32
    %c0_i32_1 = arith.constant 0 : i32
    return %c0_i32, %c0_i32_0 : i32, i32
  }
  func.func @transform_4(%arg0: i32) -> (i32, i32) {
    %c0_i32 = arith.constant 0 : i32
    %c0_i32_0 = arith.constant 0 : i32
    %c0_i32_1 = arith.constant 0 : i32
    return %c0_i32, %c0_i32_0 : i32, i32
  }
  func.func @transform_5(%arg0: i32) -> (i32, i32, i32) {
    %c0_i32 = arith.constant 0 : i32
    %c0_i32_0 = arith.constant 0 : i32
    %c0_i32_1 = arith.constant 0 : i32
    %c0_i32_2 = arith.constant 0 : i32
    return %c0_i32, %c0_i32_0, %c0_i32_1 : i32, i32, i32
  }
  func.func @transform_6(%arg0: i32) -> (i32, i32, i32, i32) {
    %c0_i32 = arith.constant 0 : i32
    %c0_i32_0 = arith.constant 0 : i32
    %c0_i32_1 = arith.constant 0 : i32
    %c0_i32_2 = arith.constant 0 : i32
    %c0_i32_3 = arith.constant 0 : i32
    return %c0_i32, %c0_i32_0, %c0_i32_1, %c0_i32_2 : i32, i32, i32, i32
  }
  func.func @transform_7(%arg0: i32) -> (i32, i32, i32) {
    %c0_i32 = arith.constant 0 : i32
    %c0_i32_0 = arith.constant 0 : i32
    %c0_i32_1 = arith.constant 0 : i32
    %c0_i32_2 = arith.constant 0 : i32
    return %c0_i32, %c0_i32_0, %c0_i32_1 : i32, i32, i32
  }
  func.func @transform_8(%arg0: i32) -> (i32, i32, i32) {
    %c0_i32 = arith.constant 0 : i32
    %c0_i32_0 = arith.constant 0 : i32
    %c0_i32_1 = arith.constant 0 : i32
    %c0_i32_2 = arith.constant 0 : i32
    return %c0_i32, %c0_i32_0, %c0_i32_1 : i32, i32, i32
  }
  func.func @transform_9(%arg0: i32) -> (i32, i32, i32) {
    %c0_i32 = arith.constant 0 : i32
    %c0_i32_0 = arith.constant 0 : i32
    %c0_i32_1 = arith.constant 0 : i32
    %c0_i32_2 = arith.constant 0 : i32
    return %c0_i32, %c0_i32_0, %c0_i32_1 : i32, i32, i32
  }
  func.func @transform_10(%arg0: i32) -> (i32, i32, i32) {
    %c0_i32 = arith.constant 0 : i32
    %c0_i32_0 = arith.constant 0 : i32
    %c0_i32_1 = arith.constant 0 : i32
    %c0_i32_2 = arith.constant 0 : i32
    return %c0_i32, %c0_i32_0, %c0_i32_1 : i32, i32, i32
  }
  func.func @transform_11(%arg0: i32) -> (i32, i32, i32, i32) {
    %c0_i32 = arith.constant 0 : i32
    %c0_i32_0 = arith.constant 0 : i32
    %c0_i32_1 = arith.constant 0 : i32
    %c0_i32_2 = arith.constant 0 : i32
    %c0_i32_3 = arith.constant 0 : i32
    return %c0_i32, %c0_i32_0, %c0_i32_1, %c0_i32_2 : i32, i32, i32, i32
  }
  func.func @transform_12(%arg0: i32) -> (i32, i32, i32) {
    %c0_i32 = arith.constant 0 : i32
    %c0_i32_0 = arith.constant 0 : i32
    %c0_i32_1 = arith.constant 0 : i32
    %c0_i32_2 = arith.constant 0 : i32
    return %c0_i32, %c0_i32_0, %c0_i32_1 : i32, i32, i32
  }
  func.func @transform_13(%arg0: i32) -> (i32, i32, i32, i32) {
    %c0_i32 = arith.constant 0 : i32
    %c0_i32_0 = arith.constant 0 : i32
    %c0_i32_1 = arith.constant 0 : i32
    %c0_i32_2 = arith.constant 0 : i32
    %c0_i32_3 = arith.constant 0 : i32
    return %c0_i32, %c0_i32_0, %c0_i32_1, %c0_i32_2 : i32, i32, i32, i32
  }
  func.func @transform_14(%arg0: i32) -> (i32, i32, i32, i32) {
    %c0_i32 = arith.constant 0 : i32
    %c0_i32_0 = arith.constant 0 : i32
    %c0_i32_1 = arith.constant 0 : i32
    %c0_i32_2 = arith.constant 0 : i32
    %c0_i32_3 = arith.constant 0 : i32
    return %c0_i32, %c0_i32_0, %c0_i32_1, %c0_i32_2 : i32, i32, i32, i32
  }
  func.func @transform_15(%arg0: i32) -> (i32, i32, i32) {
    %c0_i32 = arith.constant 0 : i32
    %c0_i32_0 = arith.constant 0 : i32
    %c0_i32_1 = arith.constant 0 : i32
    %c0_i32_2 = arith.constant 0 : i32
    return %c0_i32, %c0_i32_0, %c0_i32_1 : i32, i32, i32
  }
  func.func @transform_16(%arg0: i32) -> (i32, i32, i32) {
    %c0_i32 = arith.constant 0 : i32
    %c0_i32_0 = arith.constant 0 : i32
    %c0_i32_1 = arith.constant 0 : i32
    %c0_i32_2 = arith.constant 0 : i32
    return %c0_i32, %c0_i32_0, %c0_i32_1 : i32, i32, i32
  }
  func.func @transform_17(%arg0: i32) -> (i32, i32, i32) {
    %c0_i32 = arith.constant 0 : i32
    %c0_i32_0 = arith.constant 0 : i32
    %c0_i32_1 = arith.constant 0 : i32
    %c0_i32_2 = arith.constant 0 : i32
    return %c0_i32, %c0_i32_0, %c0_i32_1 : i32, i32, i32
  }
  func.func @transform_18(%arg0: i32) -> (i32, i32, i32) {
    %c0_i32 = arith.constant 0 : i32
    %c0_i32_0 = arith.constant 0 : i32
    %c0_i32_1 = arith.constant 0 : i32
    %c0_i32_2 = arith.constant 0 : i32
    return %c0_i32, %c0_i32_0, %c0_i32_1 : i32, i32, i32
  }
  func.func @transform_19(%arg0: i32) -> (i32, i32) {
    %c0_i32 = arith.constant 0 : i32
    %c0_i32_0 = arith.constant 0 : i32
    %c0_i32_1 = arith.constant 0 : i32
    return %c0_i32, %c0_i32_0 : i32, i32
  }
  func.func @transform_20(%arg0: i32) -> (i32, i32) {
    %c0_i32 = arith.constant 0 : i32
    %c0_i32_0 = arith.constant 0 : i32
    %c0_i32_1 = arith.constant 0 : i32
    return %c0_i32, %c0_i32_0 : i32, i32
  }
  func.func @transform_21(%arg0: i32) -> (i32, i32, i32) {
    %c0_i32 = arith.constant 0 : i32
    %c0_i32_0 = arith.constant 0 : i32
    %c0_i32_1 = arith.constant 0 : i32
    return %arg0, %c0_i32, %c0_i32_0 : i32, i32, i32
  }
}

</mosaic_0001>

<bundles_post_ra>
// kernel: transformer_decoder_forward.1
= control target key start
LH: loop header
LB: loop body
LE: loop exit
PB: predicated region body
PF: predicated region fallthrough
CT: control target
= control target key end

     0   :  { %s13790_s0 = inlined_call_operand.vmem [shape: s32[2,8,1], index: 0, kind: input, shape index: {}]   ;;  %s13791_s1 = inlined_call_operand.vmem [shape: f32[2,8,32], index: 1, kind: input, shape index: {}]   ;;  %s13792_s2 = inlined_call_operand.vmem [shape: f32[2,8,8], index: 2, kind: input, shape index: {}]   ;;  %s13793_s3 = inlined_call_operand.vmem [shape: f32[8,32], index: 3, kind: input, shape index: {}]   ;;  %s13794_s4 = inlined_call_operand.vmem [shape: f32[16,32], index: 4, kind: input, shape index: {}]   ;;  %s13795_s5 = inlined_call_operand.vmem [shape: f32[2,32,96], index: 5, kind: input, shape index: {}]   ;;  %s13796_s6 = inlined_call_operand.vmem [shape: f32[2,8,4,32], index: 6, kind: input, shape index: {}]   ;;  %s13797_s7 = inlined_call_operand.hbm [shape: f32[2,1,32], index: 7, kind: input, shape index: {}]   ;;  %s13798_s8 = inlined_call_operand.vmem [shape: f32[2,32,32], index: 8, kind: input, shape index: {}]   ;;  %s13799_s9 = inlined_call_operand.vmem [shape: f32[2,32,32], index: 9, kind: input, shape index: {}]   ;;  %s13800_s10 = inlined_call_operand.vmem [shape: f32[2,32,32], index: 10, kind: input, shape index: {}]   ;;  %s13801_s11 = inlined_call_operand.hbm [shape: f32[2,8,4,32], index: 11, kind: input, shape index: {}]   ;;  %s13802_s12 = inlined_call_operand.hbm [shape: f32[2,1,32], index: 12, kind: input, shape index: {}]   ;;  %s13803_s13 = inlined_call_operand.vmem [shape: f32[2,3,1,32], index: 13, kind: input, shape index: {}]   ;;  %s13804_s14 = inlined_call_operand.hbm [shape: f32[2,3,1,32], index: 14, kind: input, shape index: {}]   ;;  %s13805_s15 = inlined_call_operand.hbm [shape: f32[2,32,128], index: 15, kind: input, shape index: {}]   ;;  %s13806_s16 = inlined_call_operand.hbm [shape: f32[2,1,128], index: 16, kind: input, shape index: {}]   ;;  %s13807_s17 = inlined_call_operand.vmem [shape: f32[2,128,32], index: 17, kind: input, shape index: {}]   ;;  %s13808_s18 = inlined_call_operand.hbm [shape: f32[2,1,32], index: 18, kind: input, shape index: {}]   ;;  %s13809_s19 = inlined_call_operand.vmem [shape: f32[32,16], index: 19, kind: input, shape index: {}]   ;;  %s13810_s20 = inlined_call_operand.hbm [shape: f32[1,16], index: 20, kind: input, shape index: {}]   ;;  %s13811_s21 = inlined_call_operand.hbm [shape: f32[2,8,16], index: 21, kind: output, shape index: {}]  }
   0x1   :  { %13845 = sst [smem:[#allocation31_spill]] %s13790_s0 }
   0x2   :  { %13846 = sst [smem:[#allocation32_spill]] %s13791_s1 }
   0x3   :  { %13847 = sst [smem:[#allocation33_spill]] %s13792_s2 }
   0x4   :  { %13848 = sst [smem:[#allocation34_spill]] %s13793_s3 }
   0x5   :  { %13849 = sst [smem:[#allocation35_spill]] %s13794_s4 }
   0x6   :  { %13850 = sst [smem:[#allocation36_spill]] %s13795_s5 }
   0x7   :  { %13851 = sst [smem:[#allocation37_spill]] %s13803_s13 }
   0x8   :  { %13852 = sst [smem:[#allocation38_spill]] %s13807_s17 }
   0x9   :  { %13853 = sst [smem:[#allocation39_spill]] %s13809_s19 }
   0xa   :  { %13854 = sst [smem:[#allocation40_spill]] %s13811_s21 }
   0xb   :  { %26 = vsyncpa [#allocation3], 0 }
   0xc   :  { %27 = vsyncpa [#allocation6], 0 }
   0xd   :  { %28 = vsyncpa [#allocation9], 0 }
   0xe   :  { %29 = vsyncpa [#allocation12], 0 }
   0xf   :  { %30 = vsyncpa [#allocation15], 0 }
  0x10   :  { %31 = vsyncpa [#allocation4], 0 }
  0x11   :  { %33 = vsyncpa [#allocation4 + $0x1], 0  ;;  %s12247_s2 = smov 0   ;;  %s12249_s25 = smov 0  }
  0x12   :  { %s12251_s26 = smov 0   ;;  %s12253_s27 = smov 0  }
  0x13 LB: > { %13855 = sst [smem:[#allocation23_spill]] %s12095_s2  ;;  %s12268_s3 = sadd.s32 4294967295, %s12107_s27   ;;  %s12107_s27 = sphi %s12253_s27, %s13907_s27   ;;  %s12103_s26 = sphi %s12251_s26, %s13910_s26   ;;  %s12099_s25 = sphi %s12249_s25, %s13909_s25   ;;  %s12095_s2 = sphi %s12247_s2, %s13908_s2  }
  0x14   : > { %13856 = sst [smem:[#allocation24_spill]] %s12099_s25  ;;  %s10169_s28 = sadd.s32 4294967294, %s12107_s27  }
  0x15   : > { %13857 = sst [smem:[#allocation25_spill]] %s12103_s26  ;;  %s12272_s29 = sadd.s32 1, %s12107_s27  }
  0x16   : > { %13858 = sst [smem:[#allocation26_spill]] %s12107_s27  ;;  %s502_s0 = sadd.s32 1, %s12103_s26 }
  0x17   : > { %13859 = sst [smem:[#allocation27_spill]] %s12272_s29  ;;  %s499_s4 = ssub.s32 %s12107_s27, %s12272_s29 }
  0x18   : > { %p512_p0 = scmp.ne.s32.totalorder %s12103_s26, %s12099_s25  ;;  %p500_p1 = scmp.eq.s32.totalorder %s499_s4, 0 }
  0x19   : > { %p513_p2 = scmp.eq.s32.totalorder %s12268_s3, 1  ;;  %p518_p3 = scmp.ne.s32.totalorder %s12099_s25, %s12095_s2 }
  0x1a   : > { %p519_p4 = scmp.eq.s32.totalorder %s10169_s28, 1  ;;  %p10170_p7 = scmp.ge.s32.totalorder %s12107_s27, 1 }
  0x1b   : > { %s12283_s30 = scalar_select %p500_p1, %s12103_s26, %s502_s0  }
  0x1c   : > { %p12285_p5 = por %p513_p2, %p512_p0  ;;  %p12289_p6 = por %p519_p4, %p518_p3 }
  0x1d   : > { %13860 = sst [smem:[#allocation28_spill]] %s12283_s30  ;;  %p526_p8 = scmp.lt.s32.totalorder %s12107_s27, 3 }
  0x1e   : > { %s13861_s5 = scalar_select %p12285_p5, 1, 0 }
  0x1f   : > { %s13863_s22 = scalar_select %p12289_p6, 1, 0 }
  0x20   : > { %13862 = sst [smem:[#allocation29_spill]] %s13861_s5  ;;  %p13821_p9 = scmp.eq.s32.totalorder %s12268_s3, 0 }
  0x21   : > { %13864 = sst [smem:[#allocation30_spill]] %s13863_s22  ;;  %p12296_p10 = pnand %p10170_p7, %p526_p8 }
  0x22   : > { %s12109_s1 = smov [#allocation5]   ;;  %s12110_s0 = smov [#allocation8]  }
  0x23   : > { %s13865_s23 = scalar_select %p12296_p10, 1, 0 }
  0x24   : > { %s572_s24 = sshll.u32 %s12109_s1, 4  ;;  %p11549_p11 = pneg %p12296_p10  ;;  %s573_s24 = int_to_ptr.vmem [resolvable:$true] %s572_s24 }
  0x25   : > { %s601_s4 = sshll.u32 %s12110_s0, 4  ;;  %s11801_s29 = scalar_lea.hbm %s13801_s11, 1024  ;;  %s602_s4 = int_to_ptr.vmem [resolvable:$true] %s601_s4 }
  0x26   : > { %p12304_p12 = pnand %p13821_p9, %p11549_p11  ;;  %p11802_p13 = scmp.ne.s32.totalorder %s13801_s11, %s11801_s29 }
  0x27   : > { %p11808_p3 = scmp.lt.u32.totalorder %s11801_s29, %s13801_s11 }
  0x28   : > { %p12316_p0 = pneg %p12304_p12 }
  0x2a   : > { %p11804_p1 = pnand %p12316_p0, %p11802_p13 }
  0x2c   : > { %p11805_p2 = pneg %p11804_p1 }
  0x2e   : > { %p11810_p4 = pnand %p11808_p3, %p11805_p2 }
  0x30   : > { %11813 = shalt.err (!%p11810_p4)
}
  0x31   : > { %s11814_s26 = scalar_lea.vmem %s573_s24, 1024  ;;  %p11822_p9 = scmp.lt.s32.totalorder %s573_s24, %s573_s24 }
  0x32   : > { %p11815_p7 = scmp.ne.s32.totalorder %s573_s24, %s11814_s26  ;;  %p11823_p6 = scmp.lt.s32.totalorder %s11814_s26, %s11814_s26 }
  0x34   : > { %p11817_p8 = pnand %p11815_p7, %p12316_p0  ;;  %p11824_p5 = por %p11823_p6, %p11822_p9 }
  0x36   : > { %p11818_p11 = pneg %p11817_p8 }
  0x38   : > { %p11825_p10 = pnand %p11824_p5, %p11818_p11 }
  0x3a   : > { %11828 = shalt.err (!%p11825_p10)
}
  0x3b   : > { %s12111_s2 = smov 64   ;;  %s12112_s30 = smov 4  }
  0x3c   : > { %11555 = dma.hbm_to_vmem [thread:$0]  (!%p12304_p12), %s13801_s11, 1024, %s573_s24, [#allocation6], %s12111_s2, %s12111_s2, %s12112_s30  }
  0x3d   : > { %s12113_s29 = smov [#allocation11]   ;;  %s11829_s25 = scalar_lea.hbm %s13804_s14, 96 }
  0x3e   : > { %s627_s22 = sshll.u32 %s12113_s29, 4  ;;  %p11830_p5 = scmp.ne.s32.totalorder %s13804_s14, %s11829_s25  ;;  %s628_s22 = int_to_ptr.vmem [resolvable:$true] %s627_s22 }
  0x3f   : > { %p11836_p10 = scmp.lt.u32.totalorder %s11829_s25, %s13804_s14 }
  0x40   : > { %p11832_p6 = pnand %p11830_p5, %p12316_p0 }
  0x42   : > { %p11833_p9 = pneg %p11832_p6 }
  0x44   : > { %p11838_p13 = pnand %p11836_p10, %p11833_p9 }
  0x46   : > { %11841 = shalt.err (!%p11838_p13)
}
  0x47   : > { %s11842_s24 = scalar_lea.vmem %s602_s4, 96  ;;  %p11850_p4 = scmp.lt.s32.totalorder %s602_s4, %s602_s4 }
  0x48   : > { %p11843_p1 = scmp.ne.s32.totalorder %s602_s4, %s11842_s24  ;;  %p11851_p7 = scmp.lt.s32.totalorder %s11842_s24, %s11842_s24 }
  0x4a   : > { %p11845_p2 = pnand %p11843_p1, %p12316_p0  ;;  %p11852_p8 = por %p11851_p7, %p11850_p4 }
  0x4c   : > { %p11846_p3 = pneg %p11845_p2 }
  0x4e   : > { %p11853_p11 = pnand %p11852_p8, %p11846_p3 }
  0x50   : > { %11856 = shalt.err (!%p11853_p11)
}
  0x51   : > { %s13830_s19 = smov 16   ;;  %s12115_s5 = smov 1  }
  0x52   : > { %11561 = dma.hbm_to_vmem [thread:$0]  (!%p12304_p12), %s13804_s14, 96, %s602_s4, [#allocation9], %s13830_s19, %s13830_s19, %s12115_s5  }
  0x53   : > { %s11857_s30 = scalar_lea.hbm %s13806_s16, 32 }
  0x54   : > { %p11858_p5 = scmp.ne.s32.totalorder %s13806_s16, %s11857_s30  ;;  %p11864_p10 = scmp.lt.u32.totalorder %s11857_s30, %s13806_s16 }
  0x56   : > { %p11860_p6 = pnand %p11858_p5, %p12316_p0 }
  0x58   : > { %p11861_p9 = pneg %p11860_p6 }
  0x5a   : > { %p11866_p13 = pnand %p11864_p10, %p11861_p9 }
  0x5c   : > { %11869 = shalt.err (!%p11866_p13)
}
  0x5d   : > { %s11870_s26 = scalar_lea.vmem %s628_s22, 32  ;;  %p11878_p4 = scmp.lt.s32.totalorder %s628_s22, %s628_s22 }
  0x5e   : > { %p11871_p1 = scmp.ne.s32.totalorder %s628_s22, %s11870_s26  ;;  %p11879_p7 = scmp.lt.s32.totalorder %s11870_s26, %s11870_s26 }
  0x60   : > { %p11873_p2 = pnand %p11871_p1, %p12316_p0  ;;  %p11880_p8 = por %p11879_p7, %p11878_p4 }
  0x62   : > { %p11874_p3 = pneg %p11873_p2 }
  0x64   : > { %p11881_p11 = pnand %p11880_p8, %p11874_p3 }
  0x66   : > { %11884 = shalt.err (!%p11881_p11)
}
  0x67   : > { %11567 = dma.hbm_to_vmem [thread:$0]  (!%p12304_p12), %s13806_s16, 32, %s628_s22, [#allocation12], %s13830_s19, %s13830_s19, %s12115_s5  }
  0x68   : > { %s12116_s13 = smov [#allocation2]   ;;  %s12117_s25 = smov [#allocation7]  }
  0x69   : > { %s550_s17 = sshll.u32 %s12116_s13, 4  ;;  %s585_s2 = sshll.u32 %s12117_s25, 4  ;;  %s551_s17 = int_to_ptr.vmem [resolvable:$true] %s550_s17  ;;  %s586_s2 = int_to_ptr.vmem [resolvable:$true] %s585_s2 }
  0x6a   : > { %s11885_s27 = scalar_lea.hbm %s13797_s7, 32 }
  0x6b   : > { %p11886_p5 = scmp.ne.s32.totalorder %s13797_s7, %s11885_s27  ;;  %p11892_p10 = scmp.lt.u32.totalorder %s11885_s27, %s13797_s7 }
  0x6d   : > { %p11888_p6 = pnand %p11886_p5, %p12316_p0 }
  0x6f   : > { %p11889_p9 = pneg %p11888_p6 }
  0x71   : > { %p11894_p13 = pnand %p11892_p10, %p11889_p9 }
  0x73   : > { %11897 = shalt.err (!%p11894_p13)
}
  0x74   : > { %s11898_s22 = scalar_lea.vmem %s551_s17, 32  ;;  %p11906_p4 = scmp.lt.s32.totalorder %s551_s17, %s551_s17 }
  0x75   : > { %p11899_p1 = scmp.ne.s32.totalorder %s551_s17, %s11898_s22  ;;  %p11907_p7 = scmp.lt.s32.totalorder %s11898_s22, %s11898_s22 }
  0x77   : > { %p11901_p2 = pnand %p11899_p1, %p12316_p0  ;;  %p11908_p8 = por %p11907_p7, %p11906_p4 }
  0x79   : > { %p11902_p3 = pneg %p11901_p2 }
  0x7b   : > { %p11909_p11 = pnand %p11908_p8, %p11902_p3 }
  0x7d   : > { %11912 = shalt.err (!%p11909_p11)
}
  0x7e   : > { %11552 = dma.hbm_to_vmem [thread:$0]  (!%p12304_p12), %s13797_s7, 32, %s551_s17, [#allocation3], %s13830_s19, %s13830_s19, %s12115_s5  }
  0x7f   : > { %s11913_s21 = scalar_lea.hbm %s13802_s12, 32 }
  0x80   : > { %p11914_p5 = scmp.ne.s32.totalorder %s13802_s12, %s11913_s21  ;;  %p11920_p10 = scmp.lt.u32.totalorder %s11913_s21, %s13802_s12 }
  0x82   : > { %p11916_p6 = pnand %p11914_p5, %p12316_p0 }
  0x84   : > { %p11917_p9 = pneg %p11916_p6 }
  0x86   : > { %p11922_p13 = pnand %p11920_p10, %p11917_p9 }
  0x88   : > { %11925 = shalt.err (!%p11922_p13)
}
  0x89   : > { %s11926_s4 = scalar_lea.vmem %s586_s2, 32  ;;  %p11934_p4 = scmp.lt.s32.totalorder %s586_s2, %s586_s2 }
  0x8a   : > { %p11927_p1 = scmp.ne.s32.totalorder %s586_s2, %s11926_s4  ;;  %p11935_p7 = scmp.lt.s32.totalorder %s11926_s4, %s11926_s4 }
  0x8c   : > { %p11929_p2 = pnand %p11927_p1, %p12316_p0  ;;  %p11936_p8 = por %p11935_p7, %p11934_p4 }
  0x8e   : > { %p11930_p3 = pneg %p11929_p2 }
  0x90   : > { %p11937_p11 = pnand %p11936_p8, %p11930_p3 }
  0x92   : > { %11940 = shalt.err (!%p11937_p11)
}
  0x93   : > { %11558 = dma.hbm_to_vmem [thread:$0]  (!%p12304_p12), %s13802_s12, 32, %s586_s2, [#allocation6], %s13830_s19, %s13830_s19, %s12115_s5  }
  0x94   : > { %s12118_s24 = smov [#allocation10]   ;;  %s11941_s21 = scalar_lea.hbm %s13805_s15, 1024 }
  0x95   : > { %s614_s13 = sshll.u32 %s12118_s24, 4  ;;  %p11942_p5 = scmp.ne.s32.totalorder %s13805_s15, %s11941_s21  ;;  %s615_s13 = int_to_ptr.vmem [resolvable:$true] %s614_s13 }
  0x96   : > { %p11948_p10 = scmp.lt.u32.totalorder %s11941_s21, %s13805_s15 }
  0x97   : > { %p11944_p6 = pnand %p11942_p5, %p12316_p0 }
  0x99   : > { %p11945_p9 = pneg %p11944_p6 }
  0x9b   : > { %p11950_p13 = pnand %p11948_p10, %p11945_p9 }
  0x9d   : > { %11953 = shalt.err (!%p11950_p13)
}
  0x9e   : > { %s11954_s2 = scalar_lea.vmem %s615_s13, 1024  ;;  %p11962_p4 = scmp.lt.s32.totalorder %s615_s13, %s615_s13 }
  0x9f   : > { %p11955_p1 = scmp.ne.s32.totalorder %s615_s13, %s11954_s2  ;;  %p11963_p7 = scmp.lt.s32.totalorder %s11954_s2, %s11954_s2 }
  0xa1   : > { %p11957_p2 = pnand %p11955_p1, %p12316_p0  ;;  %p11964_p8 = por %p11963_p7, %p11962_p4 }
  0xa3   : > { %p11958_p3 = pneg %p11957_p2 }
  0xa5   : > { %p11965_p11 = pnand %p11964_p8, %p11958_p3 }
  0xa7   : > { %11968 = shalt.err (!%p11965_p11)
}
  0xa8   : > { %s12119_s4 = smov 128   ;;  %s12120_s17 = smov 8  }
  0xa9   : > { %11564 = dma.hbm_to_vmem [thread:$0]  (!%p12304_p12), %s13805_s15, 1024, %s615_s13, [#allocation9], %s12119_s4, %s12119_s4, %s12120_s17  }
  0xaa   : > { %s12121_s25 = smov [#allocation13]   ;;  %s12122_s21 = smov [#allocation14]  }
  0xab   : > { %s643_s30 = sshll.u32 %s12121_s25, 4  ;;  %s660_s27 = sshll.u32 %s12122_s21, 4  ;;  %s644_s30 = int_to_ptr.vmem [resolvable:$true] %s643_s30  ;;  %s12434_s27 = int_to_ptr.vmem [resolvable:$true] %s660_s27 }
  0xac   : > { %s11969_s26 = scalar_lea.hbm %s13808_s18, 32 }
  0xad   : > { %p11970_p5 = scmp.ne.s32.totalorder %s13808_s18, %s11969_s26  ;;  %p11976_p10 = scmp.lt.u32.totalorder %s11969_s26, %s13808_s18 }
  0xaf   : > { %p11972_p6 = pnand %p11970_p5, %p12316_p0 }
  0xb1   : > { %p11973_p9 = pneg %p11972_p6 }
  0xb3   : > { %p11978_p13 = pnand %p11976_p10, %p11973_p9 }
  0xb5   : > { %11981 = shalt.err (!%p11978_p13)
}
  0xb6   : > { %s11982_s4 = scalar_lea.vmem %s644_s30, 32  ;;  %p11990_p4 = scmp.lt.s32.totalorder %s644_s30, %s644_s30 }
  0xb7   : > { %p11983_p1 = scmp.ne.s32.totalorder %s644_s30, %s11982_s4  ;;  %p11991_p7 = scmp.lt.s32.totalorder %s11982_s4, %s11982_s4 }
  0xb9   : > { %p11985_p2 = pnand %p11983_p1, %p12316_p0  ;;  %p11992_p8 = por %p11991_p7, %p11990_p4 }
  0xbb   : > { %p11986_p3 = pneg %p11985_p2 }
  0xbd   : > { %p11993_p11 = pnand %p11992_p8, %p11986_p3 }
  0xbf   : > { %11996 = shalt.err (!%p11993_p11)
}
  0xc0   : > { %s13868_s19 = smov 16   ;;  %s11997_s29 = scalar_lea.hbm %s13810_s20, 16 }
  0xc1   : > { %11570 = dma.hbm_to_vmem [thread:$0]  (!%p12304_p12), %s13808_s18, 32, %s644_s30, [#allocation12], %s13868_s19, %s13868_s19, %s12115_s5  }
  0xc2   : > { %p11998_p5 = scmp.ne.s32.totalorder %s13810_s20, %s11997_s29  ;;  %p12004_p10 = scmp.lt.u32.totalorder %s11997_s29, %s13810_s20 }
  0xc4   : > { %p12000_p6 = pnand %p11998_p5, %p12316_p0 }
  0xc6   : > { %p12001_p9 = pneg %p12000_p6 }
  0xc8   : > { %p12006_p13 = pnand %p12004_p10, %p12001_p9 }
  0xca   : > { %12009 = shalt.err (!%p12006_p13)
}
  0xcb   : > { %s12010_s5 = scalar_lea.vmem %s12434_s27, 16  ;;  %s12017_s30 = scalar_lea.vmem %s12434_s27, 32 }
  0xcc   : > { %p12011_p1 = scmp.ne.s32.totalorder %s12434_s27, %s12010_s5  ;;  %p12018_p4 = scmp.lt.s32.totalorder %s12434_s27, %s12434_s27 }
  0xcd   : > { %p12019_p7 = scmp.lt.s32.totalorder %s12017_s30, %s12010_s5 }
  0xce   : > { %p12013_p2 = pnand %p12011_p1, %p12316_p0 }
  0xcf   : > { %p12020_p8 = por %p12019_p7, %p12018_p4 }
  0xd0   : > { %p12014_p3 = pneg %p12013_p2 }
  0xd2   : > { %p12021_p11 = pnand %p12020_p8, %p12014_p3 }
  0xd4   : > { %12024 = shalt.err (!%p12021_p11)
}
  0xd5   : > { %11573 = dma.hbm_to_vmem [thread:$0]  (!%p12304_p12), %s13810_s20, 16, %s12434_s27, [#allocation15]  }
  0xd6   : > { %p13869_p5 = scmp.ne.s32.totalorder %s13865_s23, 0 }
  0xd7   : > { %p13870_p0 = scmp.eq.s32.totalorder (!%p13869_p5), %s12268_s3, 0 }
  0xd8   : > { %694 = sbr.rel (%p13869_p5) target bundleno = 7377 (0x1cd1), region = 104 }
  0xdf   : > { %12070 = dma.done.wait (%p13870_p0), [#allocation3], 32   ;;  %p13871_p6 = pmov %p13870_p0 }
  0xe0   : > { %p13872_p9 = pmov %p13870_p0 }
  0xe1   : > { %12072 = vsyncadd (%p13871_p6), [#allocation3], 4294967264 }
  0xe2   : > { %12074 = dma.done.wait (%p13872_p9), [#allocation6], 1056   ;;  %p13873_p10 = pmov %p13870_p0 }
  0xe3   : > { %p13874_p13 = pmov %p13870_p0 }
  0xe4   : > { %12076 = vsyncadd (%p13873_p10), [#allocation6], 4294966240 }
  0xe5   : > { %12078 = dma.done.wait (%p13874_p13), [#allocation9], 1120   ;;  %p13875_p12 = pmov %p13870_p0 }
  0xe6   : > { %p13876_p1 = pmov %p13870_p0 }
  0xe7   : > { %12080 = vsyncadd (%p13875_p12), [#allocation9], 4294966176 }
  0xe8   : > { %12082 = dma.done.wait (%p13876_p1), [#allocation12], 64   ;;  %p13877_p2 = pmov %p13870_p0 }
  0xe9   : > { %p13878_p3 = pmov %p13870_p0 }
  0xea   : > { %12084 = vsyncadd (%p13877_p2), [#allocation12], 4294967232 }
  0xeb   : > { %12086 = dma.done.wait (%p13878_p3), [#allocation15], 16   ;;  %p13879_p4 = pmov %p13870_p0 }
  0xec   : > { %p789_p7 = scmp.lt.s32.totalorder %s12268_s3, 1  ;;  %v12123_v0 = vmov 0.0|0.0   ;;  %vm12124_vm0 = vmmov 0   ;;  %v12125_v1 = vmov 0.0   ;;  %s13880_s27 = sld [smem:[#allocation36_spill]]  ;;  %vm897_vm1 = vcmask 261120  }
  0xed   : > { %12088 = vsyncadd (%p13879_p4), [#allocation15], 4294967280  ;;  %11401 = vmatprep.subr.bf16.mxu1 %v12123_v0  ;;  %10735 = vmatprep.mubr.msk.f32.mxu1 %vm12124_vm0, %v12125_v1  ;;  %s13882_s5 = sld [smem:[#allocation32_spill]]  ;;  %v12126_v9 = vmov 0   ;;  %s12127_s13 = smov 116   ;;  %v806_v23 = vlaneseq  ;;  %vm816_vm2 = vcmask 130048  }
  0xee   : > { %11398 = vmatprep.subr.bf16.mxu0 %v12123_v0  ;;  %10724 = vmatprep.mubr.msk.f32.mxu0 %vm12124_vm0, %v12125_v1  ;;  %s790_s23 = scalar_select %p789_p7, %s12268_s3, 1  ;;  %vm997_vm4 = vcmask 31744   ;;  %vm1604_vm6 = vcmask 64512   ;;  %vm2304_vm7 = vcmask 1043456  }
  0xef   : > { %11654 = vset.pattern.permute.xlu1 %v12126_v9  ;;  %11655 = vset.pattern.permute.xlu0 %v12126_v9  ;;  %s13843_s4 = smov 124   ;;  %s13883_s1 = sld [smem:[#allocation35_spill]]  ;;  %v807_v24 = vand.u32 127, %v806_v23 }
  0xf0   : > { %s12523_s26 = sshll.u32 %s790_s23, 3  ;;  %s12129_s24 = smov 112  }
  0xf1   : > { %s13841_s25 = smov 120   ;;  %s13884_s0 = sld [smem:[#allocation31_spill]] }
  0xf2   : > { %s13881_s19 = smov %s13880_s27  ;;  %v893_v2 = vld [vmem:[%s13880_s27] sm:$0xff]  ;;  %s13837_s22 = smov 104  }
  0xf3   : > { %v894_v3 = vld [vmem:[%s13881_s19 + $0x8] sm:$0xff]  ;;  %v895_v4 = vld [vmem:[%s13881_s19 + $0x10] sm:$0xff]  ;;  %v896_v6 = vld [vmem:[%s13881_s19 + $0x18] sm:$0xff]  ;;  %s12530_s30 = scalar_lea.vmem %s13882_s5, %s12523_s26  ;;  %s13839_s5 = smov 108  }
  0xf4   : > { %v11402_v5 = vpack.c.bf16 %v894_v3, %v893_v2  ;;  %v11405_v7 = vpack.c.bf16 %v896_v6, %v895_v4  ;;  %v12533_v8 = vld [vmem:[%s12530_s30] sm:$0xff]  ;;  %s13835_s23 = smov 100   ;;  %s13833_s28 = smov 96  }
  0xf5   : > { %v814_v12 = vld [vmem:[%s13883_s1] sm:$0xff]  ;;  %v815_v13 = vld [vmem:[%s13883_s1 + $0x8] sm:$0xff]  ;;  %s13885_s21 = sld [smem:[#allocation33_spill]]  ;;  %s13889_s17 = sld [smem:[#allocation38_spill]] }
  0xf6   : > { %11403 = vmatpush3.bf16.msra.mxu1 %v11402_v5  ;;  %v11399_v14 = vpack.c.bf16 %v815_v13, %v814_v12  ;;  %s10433_s27 = sshll.u32 %s12268_s3, 7  ;;  %s12136_s3 = smov [#allocation16]  }
  0xf7   : > { %11404 = vmatprep.subr.bf16.mxu1 %v12123_v0  ;;  %s792_s2 = scalar_lea.vmem %s13884_s0, %s12523_s26  ;;  %s13886_s0 = sld [smem:[#allocation34_spill]] }
  0xf8   : > { %11400 = vmatpush3.bf16.msra.mxu0 %v11399_v14  ;;  %v805_v15 = vld [vmem:[%s792_s2] sm:$0xff]  ;;  %s13894_s2 = smov 64  }
  0xf9   : > { %10738 = vmatprep.subr.mxu0 %v12125_v1 }
  0xfa   : > { %11406 = vmatpush3.bf16.msra.mxu1 %v11405_v7 }
  0xfb   : > { %10748 = vmatprep.subr.mxu1 %v12125_v1  ;;  %s800_s29 = scalar_lea.vmem %s13885_s21, %s12523_s26  ;;  %s13831_s26 = smov 64  }
  0xfc   : > { %v802_v35 = vld [vmem:[%s800_s29] sm:$0xff]  ;;  %s13897_s21 = sld [smem:[#allocation39_spill]] }
  0xfd   : > { %10736 = vmatmul.mubr.msk.f32.vlgmr.msra.gmra.mrb[0].mxu1 %vm897_vm1, %v12533_v8  ;;  %vm803_vm5 = vcmp.eq.f32.partialorder %v802_v35, 0.0 }
  0xfe   : > { %10750 = vmatprep.mubr.msk.f32.mxu1 %vm12124_vm0, %v12125_v1  ;;  %v12656_v38 = vsel %vm803_vm5, -1e+20, %v12125_v1 }
 0x1d0   : > { %v12540_v10 = vpop.f32.mrb[0].mxu1 }
 0x1d1   : > { %976 = vrot.lane.b32.xlu1 %v12540_v10, %s12127_s13  ;;  %972 = vrot.lane.b32.xlu0 %v12540_v10, %s13843_s4  ;;  %v10737_v11 = vpop.f32.mrb[1].mxu1 }
 0x1d5   : > { %978 = vrot.lane.b32.xlu1 %v12540_v10, %s12129_s24  ;;  %974 = vrot.lane.b32.xlu0 %v12540_v10, %s13841_s25 }
 0x1d9   : > { %982 = vrot.lane.b32.xlu1 %v12540_v10, %s13837_s22  ;;  %980 = vrot.lane.b32.xlu0 %v12540_v10, %s13839_s5 }
 0x1dd   : > { %809 = vperm.xlu1 %11654, %v805_v15   ;;  %984 = vrot.lane.b32.xlu0 %v12540_v10, %s13835_s23 }
 0x1e1   : > { %995 = vrot.lane.b32.xlu0 %v12540_v10, %s13833_s28 }
 0x243   : > { %v12569_v16 = vpop.permute.xlu1 %976  ;;  %v12571_v17 = vpop.permute.xlu0 %972 }
 0x244   : > { %1072 = vrot.lane.b32.xlu1 %v12571_v17, %s13833_s28 }
 0x247   : > { %v12575_v18 = vpop.permute.xlu0 %974  ;;  %v12581_v19 = vpop.permute.xlu1 %978 }
 0x248   : > { %1224 = vrot.lane.b32.xlu1 %v12569_v16, %s13833_s28  ;;  %1148 = vrot.lane.b32.xlu0 %v12575_v18, %s13833_s28 }
 0x24b   : > { %v12583_v20 = vpop.permute.xlu0 %980  ;;  %v12589_v21 = vpop.permute.xlu1 %982 }
 0x24c   : > { %1300 = vrot.lane.b32.xlu0 %v12581_v19, %s13833_s28  ;;  %1376 = vrot.lane.b32.xlu1 %v12583_v20, %s13833_s28 }
 0x24f   : > { %v12591_v22 = vpop.permute.xlu0 %984 }
 0x250   : > { %1452 = vrot.lane.b32.xlu0 %v12589_v21, %s13833_s28  ;;  %1528 = vrot.lane.b32.xlu1 %v12591_v22, %s13833_s28 }
 0x253   : > { %v996_v27 = vpop.permute.xlu0 %995 }
 0x25c   : > { %v810_v25 = vpop.permute.xlu1 %809 }
 0x25d   : > { %vm811_vm3 = vcmp.eq.s32.totalorder %v810_v25, %v807_v24 }
 0x25e   : > { %v10193_v26 = vsel %vm811_vm3, 1.0, %v12125_v1 }
 0x25f   : > { %10725 = vmatmul.mubr.msk.f32.vlgmr.msra.gmra.mrb[0].mxu0 %vm816_vm2, %v10193_v26 }
 0x260   : > { %10739 = vmatpush3.xpose.msk.msra.mxu0 %vm997_vm4, %v996_v27  ;;  %10740 = vmatprep.mubr.msk.f32.mxu0 %vm12124_vm0, %v12125_v1 }
 0x261   : > { %10743 = vmatprep.subr.mxu0 %v12125_v1 }
 0x263   : > { %10741 = vmatmul.mubr.msk.f32.vlgmr.msra.gmra.mrb[2].mxu0 %vm997_vm4, %v12540_v10 }
 0x264   : > { %10745 = vmatprep.mubr.msk.f32.mxu0 %vm12124_vm0, %v12125_v1 }
 0x2b6   : > { %v1073_v28 = vpop.permute.xlu1 %1072 }
 0x2b7   : > { %10744 = vmatpush3.xpose.msk.msra.mxu0 %vm997_vm4, %v1073_v28 }
 0x2b8   : > { %10753 = vmatprep.subr.mxu0 %v12125_v1 }
 0x2ba   : > { %v1225_v29 = vpop.permute.xlu1 %1224  ;;  %10746 = vmatmul.mubr.msk.f32.vlgmr.msra.gmra.mrb[4].mxu0 %vm997_vm4, %v12571_v17  ;;  %v1149_v30 = vpop.permute.xlu0 %1148 }
 0x2bb   : > { %10749 = vmatpush3.xpose.msk.msra.mxu1 %vm997_vm4, %v1149_v30  ;;  %10754 = vmatpush3.xpose.msk.msra.mxu0 %vm997_vm4, %v1225_v29 }
 0x2bc   : > { %10755 = vmatprep.mubr.msk.f32.mxu0 %vm12124_vm0, %v12125_v1  ;;  %10758 = vmatprep.subr.mxu1 %v12125_v1 }
 0x2bd   : > { %10763 = vmatprep.subr.mxu0 %v12125_v1 }
 0x2be   : > { %v1377_v31 = vpop.permute.xlu1 %1376  ;;  %10751 = vmatmul.mubr.msk.f32.vlgmr.msra.gmra.mrb[2].mxu1 %vm997_vm4, %v12575_v18  ;;  %10756 = vmatmul.mubr.msk.f32.vlgmr.msra.gmra.mrb[6].mxu0 %vm997_vm4, %v12569_v16  ;;  %v1301_v32 = vpop.permute.xlu0 %1300 }
 0x2bf   : > { %10759 = vmatpush3.xpose.msk.msra.mxu1 %vm997_vm4, %v1301_v32  ;;  %10764 = vmatpush3.xpose.msk.msra.mxu0 %vm997_vm4, %v1377_v31 }
 0x2c0   : > { %10760 = vmatprep.mubr.msk.f32.mxu1 %vm12124_vm0, %v12125_v1  ;;  %10765 = vmatprep.mubr.msk.f32.mxu0 %vm12124_vm0, %v12125_v1 }
 0x2c1   : > { %10768 = vmatprep.subr.mxu1 %v12125_v1  ;;  %10773 = vmatprep.subr.mxu0 %v12125_v1 }
 0x2c2   : > { %v1529_v33 = vpop.permute.xlu1 %1528  ;;  %10761 = vmatmul.mubr.msk.f32.vlgmr.msra.gmra.mrb[4].mxu1 %vm997_vm4, %v12581_v19  ;;  %10766 = vmatmul.mubr.msk.f32.vlgmr.msra.gmra.mrb[8].mxu0 %vm997_vm4, %v12583_v20  ;;  %v1453_v34 = vpop.permute.xlu0 %1452 }
 0x2c3   : > { %10769 = vmatpush3.xpose.msk.msra.mxu1 %vm997_vm4, %v1453_v34  ;;  %10774 = vmatpush3.xpose.msk.msra.mxu0 %vm997_vm4, %v1529_v33 }
 0x2c4   : > { %10770 = vmatprep.mubr.msk.f32.mxu1 %vm12124_vm0, %v12125_v1  ;;  %10775 = vmatprep.mubr.msk.f32.mxu0 %vm12124_vm0, %v12125_v1 }
 0x2c5   : > { %10778 = vmatprep.subr.mxu1 %v12125_v1  ;;  %10783 = vmatprep.subr.mxu0 %v12125_v1 }
 0x2c6   : > { %10771 = vmatmul.mubr.msk.f32.vlgmr.msra.gmra.mrb[6].mxu1 %vm997_vm4, %v12589_v21  ;;  %10776 = vmatmul.mubr.msk.f32.vlgmr.msra.gmra.mrb[10].mxu0 %vm997_vm4, %v12591_v22 }
 0x2c7   : > { %10780 = vmatprep.mubr.msk.f32.mxu1 %vm12124_vm0, %v12125_v1  ;;  %10785 = vmatprep.mubr.msk.f32.mxu0 %vm12124_vm0, %v12125_v1 }
 0x332   : > { %v12653_v36 = vpop.f32.mrb[0].mxu0 }
 0x333   : > { %v10726_v37 = vpop.f32.mrb[1].mxu0 }
 0x336   : > { %v1068_v39 = vpop.f32.mrb[2].mxu0 }
 0x337   : > { %v1069_v40 = vadd.f32 %v1068_v39, %v12656_v38  ;;  %v10742_v41 = vpop.f32.mrb[3].mxu0 }
 0x339   : > { %v1605_v42 = vsel %vm1604_vm6, %v1069_v40, -inf }
 0x33a   : > { %1606 = vmax.xlane.f32.xlu0 %v1605_v42 }
 0x38d   : > { %v1144_v43 = vpop.f32.mrb[4].mxu0 }
 0x38e   : > { %v1145_v44 = vadd.f32 %v1144_v43, %v12656_v38  ;;  %v10747_v45 = vpop.f32.mrb[5].mxu0 }
 0x390   : > { %v1608_v46 = vsel %vm1604_vm6, %v1145_v44, -inf }
 0x391   : > { %1609 = vmax.xlane.f32.xlu1 %v1608_v46  ;;  %v1220_v47 = vpop.f32.mrb[2].mxu1  ;;  %v1296_v48 = vpop.f32.mrb[6].mxu0 }
 0x392   : > { %v1221_v49 = vadd.f32 %v1220_v47, %v12656_v38  ;;  %v10752_v50 = vpop.f32.mrb[3].mxu1  ;;  %v10757_v51 = vpop.f32.mrb[7].mxu0  ;;  %v1297_v52 = vadd.f32 %v1296_v48, %v12656_v38 }
 0x394   : > { %v1611_v53 = vsel %vm1604_vm6, %v1221_v49, -inf  ;;  %v1614_v60 = vsel %vm1604_vm6, %v1297_v52, -inf }
 0x395   : > { %v1448_v54 = vpop.f32.mrb[8].mxu0  ;;  %1612 = vmax.xlane.f32.xlu0 %v1611_v53  ;;  %v1372_v55 = vpop.f32.mrb[4].mxu1 }
 0x396   : > { %v1373_v56 = vadd.f32 %v1372_v55, %v12656_v38  ;;  %v10762_v57 = vpop.f32.mrb[5].mxu1  ;;  %v10767_v58 = vpop.f32.mrb[9].mxu0  ;;  %v1449_v59 = vadd.f32 %v1448_v54, %v12656_v38 }
 0x398   : > { %v1617_v61 = vsel %vm1604_vm6, %v1373_v56, -inf  ;;  %v1620_v6 = vsel %vm1604_vm6, %v1449_v59, -inf }
 0x399   : > { %v1600_v62 = vpop.f32.mrb[10].mxu0  ;;  %1615 = vmax.xlane.f32.xlu0 %v1614_v60  ;;  %1618 = vmax.xlane.f32.xlu1 %v1617_v61  ;;  %v1524_v63 = vpop.f32.mrb[6].mxu1 }
 0x39a   : > { %v1525_v2 = vadd.f32 %v1524_v63, %v12656_v38  ;;  %v10772_v3 = vpop.f32.mrb[7].mxu1  ;;  %v10777_v4 = vpop.f32.mrb[11].mxu0  ;;  %v1601_v5 = vadd.f32 %v1600_v62, %v12656_v38 }
 0x39c   : > { %v1623_v7 = vsel %vm1604_vm6, %v1525_v2, -inf  ;;  %v1626_v9 = vsel %vm1604_vm6, %v1601_v5, -inf }
 0x39d   : > { %1621 = vmax.xlane.f32.xlu0 %v1620_v6  ;;  %1624 = vmax.xlane.f32.xlu1 %v1623_v7 }
 0x3a1   : > { %1627 = vmax.xlane.f32.xlu0 %v1626_v9 }
 0x3ae   : > { %1693 = vrot.lane.b32.xlu1 %v12540_v10, %s13831_s26 }
 0x3b2   : > { %1845 = vrot.lane.b32.xlu1 %v12575_v18, %s13831_s26 }
 0x3b6   : > { %1921 = vrot.lane.b32.xlu1 %v12569_v16, %s13831_s26 }
 0x3b7   : > { %1769 = vrot.lane.b32.xlu0 %v12571_v17, %s13831_s26 }
 0x3ba   : > { %2073 = vrot.lane.b32.xlu1 %v12583_v20, %s13831_s26 }
 0x3bb   : > { %1997 = vrot.lane.b32.xlu0 %v12581_v19, %s13831_s26 }
 0x3c7   : > { %v1607_v11 = vpop.xlane.xlu0 %1606 }
 0x3c8   : > { %v1629_v12 = vsub.f32 %v1069_v40, %v1607_v11 }
 0x3ca   : > { %v1637_v13 = vmul.f32 1.442695, %v1629_v12 }
 0x3cc   : > { %11656 = vpow2.f32 %v1637_v13 }
 0x3d6   : > { %v12686_v10 = vpop.eup %11656 }
 0x3d7   : > { %v1653_v14 = vsel %vm1604_vm6, %v12686_v10, 0.0 }
 0x3de   : > { %1654 = vadd.xlane.f32.xlu1 %v1653_v14 }
 0x41e   : > { %v1610_v15 = vpop.xlane.xlu1 %1609 }
 0x41f   : > { %v1630_v16 = vsub.f32 %v1145_v44, %v1610_v15 }
 0x421   : > { %v1639_v18 = vmul.f32 1.442695, %v1630_v16 }
 0x422   : > { %v1613_v17 = vpop.xlane.xlu0 %1612 }
 0x423   : > { %11658 = vpow2.f32 %v1639_v18  ;;  %v1631_v23 = vsub.f32 %v1221_v49, %v1613_v17 }
 0x425   : > { %v1641_v20 = vmul.f32 1.442695, %v1631_v23 }
 0x426   : > { %v1616_v24 = vpop.xlane.xlu0 %1615  ;;  %v1619_v25 = vpop.xlane.xlu1 %1618 }
 0x427   : > { %11660 = vpow2.f32 %v1641_v20  ;;  %v1632_v19 = vsub.f32 %v1297_v52, %v1616_v24  ;;  %v1633_v26 = vsub.f32 %v1373_v56, %v1619_v25  ;;  %v986_v20 = vld [vmem:[%s13796_s6] sm:$0xf] }
 0x429   : > { %v1643_v27 = vmul.f32 1.442695, %v1632_v19  ;;  %v1645_v28 = vmul.f32 1.442695, %v1633_v26  ;;  %v987_v26 = vld [vmem:[%s13796_s6 + $0x4] sm:$0xf] }
 0x42a   : > { %v1622_v29 = vpop.xlane.xlu0 %1621  ;;  %v1625_v30 = vpop.xlane.xlu1 %1624 }
 0x42b   : > { %11662 = vpow2.f32 %v1643_v27  ;;  %v1634_v31 = vsub.f32 %v1449_v59, %v1622_v29  ;;  %v1635_v32 = vsub.f32 %v1525_v2, %v1625_v30  ;;  %v988_v27 = vld [vmem:[%s13796_s6 + $0x8] sm:$0xf]  ;;  %v989_v30 = vld [vmem:[%s13796_s6 + $0xc] sm:$0xf] }
 0x42c   : > { %11664 = vpow2.f32 %v1645_v28 }
 0x42d   : > { %v11659_v33 = vpop.eup %11658  ;;  %v1647_v34 = vmul.f32 1.442695, %v1634_v31  ;;  %v1649_v35 = vmul.f32 1.442695, %v1635_v32 }
 0x42e   : > { %v1628_v37 = vpop.xlane.xlu0 %1627  ;;  %v1694_v39 = vpop.permute.xlu1 %1693  ;;  %v1656_v40 = vsel %vm1604_vm6, %v11659_v33, 0.0 }
 0x42f   : > { %11666 = vpow2.f32 %v1647_v34  ;;  %v1636_v41 = vsub.f32 %v1601_v5, %v1628_v37  ;;  %1657 = vadd.xlane.f32.xlu0 %v1656_v40  ;;  %10779 = vmatpush3.msra.mxu1 %v1694_v39  ;;  %v991_v37 = vld [vmem:[%s13796_s6 + $0x14] sm:$0xf]  ;;  %v992_v40 = vld [vmem:[%s13796_s6 + $0x18] sm:$0xf] }
 0x430   : > { %11668 = vpow2.f32 %v1649_v35  ;;  %10788 = vmatprep.subr.mxu1 %v12125_v1 }
 0x431   : > { %v11661_v42 = vpop.eup %11660  ;;  %v1651_v43 = vmul.f32 1.442695, %v1636_v41  ;;  %v2963_v41 = vld [vmem:[%s13798_s8] sm:$0xff] }
 0x432   : > { %v1770_v44 = vpop.permute.xlu0 %1769  ;;  %v1659_v45 = vsel %vm1604_vm6, %v11661_v42, 0.0  ;;  %v1846_v56 = vpop.permute.xlu1 %1845 }
 0x433   : > { %11670 = vpow2.f32 %v1651_v43  ;;  %10784 = vmatpush3.msra.mxu0 %v1770_v44  ;;  %1660 = vadd.xlane.f32.xlu1 %v1659_v45 }
 0x434   : > { %10793 = vmatprep.subr.mxu0 %v12125_v1 }
 0x435   : > { %v11663_v46 = vpop.eup %11662 }
 0x436   : > { %v11665_v47 = vpop.eup %11664  ;;  %v1662_v48 = vsel %vm1604_vm6, %v11663_v46, 0.0  ;;  %v1922_v57 = vpop.permute.xlu1 %1921 }
 0x437   : > { %1663 = vadd.xlane.f32.xlu0 %v1662_v48  ;;  %v1665_v49 = vsel %vm1604_vm6, %v11665_v47, 0.0 }
 0x438   : > { %1666 = vadd.xlane.f32.xlu1 %v1665_v49  ;;  %v2965_v49 = vld [vmem:[%s13798_s8 + $0x10] sm:$0xff] }
 0x439   : > { %v11667_v50 = vpop.eup %11666 }
 0x43a   : > { %v12696_v51 = vpop.eup %11668  ;;  %v1668_v52 = vsel %vm1604_vm6, %v11667_v50, 0.0  ;;  %v2074_v58 = vpop.permute.xlu1 %2073 }
 0x43b   : > { %1669 = vadd.xlane.f32.xlu0 %v1668_v52  ;;  %v1671_v53 = vsel %vm1604_vm6, %v12696_v51, 0.0 }
 0x43c   : > { %1672 = vadd.xlane.f32.xlu1 %v1671_v53 }
 0x43d   : > { %v12701_v54 = vpop.eup %11670 }
 0x43e   : > { %v1674_v55 = vsel %vm1604_vm6, %v12701_v54, 0.0 }
 0x43f   : > { %1675 = vadd.xlane.f32.xlu0 %v1674_v55  ;;  %v890_v55 = vmul.f32 5.656854, %v12653_v36 }
 0x44d   : > { %2225 = vrot.lane.b32.xlu1 %v12591_v22, %s13831_s26  ;;  %v1998_v22 = vpop.permute.xlu0 %1997 }
 0x455   : > { %2149 = vrot.lane.b32.xlu0 %v12589_v21, %s13831_s26  ;;  %s13887_s26 = sld [smem:[#allocation37_spill]] }
 0x46b   : > { %v1655_v59 = vpop.xlane.xlu1 %1654 }
 0x46c   : > { %11672 = vrcp.f32 %v1655_v59  ;;  %v891_v59 = vld [vmem:[%s13886_s0] sm:$0xff]  ;;  %s13888_s0 = smov %s13887_s26 }
 0x476   : > { %v11673_v60 = vpop.eup %11672 }
 0x477   : > { %v1685_v61 = vmul.f32 %v11673_v60, %v12686_v10 }
 0x479   : > { %10781 = vmatmul.mubr.msk.f32.vlgmr.msra.gmra.mrb[8].mxu1 %vm1604_vm6, %v1685_v61  ;;  %v892_v61 = vadd.f32 %v891_v59, %v890_v55  ;;  %v3114_v55 = vld [vmem:[%s13800_s10] sm:$0xff]  ;;  %v3117_v59 = vld [vmem:[%s13800_s10 + $0x18] sm:$0xff] }
 0x47a   : > { %10789 = vmatpush3.msra.mxu1 %v1846_v56  ;;  %10790 = vmatprep.mubr.msk.f32.mxu1 %vm12124_vm0, %v12125_v1 }
 0x47b   : > { %10798 = vmatprep.subr.mxu1 %v12125_v1 }
 0x4bc   : > { %v1658_v62 = vpop.xlane.xlu0 %1657 }
 0x4bd   : > { %11674 = vrcp.f32 %v1658_v62  ;;  %v3043_v62 = vld [vmem:[%s13799_s9 + $0x18] sm:$0xff] }
 0x4c0   : > { %v1661_v21 = vpop.xlane.xlu1 %1660 }
 0x4c1   : > { %11676 = vrcp.f32 %v1661_v21 }
 0x4c4   : > { %v1664_v63 = vpop.xlane.xlu0 %1663 }
 0x4c5   : > { %11678 = vrcp.f32 %v1664_v63  ;;  %v1667_v2 = vpop.xlane.xlu1 %1666 }
 0x4c6   : > { %11680 = vrcp.f32 %v1667_v2 }
 0x4c7   : > { %v11675_v3 = vpop.eup %11674 }
 0x4c8   : > { %v1670_v4 = vpop.xlane.xlu0 %1669  ;;  %v1686_v5 = vmul.f32 %v11675_v3, %v11659_v33  ;;  %v990_v33 = vld [vmem:[%s13796_s6 + $0x10] sm:$0xf] }
 0x4c9   : > { %11682 = vrcp.f32 %v1670_v4  ;;  %v1673_v6 = vpop.xlane.xlu1 %1672 }
 0x4ca   : > { %11684 = vrcp.f32 %v1673_v6  ;;  %10786 = vmatmul.mubr.msk.f32.vlgmr.msra.gmra.mrb[12].mxu0 %vm1604_vm6, %v1686_v5 }
 0x4cb   : > { %v11677_v7 = vpop.eup %11676  ;;  %10794 = vmatpush3.msra.mxu0 %v1922_v57  ;;  %10795 = vmatprep.mubr.msk.f32.mxu0 %vm12124_vm0, %v12125_v1  ;;  %v3040_v57 = vld [vmem:[%s13799_s9] sm:$0xff] }
 0x4cc   : > { %v1676_v9 = vpop.xlane.xlu0 %1675  ;;  %v1687_v11 = vmul.f32 %v11677_v7, %v11661_v42  ;;  %10803 = vmatprep.subr.mxu0 %v12125_v1  ;;  %v2964_v42 = vld [vmem:[%s13798_s8 + $0x8] sm:$0xff] }
 0x4cd   : > { %11686 = vrcp.f32 %v1676_v9  ;;  %v2226_v24 = vpop.permute.xlu1 %2225 }
 0x4ce   : > { %10791 = vmatmul.mubr.msk.f32.vlgmr.msra.gmra.mrb[10].mxu1 %vm1604_vm6, %v1687_v11 }
 0x4cf   : > { %v11679_v12 = vpop.eup %11678  ;;  %10799 = vmatpush3.msra.mxu1 %v1998_v22  ;;  %10800 = vmatprep.mubr.msk.f32.mxu1 %vm12124_vm0, %v12125_v1  ;;  %v3042_v22 = vld [vmem:[%s13799_s9 + $0x10] sm:$0xff] }
 0x4d0   : > { %v11681_v13 = vpop.eup %11680  ;;  %10808 = vmatprep.subr.mxu1 %v12125_v1  ;;  %v1688_v10 = vmul.f32 %v11679_v12, %v11663_v46  ;;  %v2150_v14 = vpop.permute.xlu0 %2149  ;;  %v11408_v46 = vpack.c.bf16 %v2964_v42, %v2963_v41  ;;  %v11417_v21 = vpack.c.bf16 %v3043_v62, %v3042_v22 }
 0x4d1   : > { %v1689_v15 = vmul.f32 %v11681_v13, %v11665_v47  ;;  %v993_v47 = vld [vmem:[%s13796_s6 + $0x1c] sm:$0xf] }
 0x4d2   : > { %10796 = vmatmul.mubr.msk.f32.vlgmr.msra.gmra.mrb[14].mxu0 %vm1604_vm6, %v1688_v10 }
 0x4d3   : > { %v11683_v16 = vpop.eup %11682  ;;  %10801 = vmatmul.mubr.msk.f32.vlgmr.msra.gmra.mrb[12].mxu1 %vm1604_vm6, %v1689_v15  ;;  %10804 = vmatpush3.msra.mxu0 %v2074_v58  ;;  %v3041_v58 = vld [vmem:[%s13799_s9 + $0x8] sm:$0xff] }
 0x4d4   : > { %v11685_v18 = vpop.eup %11684  ;;  %10809 = vmatpush3.msra.mxu1 %v2150_v14  ;;  %10805 = vmatprep.mubr.msk.f32.mxu0 %vm12124_vm0, %v12125_v1  ;;  %v1690_v17 = vmul.f32 %v11683_v16, %v11667_v50  ;;  %v2966_v50 = vld [vmem:[%s13798_s8 + $0x18] sm:$0xff]  ;;  %v11414_v36 = vpack.c.bf16 %v3041_v58, %v3040_v57  ;;  %v3116_v58 = vld [vmem:[%s13800_s10 + $0x10] sm:$0xff] }
 0x4d5   : > { %10810 = vmatprep.mubr.msk.f32.mxu1 %vm12124_vm0, %v12125_v1  ;;  %10813 = vmatprep.subr.mxu0 %v12125_v1  ;;  %v1691_v23 = vmul.f32 %v11685_v18, %v12696_v51 }
 0x4d6   : > { %10806 = vmatmul.mubr.msk.f32.vlgmr.msra.gmra.mrb[16].mxu0 %vm1604_vm6, %v1690_v17  ;;  %10818 = vmatprep.subr.mxu1 %v12125_v1 }
 0x4d7   : > { %v11687_v25 = vpop.eup %11686  ;;  %10811 = vmatmul.mubr.msk.f32.vlgmr.msra.gmra.mrb[14].mxu1 %vm1604_vm6, %v1691_v23  ;;  %10814 = vmatpush3.msra.mxu0 %v2226_v24 }
 0x4d8   : > { %10815 = vmatprep.mubr.msk.f32.mxu0 %vm12124_vm0, %v12125_v1  ;;  %v1692_v19 = vmul.f32 %v11687_v25, %v12701_v54  ;;  %10819 = vmatpush3.msk.msra.mxu1 %vm2304_vm7, %v986_v20  ;;  %v11411_v54 = vpack.c.bf16 %v2966_v50, %v2965_v49 }
 0x4d9   : > { %10820 = vmatprep.mubr.msk.f32.mxu1 %vm12124_vm0, %v12125_v1  ;;  %10823 = vmatprep.subr.mxu0 %v12125_v1 }
 0x4da   : > { %10816 = vmatmul.mubr.msk.f32.vlgmr.msra.gmra.mrb[18].mxu0 %vm1604_vm6, %v1692_v19  ;;  %10828 = vmatprep.subr.mxu1 %v12125_v1 }
 0x4db   : > { %10825 = vmatprep.mubr.msk.f32.mxu0 %vm12124_vm0, %v12125_v1  ;;  %10824 = vmatpush3.msk.msra.mxu0 %vm2304_vm7, %v987_v26 }
 0x4dc   : > { %10833 = vmatprep.subr.mxu0 %v12125_v1 }
 0x54c   : > { %v1765_v28 = vpop.f32.mrb[8].mxu1 }
 0x54d   : > { %v10782_v29 = vpop.f32.mrb[9].mxu1  ;;  %10821 = vmatmul.mubr.msk.f32.vlgmr.msra.gmra.mrb[16].mxu1 %vm997_vm4, %v1765_v28 }
 0x54e   : > { %10829 = vmatpush3.msk.msra.mxu1 %vm2304_vm7, %v988_v27  ;;  %10830 = vmatprep.mubr.msk.f32.mxu1 %vm12124_vm0, %v12125_v1 }
 0x54f   : > { %10838 = vmatprep.subr.mxu1 %v12125_v1 }
 0x59d   : > { %v1841_v31 = vpop.f32.mrb[12].mxu0 }
 0x59e   : > { %v10787_v32 = vpop.f32.mrb[13].mxu0  ;;  %10826 = vmatmul.mubr.msk.f32.vlgmr.msra.gmra.mrb[20].mxu0 %vm997_vm4, %v1841_v31 }
 0x59f   : > { %10834 = vmatpush3.msk.msra.mxu0 %vm2304_vm7, %v989_v30  ;;  %10835 = vmatprep.mubr.msk.f32.mxu0 %vm12124_vm0, %v12125_v1  ;;  %v10236_v32 = vld [vmem:[#allocation2] ss:$0 sm:$0xff] }
 0x5a0   : > { %10843 = vmatprep.subr.mxu0 %v12125_v1 }
 0x5a1   : > { %v1917_v34 = vpop.f32.mrb[10].mxu1 }
 0x5a2   : > { %v10792_v35 = vpop.f32.mrb[11].mxu1  ;;  %10831 = vmatmul.mubr.msk.f32.vlgmr.msra.gmra.mrb[18].mxu1 %vm997_vm4, %v1917_v34 }
 0x5a3   : > { %10839 = vmatpush3.msk.msra.mxu1 %vm2304_vm7, %v990_v33  ;;  %10840 = vmatprep.mubr.msk.f32.mxu1 %vm12124_vm0, %v12125_v1 }
 0x5a4   : > { %10848 = vmatprep.subr.mxu1 %v12125_v1 }
 0x5a5   : > { %v1993_v39 = vpop.f32.mrb[14].mxu0 }
 0x5a6   : > { %v2069_v43 = vpop.f32.mrb[12].mxu1  ;;  %v10797_v44 = vpop.f32.mrb[15].mxu0  ;;  %10836 = vmatmul.mubr.msk.f32.vlgmr.msra.gmra.mrb[22].mxu0 %vm997_vm4, %v1993_v39 }
 0x5a7   : > { %v10802_v45 = vpop.f32.mrb[13].mxu1  ;;  %10841 = vmatmul.mubr.msk.f32.vlgmr.msra.gmra.mrb[20].mxu1 %vm997_vm4, %v2069_v43  ;;  %10844 = vmatpush3.msk.msra.mxu0 %vm2304_vm7, %v991_v37 }
 0x5a8   : > { %10849 = vmatpush3.msk.msra.mxu1 %vm2304_vm7, %v992_v40  ;;  %10845 = vmatprep.mubr.msk.f32.mxu0 %vm12124_vm0, %v12125_v1 }
 0x5a9   : > { %v2145_v48 = vpop.f32.mrb[16].mxu0  ;;  %10850 = vmatprep.mubr.msk.f32.mxu1 %vm12124_vm0, %v12125_v1  ;;  %11407 = vmatprep.subr.bf16.mxu1 %v12123_v0 }
 0x5aa   : > { %v2221_v51 = vpop.f32.mrb[14].mxu1  ;;  %v10807_v52 = vpop.f32.mrb[17].mxu0  ;;  %10846 = vmatmul.mubr.msk.f32.vlgmr.msra.gmra.mrb[24].mxu0 %vm997_vm4, %v2145_v48  ;;  %10853 = vmatprep.subr.mxu0 %v12125_v1 }
 0x5ab   : > { %v10812_v53 = vpop.f32.mrb[15].mxu1  ;;  %10851 = vmatmul.mubr.msk.f32.vlgmr.msra.gmra.mrb[22].mxu1 %vm997_vm4, %v2221_v51  ;;  %10854 = vmatpush3.msk.msra.mxu0 %vm2304_vm7, %v993_v47 }
 0x5ac   : > { %11409 = vmatpush3.bf16.msra.mxu1 %v11408_v46  ;;  %10855 = vmatprep.mubr.msk.f32.mxu0 %vm12124_vm0, %v12125_v1 }
 0x5ad   : > { %v2297_v56 = vpop.f32.mrb[18].mxu0  ;;  %11410 = vmatprep.subr.bf16.mxu1 %v12123_v0  ;;  %10866 = vmatprep.mubr.msk.f32.mxu1 %vm12124_vm0, %v12125_v1 }
 0x5ae   : > { %v10817_v60 = vpop.f32.mrb[19].mxu0  ;;  %10856 = vmatmul.mubr.msk.f32.vlgmr.msra.gmra.mrb[26].mxu0 %vm997_vm4, %v2297_v56  ;;  %10891 = vmatprep.subr.mxu0 %v12125_v1  ;;  %v3115_v56 = vld [vmem:[%s13800_s10 + $0x8] sm:$0xff] }
 0x5af   : > { %10893 = vmatprep.mubr.msk.f32.mxu0 %vm12124_vm0, %v12125_v1  ;;  %v11420_v57 = vpack.c.bf16 %v3115_v56, %v3114_v55  ;;  %v11423_v60 = vpack.c.bf16 %v3117_v59, %v3116_v58 }
 0x5b0   : > { %11412 = vmatpush3.bf16.msra.mxu1 %v11411_v54 }
 0x5b1   : > { %11413 = vmatprep.subr.bf16.mxu1 %v12123_v0 }
 0x5b3   : > { %10867 = vmatmul.mubr.msk.f32.vlgmr.msra.gmra.mrb[24].mxu1 %vm897_vm1, %v892_v61 }
 0x5b4   : > { %11415 = vmatpush3.bf16.msra.mxu1 %v11414_v36  ;;  %10877 = vmatprep.mubr.msk.f32.mxu1 %vm12124_vm0, %v12125_v1 }
 0x5b5   : > { %11416 = vmatprep.subr.bf16.mxu1 %v12123_v0 }
 0x5b8   : > { %11418 = vmatpush3.bf16.msra.mxu1 %v11417_v21 }
 0x5b9   : > { %11419 = vmatprep.subr.bf16.mxu1 %v12123_v0 }
 0x5bb   : > { %10878 = vmatmul.mubr.msk.f32.vlgmr.msra.gmra.mrb[26].mxu1 %vm897_vm1, %v12533_v8 }
 0x5bc   : > { %10888 = vmatprep.mubr.msk.f32.mxu1 %vm12124_vm0, %v12125_v1  ;;  %11421 = vmatpush3.bf16.msra.mxu1 %v11420_v57 }
 0x5bd   : > { %11422 = vmatprep.subr.bf16.mxu1 %v12123_v0 }
 0x5c0   : > { %11424 = vmatpush3.bf16.msra.mxu1 %v11423_v60 }
 0x5c1   : > { %10901 = vmatprep.subr.mxu1 %v12125_v1 }
 0x620   : > { %v2374_v63 = vpop.f32.mrb[16].mxu1 }
 0x621   : > { %v10822_v2 = vpop.f32.mrb[17].mxu1  ;;  %v2910_v4 = vsel %vm897_vm1, %v2374_v63, 0.0 }
 0x671   : > { %v2450_v3 = vpop.f32.mrb[20].mxu0 }
 0x672   : > { %v2911_v5 = vsel %vm897_vm1, %v2450_v3, 0.0  ;;  %v10827_v6 = vpop.f32.mrb[21].mxu0 }
 0x673   : > { %v2912_v7 = vadd.f32 %v2911_v5, %v2910_v4 }
 0x675   : > { %v2526_v9 = vpop.f32.mrb[18].mxu1 }
 0x676   : > { %v2913_v11 = vsel %vm897_vm1, %v2526_v9, 0.0  ;;  %v10832_v12 = vpop.f32.mrb[19].mxu1  ;;  %v10237_v9 = vld [vmem:[%s13887_s26] ss:$0 sm:$0xff]  ;;  %s13893_s26 = smov 96  }
 0x677   : > { %v2914_v13 = vadd.f32 %v2913_v11, %v2912_v7 }
 0x679   : > { %v2602_v10 = vpop.f32.mrb[22].mxu0 }
 0x67a   : > { %v2915_v14 = vsel %vm897_vm1, %v2602_v10, 0.0  ;;  %v2678_v15 = vpop.f32.mrb[20].mxu1  ;;  %v10837_v16 = vpop.f32.mrb[23].mxu0 }
 0x67b   : > { %v2916_v18 = vadd.f32 %v2915_v14, %v2914_v13  ;;  %v10842_v17 = vpop.f32.mrb[21].mxu1  ;;  %v2917_v23 = vsel %vm897_vm1, %v2678_v15, 0.0  ;;  %v10238_v13 = vld [vmem:[#allocation8] ss:$0 sm:$0xff] }
 0x67d   : > { %v2918_v20 = vadd.f32 %v2917_v23, %v2916_v18  ;;  %v2754_v24 = vpop.f32.mrb[24].mxu0 }
 0x67e   : > { %v2919_v25 = vsel %vm897_vm1, %v2754_v24, 0.0  ;;  %v2830_v19 = vpop.f32.mrb[22].mxu1  ;;  %v10847_v26 = vpop.f32.mrb[25].mxu0 }
 0x67f   : > { %v2920_v27 = vadd.f32 %v2919_v25, %v2918_v20  ;;  %v10852_v28 = vpop.f32.mrb[23].mxu1  ;;  %v2921_v29 = vsel %vm897_vm1, %v2830_v19, 0.0 }
 0x681   : > { %v2922_v30 = vadd.f32 %v2921_v29, %v2920_v27  ;;  %v2906_v31 = vpop.f32.mrb[26].mxu0 }
 0x682   : > { %v2923_v33 = vsel %vm897_vm1, %v2906_v31, 0.0  ;;  %v10857_v34 = vpop.f32.mrb[27].mxu0 }
 0x683   : > { %v2924_v35 = vadd.f32 %v2923_v33, %v2922_v30 }
 0x685   : > { %v2931_v37 = vadd.f32 %v10236_v32, %v2924_v35 }
 0x686   : > { %v3036_v39 = vpop.f32.mrb[24].mxu1 }
 0x687   : > { %v10868_v40 = vpop.f32.mrb[25].mxu1  ;;  %v2932_v41 = vadd.f32 %v2931_v37, %v12533_v8 }
 0x689   : > { %v2935_v42 = vsel %vm897_vm1, %v2932_v41, 0.0 }
 0x68a   : > { %2936 = vadd.xlane.f32.xlu0 %v2935_v42 }
 0x68e   : > { %v3110_v43 = vpop.f32.mrb[26].mxu1 }
 0x68f   : > { %10892 = vmatpush3.xpose.msk.msra.mxu0 %vm997_vm4, %v3110_v43  ;;  %3209 = vrot.lane.b32.xlu1 %v3110_v43, %s13841_s25  ;;  %v10879_v44 = vpop.f32.mrb[27].mxu1 }
 0x690   : > { %10896 = vmatprep.subr.mxu0 %v12125_v1 }
 0x692   : > { %10894 = vmatmul.mubr.msk.f32.vlgmr.msra.gmra.mrb[28].mxu0 %vm997_vm4, %v3036_v39 }
 0x693   : > { %3211 = vrot.lane.b32.xlu1 %v3110_v43, %s12127_s13  ;;  %10898 = vmatprep.mubr.msk.f32.mxu0 %vm12124_vm0, %v12125_v1 }
 0x6a0   : > { %3192 = vrot.lane.b32.xlu0 %v3036_v39, %s13843_s4 }
 0x6a4   : > { %3194 = vrot.lane.b32.xlu0 %v3036_v39, %s13841_s25 }
 0x6a8   : > { %3207 = vrot.lane.b32.xlu0 %v3110_v43, %s13843_s4 }
 0x6ac   : > { %3196 = vrot.lane.b32.xlu0 %v3036_v39, %s12127_s13 }
 0x6b0   : > { %3198 = vrot.lane.b32.xlu0 %v3036_v39, %s12129_s24 }
 0x6b4   : > { %3200 = vrot.lane.b32.xlu0 %v3036_v39, %s13839_s5 }
 0x6b8   : > { %3202 = vrot.lane.b32.xlu0 %v3036_v39, %s13837_s22 }
 0x701   : > { %v3210_v51 = vpop.permute.xlu1 %3209 }
 0x705   : > { %v3212_v53 = vpop.permute.xlu1 %3211 }
 0x717   : > { %v2937_v8 = vpop.xlane.xlu0 %2936 }
 0x718   : > { %v2939_v45 = vmul.f32 0.03125, %v2937_v8 }
 0x71a   : > { %v2940_v46 = vsub.f32 %v2932_v41, %v2939_v45 }
 0x71b   : > { %v3193_v47 = vpop.permute.xlu0 %3192 }
 0x71c   : > { %v2941_v48 = vmul.f32 %v2940_v46, %v2940_v46 }
 0x71e   : > { %v2942_v49 = vsel %vm897_vm1, %v2941_v48, 0.0 }
 0x71f   : > { %v3195_v50 = vpop.permute.xlu0 %3194  ;;  %2943 = vadd.xlane.f32.xlu1 %v2942_v49 }
 0x723   : > { %v3208_v52 = vpop.permute.xlu0 %3207 }
 0x724   : > { %10897 = vmatpush3.xpose.msk.msra.mxu0 %vm997_vm4, %v3208_v52 }
 0x725   : > { %10906 = vmatprep.subr.mxu0 %v12125_v1 }
 0x727   : > { %10899 = vmatmul.mubr.msk.f32.vlgmr.msra.gmra.mrb[30].mxu0 %vm997_vm4, %v3193_v47  ;;  %v3197_v54 = vpop.permute.xlu0 %3196 }
 0x728   : > { %10907 = vmatpush3.xpose.msk.msra.mxu0 %vm997_vm4, %v3212_v53  ;;  %10908 = vmatprep.mubr.msk.f32.mxu0 %vm12124_vm0, %v12125_v1 }
 0x729   : > { %10916 = vmatprep.subr.mxu0 %v12125_v1 }
 0x72b   : > { %10909 = vmatmul.mubr.msk.f32.vlgmr.msra.gmra.mrb[32].mxu0 %vm997_vm4, %v3197_v54  ;;  %v3199_v3 = vpop.permute.xlu0 %3198 }
 0x72c   : > { %10918 = vmatprep.mubr.msk.f32.mxu0 %vm12124_vm0, %v12125_v1 }
 0x72f   : > { %v3201_v5 = vpop.permute.xlu0 %3200 }
 0x730   : > { %3213 = vrot.lane.b32.xlu1 %v3110_v43, %s12129_s24 }
 0x733   : > { %v3203_v16 = vpop.permute.xlu0 %3202 }
 0x734   : > { %3215 = vrot.lane.b32.xlu1 %v3110_v43, %s13839_s5 }
 0x738   : > { %3217 = vrot.lane.b32.xlu1 %v3110_v43, %s13837_s22 }
 0x73c   : > { %3219 = vrot.lane.b32.xlu1 %v3110_v43, %s13835_s23 }
 0x740   : > { %3204 = vrot.lane.b32.xlu1 %v3036_v39, %s13835_s23 }
 0x765   : > { %v3322_v36 = vpop.f32.mrb[28].mxu0 }
 0x766   : > { %v10895_v61 = vpop.f32.mrb[29].mxu0  ;;  %v3844_v22 = vsel %vm1604_vm6, %v3322_v36, -inf }
 0x767   : > { %3845 = vmax.xlane.f32.xlu0 %v3844_v22 }
 0x7ac   : > { %v2944_v62 = vpop.xlane.xlu1 %2943 }
 0x7ad   : > { %v2945_v21 = vmul.f32 0.03125, %v2944_v62 }
 0x7af   : > { %v2946_v63 = vadd.f32 1e-05, %v2945_v21 }
 0x7b0   : > { %v3214_v2 = vpop.permute.xlu1 %3213 }
 0x7b1   : > { %11688 = vrsqrt.f32 %v2946_v63 }
 0x7b4   : > { %v3216_v4 = vpop.permute.xlu1 %3215 }
 0x7b5   : > { %10917 = vmatpush3.xpose.msk.msra.mxu0 %vm997_vm4, %v3216_v4 }
 0x7b6   : > { %10926 = vmatprep.subr.mxu0 %v12125_v1 }
 0x7b8   : > { %v3218_v6 = vpop.permute.xlu1 %3217  ;;  %10919 = vmatmul.mubr.msk.f32.vlgmr.msra.gmra.mrb[34].mxu0 %vm997_vm4, %v3201_v5 }
 0x7b9   : > { %10928 = vmatprep.mubr.msk.f32.mxu0 %vm12124_vm0, %v12125_v1 }
 0x7bb   : > { %v11689_v7 = vpop.eup %11688 }
 0x7bc   : > { %v2948_v11 = vmul.f32 %v11689_v7, %v2940_v46  ;;  %v3220_v12 = vpop.permute.xlu1 %3219 }
 0x7bd   : > { %10927 = vmatpush3.xpose.msk.msra.mxu0 %vm997_vm4, %v3220_v12 }
 0x7be   : > { %v2955_v10 = vmul.f32 %v10237_v9, %v2948_v11  ;;  %10936 = vmatprep.subr.mxu0 %v12125_v1 }
 0x7c0   : > { %v3205_v14 = vpop.permute.xlu1 %3204  ;;  %v12910_v15 = vadd.f32 %v10238_v13, %v2955_v10 }
 0x7c1   : > { %10929 = vmatmul.mubr.msk.f32.vlgmr.msra.gmra.mrb[36].mxu0 %vm997_vm4, %v3205_v14 }
 0x7c2   : > { %10889 = vmatmul.mubr.msk.f32.vlgmr.msra.gmra.mrb[28].mxu1 %vm897_vm1, %v12910_v15  ;;  %10938 = vmatprep.mubr.msk.f32.mxu0 %vm12124_vm0, %v12125_v1 }
 0x7c3   : > { %10902 = vmatpush3.xpose.msk.msra.mxu1 %vm997_vm4, %v3210_v51  ;;  %10903 = vmatprep.mubr.msk.f32.mxu1 %vm12124_vm0, %v12125_v1 }
 0x7c4   : > { %10911 = vmatprep.subr.mxu1 %v12125_v1 }
 0x7c6   : > { %10904 = vmatmul.mubr.msk.f32.vlgmr.msra.gmra.mrb[30].mxu1 %vm997_vm4, %v3195_v50 }
 0x7c7   : > { %10912 = vmatpush3.xpose.msk.msra.mxu1 %vm997_vm4, %v3214_v2  ;;  %10913 = vmatprep.mubr.msk.f32.mxu1 %vm12124_vm0, %v12125_v1 }
 0x7c8   : > { %10921 = vmatprep.subr.mxu1 %v12125_v1 }
 0x7ca   : > { %10914 = vmatmul.mubr.msk.f32.vlgmr.msra.gmra.mrb[32].mxu1 %vm997_vm4, %v3199_v3 }
 0x7cb   : > { %10922 = vmatpush3.xpose.msk.msra.mxu1 %vm997_vm4, %v3218_v6  ;;  %10923 = vmatprep.mubr.msk.f32.mxu1 %vm12124_vm0, %v12125_v1 }
 0x7cc   : > { %10931 = vmatprep.subr.mxu1 %v12125_v1 }
 0x7ce   : > { %10924 = vmatmul.mubr.msk.f32.vlgmr.msra.gmra.mrb[34].mxu1 %vm997_vm4, %v3203_v16 }
 0x7cf   : > { %10933 = vmatprep.mubr.msk.f32.mxu1 %vm12124_vm0, %v12125_v1 }
 0x7f4   : > { %v3846_v26 = vpop.xlane.xlu0 %3845 }
 0x7f5   : > { %v3868_v27 = vsub.f32 %v3322_v36, %v3846_v26 }
 0x7f7   : > { %v3876_v30 = vmul.f32 1.442695, %v3868_v27 }
 0x7f9   : > { %11690 = vpow2.f32 %v3876_v30 }
 0x7fa   : > { %v3396_v18 = vpop.f32.mrb[30].mxu0 }
 0x7fb   : > { %v10900_v17 = vpop.f32.mrb[31].mxu0  ;;  %v3847_v23 = vsel %vm1604_vm6, %v3396_v18, -inf }
 0x7fc   : > { %3848 = vmax.xlane.f32.xlu1 %v3847_v23 }
 0x7fe   : > { %v3544_v20 = vpop.f32.mrb[32].mxu0 }
 0x7ff   : > { %v10910_v24 = vpop.f32.mrb[33].mxu0  ;;  %v3853_v43 = vsel %vm1604_vm6, %v3544_v20, -inf }
 0x803   : > { %v11691_v48 = vpop.eup %11690 }
 0x804   : > { %v3892_v50 = vsel %vm1604_vm6, %v11691_v48, 0.0 }
 0x889   : > { %v3849_v28 = vpop.xlane.xlu1 %3848 }
 0x88a   : > { %v3869_v31 = vsub.f32 %v3396_v18, %v3849_v28 }
 0x88b   : > { %v3692_v25 = vpop.f32.mrb[34].mxu0 }
 0x88c   : > { %v10920_v19 = vpop.f32.mrb[35].mxu0  ;;  %v3878_v35 = vmul.f32 1.442695, %v3869_v31  ;;  %v3859_v46 = vsel %vm1604_vm6, %v3692_v25, -inf }
 0x88e   : > { %11692 = vpow2.f32 %v3878_v35 }
 0x894   : > { %v3840_v29 = vpop.f32.mrb[36].mxu0 }
 0x895   : > { %v12935_v32 = vpop.f32.mrb[28].mxu1  ;;  %v10930_v33 = vpop.f32.mrb[37].mxu0  ;;  %v3865_v49 = vsel %vm1604_vm6, %v3840_v29, -inf }
 0x896   : > { %v10890_v34 = vpop.f32.mrb[29].mxu1  ;;  %10932 = vmatpush3.msra.mxu1 %v12935_v32 }
 0x897   : > { %10941 = vmatprep.subr.mxu1 %v12125_v1 }
 0x898   : > { %v11693_v51 = vpop.eup %11692 }
 0x899   : > { %v3470_v37 = vpop.f32.mrb[30].mxu1  ;;  %v3895_v52 = vsel %vm1604_vm6, %v11693_v51, 0.0 }
 0x89a   : > { %v10905_v39 = vpop.f32.mrb[31].mxu1  ;;  %v3850_v40 = vsel %vm1604_vm6, %v3470_v37, -inf }
 0x89b   : > { %3851 = vmax.xlane.f32.xlu0 %v3850_v40 }
 0x89d   : > { %v3618_v41 = vpop.f32.mrb[32].mxu1 }
 0x89e   : > { %v10915_v42 = vpop.f32.mrb[33].mxu1  ;;  %v3856_v44 = vsel %vm1604_vm6, %v3618_v41, -inf }
 0x89f   : > { %3854 = vmax.xlane.f32.xlu0 %v3853_v43  ;;  %3857 = vmax.xlane.f32.xlu1 %v3856_v44 }
 0x8a1   : > { %v3766_v8 = vpop.f32.mrb[34].mxu1 }
 0x8a2   : > { %v10925_v45 = vpop.f32.mrb[35].mxu1  ;;  %v3862_v47 = vsel %vm1604_vm6, %v3766_v8, -inf }
 0x8a3   : > { %3860 = vmax.xlane.f32.xlu0 %v3859_v46  ;;  %3863 = vmax.xlane.f32.xlu1 %v3862_v47 }
 0x8a7   : > { %3866 = vmax.xlane.f32.xlu0 %v3865_v49  ;;  %3893 = vadd.xlane.f32.xlu1 %v3892_v50 }
 0x8ab   : > { %3896 = vadd.xlane.f32.xlu0 %v3895_v52 }
 0x8b8   : > { %3222 = vrot.lane.b32.xlu1 %v12935_v32, %s13843_s4 }
 0x8bc   : > { %3228 = vrot.lane.b32.xlu1 %v12935_v32, %s12127_s13 }
 0x8c0   : > { %3231 = vrot.lane.b32.xlu1 %v12935_v32, %s12129_s24 }
 0x928   : > { %v3852_v53 = vpop.xlane.xlu0 %3851 }
 0x929   : > { %v3870_v54 = vsub.f32 %v3470_v37, %v3852_v53 }
 0x92b   : > { %v3880_v55 = vmul.f32 1.442695, %v3870_v54  ;;  %v3243_v54 = vld [vmem:[#allocation5] sm:$0xf] }
 0x92c   : > { %v3855_v56 = vpop.xlane.xlu0 %3854  ;;  %v3858_v57 = vpop.xlane.xlu1 %3857 }
 0x92d   : > { %11694 = vpow2.f32 %v3880_v55  ;;  %v3871_v58 = vsub.f32 %v3544_v20, %v3855_v56  ;;  %v3872_v59 = vsub.f32 %v3618_v41, %v3858_v57  ;;  %v3244_v55 = vld [vmem:[#allocation5 + $0x4] sm:$0xf] }
 0x92f   : > { %v3882_v60 = vmul.f32 1.442695, %v3871_v58  ;;  %v3884_v36 = vmul.f32 1.442695, %v3872_v59 }
 0x930   : > { %v3861_v61 = vpop.xlane.xlu0 %3860  ;;  %v3864_v22 = vpop.xlane.xlu1 %3863 }
 0x931   : > { %11696 = vpow2.f32 %v3882_v60  ;;  %v3873_v62 = vsub.f32 %v3692_v25, %v3861_v61  ;;  %v3874_v21 = vsub.f32 %v3766_v8, %v3864_v22  ;;  %v3245_v60 = vld [vmem:[#allocation5 + $0x8] sm:$0xf]  ;;  %v3247_v61 = vld [vmem:[#allocation5 + $0x10] sm:$0xf] }
 0x932   : > { %11698 = vpow2.f32 %v3884_v36  ;;  %v3246_v36 = vld [vmem:[#allocation5 + $0xc] sm:$0xf] }
 0x933   : > { %v3886_v63 = vmul.f32 1.442695, %v3873_v62  ;;  %v3888_v2 = vmul.f32 1.442695, %v3874_v21  ;;  %v3248_v21 = vld [vmem:[#allocation5 + $0x14] sm:$0xf] }
 0x934   : > { %v3867_v3 = vpop.xlane.xlu0 %3866  ;;  %v3894_v4 = vpop.xlane.xlu1 %3893 }
 0x935   : > { %11700 = vpow2.f32 %v3886_v63  ;;  %v3875_v5 = vsub.f32 %v3840_v29, %v3867_v3  ;;  %v3249_v3 = vld [vmem:[#allocation5 + $0x18] sm:$0xf] }
 0x936   : > { %11702 = vpow2.f32 %v3888_v2 }
 0x937   : > { %v11695_v6 = vpop.eup %11694  ;;  %v3890_v7 = vmul.f32 1.442695, %v3875_v5  ;;  %11704 = vrcp.f32 %v3894_v4 }
 0x938   : > { %v3897_v9 = vpop.xlane.xlu0 %3896  ;;  %v3223_v11 = vpop.permute.xlu1 %3222  ;;  %v3898_v12 = vsel %vm1604_vm6, %v11695_v6, 0.0 }
 0x939   : > { %11706 = vpow2.f32 %v3890_v7  ;;  %3899 = vadd.xlane.f32.xlu1 %v3898_v12  ;;  %10937 = vmatpush3.msra.mxu0 %v3223_v11 }
 0x93a   : > { %11708 = vrcp.f32 %v3897_v9  ;;  %10946 = vmatprep.subr.mxu0 %v12125_v1 }
 0x93b   : > { %v11697_v13 = vpop.eup %11696 }
 0x93c   : > { %v11699_v10 = vpop.eup %11698  ;;  %v3901_v14 = vsel %vm1604_vm6, %v11697_v13, 0.0  ;;  %v3229_v29 = vpop.permute.xlu1 %3228 }
 0x93d   : > { %3902 = vadd.xlane.f32.xlu0 %v3901_v14  ;;  %v3904_v16 = vsel %vm1604_vm6, %v11699_v10, 0.0 }
 0x93e   : > { %3905 = vadd.xlane.f32.xlu1 %v3904_v16 }
 0x93f   : > { %v11701_v18 = vpop.eup %11700 }
 0x940   : > { %v11703_v17 = vpop.eup %11702  ;;  %v3907_v23 = vsel %vm1604_vm6, %v11701_v18, 0.0  ;;  %v3232_v30 = vpop.permute.xlu1 %3231 }
 0x941   : > { %v11705_v20 = vpop.eup %11704  ;;  %3908 = vadd.xlane.f32.xlu0 %v3907_v23  ;;  %v3910_v24 = vsel %vm1604_vm6, %v11703_v17, 0.0 }
 0x942   : > { %3911 = vadd.xlane.f32.xlu1 %v3910_v24  ;;  %v3924_v25 = vmul.f32 %v11705_v20, %v11691_v48 }
 0x943   : > { %v11707_v19 = vpop.eup %11706 }
 0x944   : > { %v11709_v26 = vpop.eup %11708  ;;  %10934 = vmatmul.mubr.msk.f32.vlgmr.msra.gmra.mrb[36].mxu1 %vm1604_vm6, %v3924_v25  ;;  %v3913_v27 = vsel %vm1604_vm6, %v11707_v19, 0.0 }
 0x945   : > { %3914 = vadd.xlane.f32.xlu0 %v3913_v27  ;;  %v3925_v28 = vmul.f32 %v11709_v26, %v11693_v51  ;;  %10943 = vmatprep.mubr.msk.f32.mxu1 %vm12124_vm0, %v12125_v1 }
 0x947   : > { %10939 = vmatmul.mubr.msk.f32.vlgmr.msra.gmra.mrb[38].mxu0 %vm1604_vm6, %v3925_v28 }
 0x948   : > { %10947 = vmatpush3.msra.mxu0 %v3229_v29  ;;  %10948 = vmatprep.mubr.msk.f32.mxu0 %vm12124_vm0, %v12125_v1 }
 0x949   : > { %10956 = vmatprep.subr.mxu0 %v12125_v1 }
 0x953   : > { %3237 = vrot.lane.b32.xlu1 %v12935_v32, %s13837_s22  ;;  %s13895_s22 = smov 120  }
 0x95b   : > { %3225 = vrot.lane.b32.xlu0 %v12935_v32, %s13841_s25 }
 0x95f   : > { %3234 = vrot.lane.b32.xlu0 %v12935_v32, %s13839_s5  ;;  %s13892_s5 = smov 100  }
 0x963   : > { %3240 = vrot.lane.b32.xlu0 %v12935_v32, %s13835_s23  ;;  %s13891_s23 = smov 104  }
 0x9c6   : > { %v3900_v31 = vpop.xlane.xlu1 %3899 }
 0x9c7   : > { %11710 = vrcp.f32 %v3900_v31 }
 0x9ca   : > { %v3903_v33 = vpop.xlane.xlu0 %3902 }
 0x9cb   : > { %11712 = vrcp.f32 %v3903_v33  ;;  %v3906_v34 = vpop.xlane.xlu1 %3905 }
 0x9cc   : > { %11714 = vrcp.f32 %v3906_v34 }
 0x9ce   : > { %v3909_v35 = vpop.xlane.xlu0 %3908 }
 0x9cf   : > { %11716 = vrcp.f32 %v3909_v35  ;;  %v3912_v37 = vpop.xlane.xlu1 %3911 }
 0x9d0   : > { %11718 = vrcp.f32 %v3912_v37 }
 0x9d1   : > { %v11711_v40 = vpop.eup %11710 }
 0x9d2   : > { %v3915_v39 = vpop.xlane.xlu0 %3914  ;;  %v3926_v42 = vmul.f32 %v11711_v40, %v11695_v6  ;;  %v3250_v6 = vld [vmem:[#allocation5 + $0x1c] sm:$0xf] }
 0x9d3   : > { %11720 = vrcp.f32 %v3915_v39  ;;  %v3238_v49 = vpop.permute.xlu1 %3237 }
 0x9d5   : > { %v11713_v41 = vpop.eup %11712 }
 0x9d6   : > { %v3927_v43 = vmul.f32 %v11713_v41, %v11697_v13  ;;  %v3226_v44 = vpop.permute.xlu0 %3225  ;;  %v11715_v8 = vpop.eup %11714 }
 0x9d7   : > { %10942 = vmatpush3.msra.mxu1 %v3226_v44  ;;  %v3928_v45 = vmul.f32 %v11715_v8, %v11699_v10 }
 0x9d8   : > { %10944 = vmatmul.mubr.msk.f32.vlgmr.msra.gmra.mrb[38].mxu1 %vm1604_vm6, %v3926_v42  ;;  %10949 = vmatmul.mubr.msk.f32.vlgmr.msra.gmra.mrb[40].mxu0 %vm1604_vm6, %v3927_v43 }
 0x9d9   : > { %v11717_v32 = vpop.eup %11716  ;;  %10951 = vmatprep.subr.mxu1 %v12125_v1  ;;  %10953 = vmatprep.mubr.msk.f32.mxu1 %vm12124_vm0, %v12125_v1 }
 0x9da   : > { %v3929_v46 = vmul.f32 %v11717_v32, %v11701_v18  ;;  %10952 = vmatpush3.msra.mxu1 %v3232_v30  ;;  %v3235_v47 = vpop.permute.xlu0 %3234  ;;  %10958 = vmatprep.mubr.msk.f32.mxu0 %vm12124_vm0, %v12125_v1  ;;  %v11719_v48 = vpop.eup %11718 }
 0x9db   : > { %10957 = vmatpush3.msra.mxu0 %v3235_v47  ;;  %10961 = vmatprep.subr.mxu1 %v12125_v1  ;;  %v3930_v51 = vmul.f32 %v11719_v48, %v11703_v17  ;;  %v10282_v47 = vld [vmem:[#allocation7] ss:$0 sm:$0xff] }
 0x9dc   : > { %10954 = vmatmul.mubr.msk.f32.vlgmr.msra.gmra.mrb[40].mxu1 %vm1604_vm6, %v3928_v45  ;;  %10959 = vmatmul.mubr.msk.f32.vlgmr.msra.gmra.mrb[42].mxu0 %vm1604_vm6, %v3929_v46 }
 0x9dd   : > { %v11721_v50 = vpop.eup %11720  ;;  %10962 = vmatpush3.msra.mxu1 %v3238_v49  ;;  %10966 = vmatprep.subr.mxu0 %v12125_v1 }
 0x9de   : > { %v3931_v52 = vmul.f32 %v11721_v50, %v11707_v19  ;;  %v3241_v53 = vpop.permute.xlu0 %3240  ;;  %10963 = vmatprep.mubr.msk.f32.mxu1 %vm12124_vm0, %v12125_v1  ;;  %10968 = vmatprep.mubr.msk.f32.mxu0 %vm12124_vm0, %v12125_v1 }
 0x9df   : > { %10967 = vmatpush3.msra.mxu0 %v3241_v53  ;;  %10971 = vmatprep.subr.mxu1 %v12125_v1 }
 0x9e0   : > { %10964 = vmatmul.mubr.msk.f32.vlgmr.msra.gmra.mrb[42].mxu1 %vm1604_vm6, %v3930_v51  ;;  %10969 = vmatmul.mubr.msk.f32.vlgmr.msra.gmra.mrb[44].mxu0 %vm1604_vm6, %v3931_v52 }
 0x9e1   : > { %10972 = vmatpush3.msk.msra.mxu1 %vm2304_vm7, %v3243_v54  ;;  %10973 = vmatprep.mubr.msk.f32.mxu1 %vm12124_vm0, %v12125_v1 }
 0x9e2   : > { %10976 = vmatprep.subr.mxu0 %v12125_v1  ;;  %10978 = vmatprep.mubr.msk.f32.mxu0 %vm12124_vm0, %v12125_v1 }
 0x9e3   : > { %10977 = vmatpush3.msk.msra.mxu0 %vm2304_vm7, %v3244_v55  ;;  %10981 = vmatprep.subr.mxu1 %v12125_v1 }
 0x9e4   : > { %10986 = vmatprep.subr.mxu0 %v12125_v1 }
 0xa17   : > { %v4001_v56 = vpop.f32.mrb[36].mxu1 }
 0xa18   : > { %v10935_v57 = vpop.f32.mrb[37].mxu1  ;;  %10974 = vmatmul.mubr.msk.f32.vlgmr.msra.gmra.mrb[44].mxu1 %vm997_vm4, %v4001_v56 }
 0xa19   : > { %10983 = vmatprep.mubr.msk.f32.mxu1 %vm12124_vm0, %v12125_v1  ;;  %10982 = vmatpush3.msk.msra.mxu1 %vm2304_vm7, %v3245_v60 }
 0xa1a   : > { %v4074_v58 = vpop.f32.mrb[38].mxu0  ;;  %10991 = vmatprep.subr.mxu1 %v12125_v1 }
 0xa1b   : > { %v10940_v59 = vpop.f32.mrb[39].mxu0  ;;  %10979 = vmatmul.mubr.msk.f32.vlgmr.msra.gmra.mrb[46].mxu0 %vm997_vm4, %v4074_v58  ;;  %v5178_v58 = vld [vmem:[#allocation10] sm:$0xff] }
 0xa1c   : > { %10988 = vmatprep.mubr.msk.f32.mxu0 %vm12124_vm0, %v12125_v1  ;;  %10987 = vmatpush3.msk.msra.mxu0 %vm2304_vm7, %v3246_v36  ;;  %v5179_v59 = vld [vmem:[#allocation10 + $0x8] sm:$0xff]  ;;  %v5180_v36 = vld [vmem:[#allocation10 + $0x10] sm:$0xff] }
 0xa1d   : > { %10996 = vmatprep.subr.mxu0 %v12125_v1  ;;  %v11426_v60 = vpack.c.bf16 %v5179_v59, %v5178_v58 }
 0xaab   : > { %v4147_v22 = vpop.f32.mrb[38].mxu1  ;;  %v4220_v62 = vpop.f32.mrb[40].mxu0 }
 0xaac   : > { %v10945_v63 = vpop.f32.mrb[39].mxu1  ;;  %v10950_v2 = vpop.f32.mrb[41].mxu0  ;;  %10984 = vmatmul.mubr.msk.f32.vlgmr.msra.gmra.mrb[46].mxu1 %vm997_vm4, %v4147_v22  ;;  %10989 = vmatmul.mubr.msk.f32.vlgmr.msra.gmra.mrb[48].mxu0 %vm997_vm4, %v4220_v62  ;;  %v5264_v62 = vld [vmem:[%s13889_s17 + $0x8] sm:$0xff] }
 0xaad   : > { %10992 = vmatpush3.msk.msra.mxu1 %vm2304_vm7, %v3247_v61  ;;  %10993 = vmatprep.mubr.msk.f32.mxu1 %vm12124_vm0, %v12125_v1  ;;  %v5181_v61 = vld [vmem:[#allocation10 + $0x18] sm:$0xff]  ;;  %v5266_v2 = vld [vmem:[%s13889_s17 + $0x18] sm:$0xff] }
 0xaae   : > { %10997 = vmatpush3.msk.msra.mxu0 %vm2304_vm7, %v3248_v21  ;;  %10998 = vmatprep.mubr.msk.f32.mxu0 %vm12124_vm0, %v12125_v1  ;;  %v11429_v22 = vpack.c.bf16 %v5181_v61, %v5180_v36  ;;  %v5265_v21 = vld [vmem:[%s13889_s17 + $0x10] sm:$0xff] }
 0xaaf   : > { %v4293_v4 = vpop.f32.mrb[40].mxu1  ;;  %v4366_v5 = vpop.f32.mrb[42].mxu0  ;;  %11001 = vmatprep.subr.mxu1 %v12125_v1  ;;  %11006 = vmatprep.subr.mxu0 %v12125_v1 }
 0xab0   : > { %v10955_v7 = vpop.f32.mrb[41].mxu1  ;;  %v10960_v9 = vpop.f32.mrb[43].mxu0  ;;  %10994 = vmatmul.mubr.msk.f32.vlgmr.msra.gmra.mrb[48].mxu1 %vm997_vm4, %v4293_v4  ;;  %10999 = vmatmul.mubr.msk.f32.vlgmr.msra.gmra.mrb[50].mxu0 %vm997_vm4, %v4366_v5  ;;  %v5267_v4 = vld [vmem:[%s13889_s17 + $0x20] sm:$0xff]  ;;  %v5268_v5 = vld [vmem:[%s13889_s17 + $0x28] sm:$0xff] }
 0xab1   : > { %11002 = vmatpush3.msk.msra.mxu1 %vm2304_vm7, %v3249_v3  ;;  %11003 = vmatprep.mubr.msk.f32.mxu1 %vm12124_vm0, %v12125_v1  ;;  %v11435_v3 = vpack.c.bf16 %v5266_v2, %v5265_v21  ;;  %v5269_v7 = vld [vmem:[%s13889_s17 + $0x30] sm:$0xff]  ;;  %v5270_v9 = vld [vmem:[%s13889_s17 + $0x38] sm:$0xff] }
 0xab2   : > { %11007 = vmatpush3.msk.msra.mxu0 %vm2304_vm7, %v3250_v6  ;;  %11008 = vmatprep.mubr.msk.f32.mxu0 %vm12124_vm0, %v12125_v1  ;;  %v11438_v6 = vpack.c.bf16 %v5268_v5, %v5267_v4 }
 0xab3   : > { %v4439_v11 = vpop.f32.mrb[42].mxu1  ;;  %v4512_v12 = vpop.f32.mrb[44].mxu0  ;;  %11425 = vmatprep.subr.bf16.mxu1 %v12123_v0  ;;  %11431 = vmatprep.subr.bf16.mxu0 %v12123_v0 }
 0xab4   : > { %v10965_v13 = vpop.f32.mrb[43].mxu1  ;;  %v10970_v10 = vpop.f32.mrb[45].mxu0  ;;  %11004 = vmatmul.mubr.msk.f32.vlgmr.msra.gmra.mrb[50].mxu1 %vm997_vm4, %v4439_v11  ;;  %11009 = vmatmul.mubr.msk.f32.vlgmr.msra.gmra.mrb[52].mxu0 %vm997_vm4, %v4512_v12  ;;  %v11441_v11 = vpack.c.bf16 %v5270_v9, %v5269_v7  ;;  %v5271_v12 = vld [vmem:[%s13889_s17 + $0x40] sm:$0xff] }
 0xab5   : > { %11019 = vmatprep.mubr.msk.f32.mxu1 %vm12124_vm0, %v12125_v1  ;;  %11054 = vmatprep.mubr.msk.f32.mxu0 %vm12124_vm0, %v12125_v1  ;;  %v5272_v13 = vld [vmem:[%s13889_s17 + $0x48] sm:$0xff] }
 0xab6   : > { %11427 = vmatpush3.bf16.msra.mxu1 %v11426_v60  ;;  %v11444_v10 = vpack.c.bf16 %v5272_v13, %v5271_v12 }
 0xab7   : > { %11428 = vmatprep.subr.bf16.mxu1 %v12123_v0 }
 0xaba   : > { %11430 = vmatpush3.bf16.msra.mxu1 %v11429_v22 }
 0xabb   : > { %11455 = vmatprep.subr.bf16.mxu1 %v12123_v0 }
 0xaeb   : > { %v4588_v14 = vpop.f32.mrb[44].mxu1 }
 0xaec   : > { %v10975_v16 = vpop.f32.mrb[45].mxu1  ;;  %v5124_v17 = vsel %vm897_vm1, %v4588_v14, 0.0  ;;  %v5273_v14 = vld [vmem:[%s13889_s17 + $0x50] sm:$0xff] }
 0xaed   : > { %v5274_v16 = vld [vmem:[%s13889_s17 + $0x58] sm:$0xff] }
 0xaee   : > { %v4664_v18 = vpop.f32.mrb[46].mxu0 }
 0xaef   : > { %v5125_v23 = vsel %vm897_vm1, %v4664_v18, 0.0  ;;  %v10980_v20 = vpop.f32.mrb[47].mxu0  ;;  %v11447_v18 = vpack.c.bf16 %v5274_v16, %v5273_v14 }
 0xaf0   : > { %v5126_v24 = vadd.f32 %v5125_v23, %v5124_v17  ;;  %v5275_v17 = vld [vmem:[%s13889_s17 + $0x60] sm:$0xff]  ;;  %v5276_v23 = vld [vmem:[%s13889_s17 + $0x68] sm:$0xff] }
 0xaf1   : > { %v11450_v20 = vpack.c.bf16 %v5276_v23, %v5275_v17 }
 0xb7f   : > { %v4740_v25 = vpop.f32.mrb[46].mxu1  ;;  %v4816_v19 = vpop.f32.mrb[48].mxu0 }
 0xb80   : > { %v5127_v26 = vsel %vm897_vm1, %v4740_v25, 0.0  ;;  %v10985_v27 = vpop.f32.mrb[47].mxu1  ;;  %v10990_v28 = vpop.f32.mrb[49].mxu0  ;;  %v5129_v30 = vsel %vm897_vm1, %v4816_v19, 0.0 }
 0xb81   : > { %v5128_v29 = vadd.f32 %v5127_v26, %v5126_v24  ;;  %v10284_v27 = vld [vmem:[%s13888_s0 + $0x1] ss:$0 sm:$0xff] }
 0xb83   : > { %v5130_v31 = vadd.f32 %v5129_v30, %v5128_v29  ;;  %v4892_v33 = vpop.f32.mrb[48].mxu1  ;;  %v4968_v34 = vpop.f32.mrb[50].mxu0  ;;  %v10292_v29 = vld [vmem:[%s13881_s19 + $0x20] sm:$0xff]  ;;  %v10293_v30 = vld [vmem:[%s13881_s19 + $0x28] sm:$0xff] }
 0xb84   : > { %v5131_v35 = vsel %vm897_vm1, %v4892_v33, 0.0  ;;  %v10995_v37 = vpop.f32.mrb[49].mxu1  ;;  %v11000_v39 = vpop.f32.mrb[51].mxu0  ;;  %v5133_v41 = vsel %vm897_vm1, %v4968_v34, 0.0  ;;  %v11456_v34 = vpack.c.bf16 %v10293_v30, %v10292_v29 }
 0xb85   : > { %v5132_v40 = vadd.f32 %v5131_v35, %v5130_v31  ;;  %v10285_v31 = vld [vmem:[#allocation8 + $0x1] ss:$0 sm:$0xff]  ;;  %v10294_v37 = vld [vmem:[%s13881_s19 + $0x30] sm:$0xff]  ;;  %v10295_v39 = vld [vmem:[%s13881_s19 + $0x38] sm:$0xff] }
 0xb87   : > { %v5134_v42 = vadd.f32 %v5133_v41, %v5132_v40  ;;  %v5044_v43 = vpop.f32.mrb[50].mxu1  ;;  %v5120_v44 = vpop.f32.mrb[52].mxu0  ;;  %v11459_v40 = vpack.c.bf16 %v10295_v39, %v10294_v37  ;;  %v13124_v41 = vld [vmem:[%s12530_s30] sm:$0xff]  ;;  %s13890_s30 = smov 108  }
 0xb88   : > { %v5135_v8 = vsel %vm897_vm1, %v5044_v43, 0.0  ;;  %v11005_v32 = vpop.f32.mrb[51].mxu1  ;;  %v11010_v45 = vpop.f32.mrb[53].mxu0  ;;  %v5137_v48 = vsel %vm897_vm1, %v5120_v44, 0.0  ;;  %v5278_v43 = vld [vmem:[%s13889_s17 + $0x78] sm:$0xff] }
 0xb89   : > { %v5136_v46 = vadd.f32 %v5135_v8, %v5134_v42  ;;  %v5277_v42 = vld [vmem:[%s13889_s17 + $0x70] sm:$0xff]  ;;  %v10286_v8 = vld [vmem:[#allocation11] ss:$0 sm:$0xff] }
 0xb8a   : > { %v11453_v44 = vpack.c.bf16 %v5278_v43, %v5277_v42 }
 0xb8b   : > { %v5138_v49 = vadd.f32 %v5137_v48, %v5136_v46 }
 0xb8d   : > { %v5145_v50 = vadd.f32 %v10282_v47, %v5138_v49 }
 0xb8f   : > { %v5146_v51 = vadd.f32 %v5145_v50, %v12910_v15  ;;  %v5263_v15 = vld [vmem:[%s13889_s17] sm:$0xff] }
 0xb90   : > { %v11432_v63 = vpack.c.bf16 %v5264_v62, %v5263_v15 }
 0xb91   : > { %v5151_v52 = vsel %vm897_vm1, %v5146_v51, 0.0 }
 0xb92   : > { %5152 = vadd.xlane.f32.xlu1 %v5151_v52  ;;  %11433 = vmatpush3.bf16.msra.mxu0 %v11432_v63 }
 0xb93   : > { %11434 = vmatprep.subr.bf16.mxu0 %v12123_v0 }
 0xb96   : > { %11436 = vmatpush3.bf16.msra.mxu0 %v11435_v3 }
 0xb97   : > { %11437 = vmatprep.subr.bf16.mxu0 %v12123_v0 }
 0xb9a   : > { %11439 = vmatpush3.bf16.msra.mxu0 %v11438_v6 }
 0xb9b   : > { %11440 = vmatprep.subr.bf16.mxu0 %v12123_v0 }
 0xb9e   : > { %11442 = vmatpush3.bf16.msra.mxu0 %v11441_v11 }
 0xb9f   : > { %11443 = vmatprep.subr.bf16.mxu0 %v12123_v0 }
 0xba2   : > { %11445 = vmatpush3.bf16.msra.mxu0 %v11444_v10 }
 0xba3   : > { %11446 = vmatprep.subr.bf16.mxu0 %v12123_v0 }
 0xba6   : > { %11448 = vmatpush3.bf16.msra.mxu0 %v11447_v18 }
 0xba7   : > { %11449 = vmatprep.subr.bf16.mxu0 %v12123_v0 }
 0xbaa   : > { %11451 = vmatpush3.bf16.msra.mxu0 %v11450_v20 }
 0xbab   : > { %11452 = vmatprep.subr.bf16.mxu0 %v12123_v0 }
 0xbae   : > { %11454 = vmatpush3.bf16.msra.mxu0 %v11453_v44 }
 0xbaf   : > { %11093 = vmatprep.subr.mxu0 %v12125_v1 }
 0xc1f   : > { %v5153_v53 = vpop.xlane.xlu1 %5152 }
 0xc20   : > { %v5154_v54 = vmul.f32 0.03125, %v5153_v53 }
 0xc22   : > { %v5155_v55 = vsub.f32 %v5146_v51, %v5154_v54 }
 0xc24   : > { %v5156_v56 = vmul.f32 %v5155_v55, %v5155_v55 }
 0xc26   : > { %v5157_v57 = vsel %vm897_vm1, %v5156_v56, 0.0 }
 0xc27   : > { %5158 = vadd.xlane.f32.xlu0 %v5157_v57 }
 0xcb4   : > { %v5159_v24 = vpop.xlane.xlu0 %5158 }
 0xcb5   : > { %v5160_v25 = vmul.f32 0.03125, %v5159_v24 }
 0xcb7   : > { %v5161_v19 = vadd.f32 1e-05, %v5160_v25 }
 0xcb9   : > { %11722 = vrsqrt.f32 %v5161_v19 }
 0xcc3   : > { %v11723_v26 = vpop.eup %11722 }
 0xcc4   : > { %v5163_v28 = vmul.f32 %v11723_v26, %v5155_v55 }
 0xcc6   : > { %v5170_v33 = vmul.f32 %v10284_v27, %v5163_v28 }
 0xcc8   : > { %v13109_v35 = vadd.f32 %v10285_v31, %v5170_v33 }
 0xcca   : > { %11020 = vmatmul.mubr.msk.f32.vlgmr.msra.gmra.mrb[52].mxu1 %vm897_vm1, %v13109_v35 }
 0xccb   : > { %11457 = vmatpush3.bf16.msra.mxu1 %v11456_v34  ;;  %11065 = vmatprep.mubr.msk.f32.mxu1 %vm12124_vm0, %v12125_v1 }
 0xccc   : > { %11458 = vmatprep.subr.bf16.mxu1 %v12123_v0 }
 0xccf   : > { %11460 = vmatpush3.bf16.msra.mxu1 %v11459_v40 }
 0xcd0   : > { %11068 = vmatprep.subr.mxu1 %v12125_v1 }
 0xcd2   : > { %11066 = vmatmul.mubr.msk.f32.vlgmr.msra.gmra.mrb[54].mxu1 %vm897_vm1, %v13124_v41 }
 0xcd3   : > { %11070 = vmatprep.mubr.msk.f32.mxu1 %vm12124_vm0, %v12125_v1 }
 0xd9d   : > { %v5258_v32 = vpop.f32.mrb[52].mxu1 }
 0xd9e   : > { %v5259_v45 = vadd.f32 %v10286_v8, %v5258_v32  ;;  %v11021_v46 = vpop.f32.mrb[53].mxu1 }
 0xda0   : > { %v5262_v47 = vmax.f32 %v5259_v45, 0.0 }
 0xda2   : > { %11055 = vmatmul.mubr.f32.vlgmr.msra.gmra.mrb[54].mxu0 %v5262_v47 }
 0xda3   : > { %11095 = vmatprep.mubr.msk.f32.mxu0 %vm12124_vm0, %v12125_v1 }
 0xda5   : > { %v13139_v48 = vpop.f32.mrb[54].mxu1 }
 0xda6   : > { %5466 = vrot.lane.b32.xlu1 %v13139_v48, %s13841_s25  ;;  %5464 = vrot.lane.b32.xlu0 %v13139_v48, %s13843_s4  ;;  %v11067_v49 = vpop.f32.mrb[55].mxu1 }
 0xdaa   : > { %5468 = vrot.lane.b32.xlu1 %v13139_v48, %s12127_s13  ;;  %5470 = vrot.lane.b32.xlu0 %v13139_v48, %s12129_s24 }
 0xdae   : > { %5472 = vrot.lane.b32.xlu1 %v13139_v48, %s13890_s30  ;;  %5474 = vrot.lane.b32.xlu0 %v13139_v48, %s13891_s23 }
 0xdb2   : > { %5476 = vrot.lane.b32.xlu1 %v13139_v48, %s13892_s5  ;;  %5489 = vrot.lane.b32.xlu0 %v13139_v48, %s13893_s26 }
 0xe18   : > { %v13157_v50 = vpop.permute.xlu1 %5466  ;;  %v13159_v51 = vpop.permute.xlu0 %5464 }
 0xe19   : > { %5641 = vrot.lane.b32.xlu0 %v13157_v50, %s13893_s26  ;;  %5565 = vrot.lane.b32.xlu1 %v13159_v51, %s13893_s26 }
 0xe1c   : > { %v13165_v52 = vpop.permute.xlu1 %5468  ;;  %v13167_v53 = vpop.permute.xlu0 %5470 }
 0xe1d   : > { %5717 = vrot.lane.b32.xlu1 %v13165_v52, %s13893_s26  ;;  %5793 = vrot.lane.b32.xlu0 %v13167_v53, %s13893_s26 }
 0xe20   : > { %v13173_v54 = vpop.permute.xlu1 %5472  ;;  %v13175_v55 = vpop.permute.xlu0 %5474 }
 0xe21   : > { %5869 = vrot.lane.b32.xlu1 %v13173_v54, %s13893_s26  ;;  %5945 = vrot.lane.b32.xlu0 %v13175_v55, %s13893_s26 }
 0xe24   : > { %v13181_v56 = vpop.permute.xlu1 %5476  ;;  %v5490_v57 = vpop.permute.xlu0 %5489 }
 0xe25   : > { %6021 = vrot.lane.b32.xlu1 %v13181_v56, %s13893_s26  ;;  %11069 = vmatpush3.xpose.msk.msra.mxu1 %vm997_vm4, %v5490_v57  ;;  %s13896_s26 = smov 124  }
 0xe26   : > { %11073 = vmatprep.subr.mxu1 %v12125_v1 }
 0xe28   : > { %11071 = vmatmul.mubr.msk.f32.vlgmr.msra.gmra.mrb[56].mxu1 %vm997_vm4, %v13139_v48 }
 0xe29   : > { %11075 = vmatprep.mubr.msk.f32.mxu1 %vm12124_vm0, %v12125_v1 }
 0xe75   : > { %v13191_v58 = vpop.f32.mrb[54].mxu0 }
 0xe76   : > { %v11056_v59 = vpop.f32.mrb[55].mxu0 }
 0xe8b   : > { %v5566_v60 = vpop.permute.xlu1 %5565  ;;  %v5642_v36 = vpop.permute.xlu0 %5641 }
 0xe8c   : > { %11074 = vmatpush3.xpose.msk.msra.mxu1 %vm997_vm4, %v5566_v60 }
 0xe8d   : > { %11078 = vmatprep.subr.mxu1 %v12125_v1 }
 0xe8f   : > { %v5718_v61 = vpop.permute.xlu1 %5717  ;;  %11076 = vmatmul.mubr.msk.f32.vlgmr.msra.gmra.mrb[58].mxu1 %vm997_vm4, %v13159_v51  ;;  %v5794_v15 = vpop.permute.xlu0 %5793 }
 0xe90   : > { %11079 = vmatpush3.xpose.msk.msra.mxu1 %vm997_vm4, %v5642_v36  ;;  %11080 = vmatprep.mubr.msk.f32.mxu1 %vm12124_vm0, %v12125_v1 }
 0xe91   : > { %11083 = vmatprep.subr.mxu1 %v12125_v1 }
 0xe93   : > { %v5870_v22 = vpop.permute.xlu1 %5869  ;;  %11081 = vmatmul.mubr.msk.f32.vlgmr.msra.gmra.mrb[60].mxu1 %vm997_vm4, %v13157_v50  ;;  %v5946_v21 = vpop.permute.xlu0 %5945 }
 0xe94   : > { %11084 = vmatpush3.xpose.msk.msra.mxu1 %vm997_vm4, %v5718_v61  ;;  %11094 = vmatpush3.xpose.msk.msra.mxu0 %vm997_vm4, %v5870_v22 }
 0xe95   : > { %11085 = vmatprep.mubr.msk.f32.mxu1 %vm12124_vm0, %v12125_v1  ;;  %11103 = vmatprep.subr.mxu0 %v12125_v1 }
 0xe96   : > { %11088 = vmatprep.subr.mxu1 %v12125_v1 }
 0xe97   : > { %11096 = vmatmul.mubr.msk.f32.vlgmr.msra.gmra.mrb[56].mxu0 %vm997_vm4, %v13173_v54  ;;  %v6022_v62 = vpop.permute.xlu1 %6021  ;;  %11086 = vmatmul.mubr.msk.f32.vlgmr.msra.gmra.mrb[62].mxu1 %vm997_vm4, %v13165_v52 }
 0xe98   : > { %11089 = vmatpush3.xpose.msk.msra.mxu1 %vm997_vm4, %v5794_v15  ;;  %11104 = vmatpush3.xpose.msk.msra.mxu0 %vm997_vm4, %v6022_v62 }
 0xe99   : > { %11090 = vmatprep.mubr.msk.f32.mxu1 %vm12124_vm0, %v12125_v1  ;;  %11105 = vmatprep.mubr.msk.f32.mxu0 %vm12124_vm0, %v12125_v1 }
 0xe9a   : > { %11098 = vmatprep.subr.mxu1 %v12125_v1  ;;  %11113 = vmatprep.subr.mxu0 %v12125_v1 }
 0xe9b   : > { %11091 = vmatmul.mubr.msk.f32.vlgmr.msra.gmra.mrb[64].mxu1 %vm997_vm4, %v13167_v53  ;;  %11106 = vmatmul.mubr.msk.f32.vlgmr.msra.gmra.mrb[58].mxu0 %vm997_vm4, %v13181_v56 }
 0xe9c   : > { %11099 = vmatpush3.xpose.msk.msra.mxu1 %vm997_vm4, %v5946_v21  ;;  %11100 = vmatprep.mubr.msk.f32.mxu1 %vm12124_vm0, %v12125_v1 }
 0xe9d   : > { %11108 = vmatprep.subr.mxu1 %v12125_v1  ;;  %11115 = vmatprep.mubr.msk.f32.mxu0 %vm12124_vm0, %v12125_v1 }
 0xe9f   : > { %11101 = vmatmul.mubr.msk.f32.vlgmr.msra.gmra.mrb[66].mxu1 %vm997_vm4, %v13175_v55 }
 0xea0   : > { %11110 = vmatprep.mubr.msk.f32.mxu1 %vm12124_vm0, %v12125_v1 }
 0xefb   : > { %v5561_v63 = vpop.f32.mrb[56].mxu1 }
 0xefc   : > { %v5562_v2 = vadd.f32 %v5561_v63, %v12656_v38  ;;  %v11072_v3 = vpop.f32.mrb[57].mxu1 }
 0xefe   : > { %v6097_v4 = vsel %vm1604_vm6, %v5562_v2, -inf }
 0xeff   : > { %6098 = vmax.xlane.f32.xlu0 %v6097_v4 }
 0xf62   : > { %v5637_v5 = vpop.f32.mrb[58].mxu1 }
 0xf63   : > { %v5638_v6 = vadd.f32 %v5637_v5, %v12656_v38  ;;  %v11077_v7 = vpop.f32.mrb[59].mxu1 }
 0xf65   : > { %v6100_v9 = vsel %vm1604_vm6, %v5638_v6, -inf }
 0xf66   : > { %6101 = vmax.xlane.f32.xlu1 %v6100_v9  ;;  %v5713_v11 = vpop.f32.mrb[60].mxu1 }
 0xf67   : > { %v5714_v12 = vadd.f32 %v5713_v11, %v12656_v38  ;;  %v11082_v13 = vpop.f32.mrb[61].mxu1 }
 0xf69   : > { %v6103_v10 = vsel %vm1604_vm6, %v5714_v12, -inf }
 0xf6a   : > { %v5941_v14 = vpop.f32.mrb[56].mxu0  ;;  %6104 = vmax.xlane.f32.xlu0 %v6103_v10  ;;  %v5789_v16 = vpop.f32.mrb[62].mxu1 }
 0xf6b   : > { %v5790_v18 = vadd.f32 %v5789_v16, %v12656_v38  ;;  %v11087_v17 = vpop.f32.mrb[63].mxu1  ;;  %v11097_v23 = vpop.f32.mrb[57].mxu0  ;;  %v5942_v20 = vadd.f32 %v5941_v14, %v12656_v38 }
 0xf6d   : > { %v6106_v24 = vsel %vm1604_vm6, %v5790_v18, -inf  ;;  %v6112_v29 = vsel %vm1604_vm6, %v5942_v20, -inf }
 0xf6e   : > { %v6093_v25 = vpop.f32.mrb[58].mxu0  ;;  %6107 = vmax.xlane.f32.xlu0 %v6106_v24  ;;  %v5865_v19 = vpop.f32.mrb[64].mxu1  ;;  %v10288_v24 = vld [vmem:[#allocation13] ss:$0 sm:$0xff] }
 0xf6f   : > { %v11092_v26 = vpop.f32.mrb[65].mxu1  ;;  %v11107_v27 = vpop.f32.mrb[59].mxu0  ;;  %v6094_v28 = vadd.f32 %v6093_v25, %v12656_v38  ;;  %v5866_v34 = vadd.f32 %v5865_v19, %v12656_v38  ;;  %v5353_v25 = vadd.f32 %v10288_v24, %v13191_v58 }
 0xf71   : > { %v6118_v33 = vsel %vm1604_vm6, %v6094_v28, -inf  ;;  %v6109_v39 = vsel %vm1604_vm6, %v5866_v34, -inf  ;;  %v13302_v19 = vadd.f32 %v5353_v25, %v13109_v35  ;;  %v10356_v25 = vld [vmem:[%s13799_s9 + $0x30] sm:$0xff] }
 0xf72   : > { %6113 = vmax.xlane.f32.xlu0 %v6112_v29  ;;  %v6017_v30 = vpop.f32.mrb[66].mxu1 }
 0xf73   : > { %v11102_v31 = vpop.f32.mrb[67].mxu1  ;;  %v13255_v37 = vadd.f32 %v6017_v30, %v12656_v38 }
 0xf75   : > { %v6115_v40 = vsel %vm1604_vm6, %v13255_v37, -inf }
 0xf76   : > { %6119 = vmax.xlane.f32.xlu0 %v6118_v33 }
 0xf77   : > { %6185 = vrot.lane.b32.xlu1 %v13139_v48, %s13894_s2 }
 0xf7b   : > { %6337 = vrot.lane.b32.xlu1 %v13157_v50, %s13894_s2 }
 0xf8c   : > { %6261 = vrot.lane.b32.xlu0 %v13159_v51, %s13894_s2  ;;  %v6099_v42 = vpop.xlane.xlu0 %6098 }
 0xf8d   : > { %v6121_v43 = vsub.f32 %v5562_v2, %v6099_v42 }
 0xf8f   : > { %v6129_v44 = vmul.f32 1.442695, %v6121_v43 }
 0xf91   : > { %11724 = vpow2.f32 %v6129_v44 }
 0xf9b   : > { %v13262_v8 = vpop.eup %11724 }
 0xf9c   : > { %v6145_v38 = vsel %vm1604_vm6, %v13262_v8, 0.0 }
 0xf9f   : > { %6110 = vmax.xlane.f32.xlu1 %v6109_v39 }
 0xfa3   : > { %6116 = vmax.xlane.f32.xlu1 %v6115_v40 }
 0xfb4   : > { %6413 = vrot.lane.b32.xlu1 %v13165_v52, %s13894_s2 }
 0xfd8   : > { %6146 = vadd.xlane.f32.xlu1 %v6145_v38 }
 0xff3   : > { %v6102_v32 = vpop.xlane.xlu1 %6101 }
 0xff4   : > { %v6122_v45 = vsub.f32 %v5638_v6, %v6102_v32 }
 0xff6   : > { %v6131_v46 = vmul.f32 1.442695, %v6122_v45 }
 0xff7   : > { %v6186_v47 = vpop.permute.xlu1 %6185  ;;  %v6105_v48 = vpop.xlane.xlu0 %6104 }
 0xff8   : > { %11726 = vpow2.f32 %v6131_v46  ;;  %v6123_v49 = vsub.f32 %v5714_v12, %v6105_v48  ;;  %11109 = vmatpush3.msra.mxu1 %v6186_v47 }
 0xff9   : > { %11118 = vmatprep.subr.mxu1 %v12125_v1 }
 0xffa   : > { %v6133_v50 = vmul.f32 1.442695, %v6123_v49 }
 0xffb   : > { %v6108_v51 = vpop.xlane.xlu0 %6107  ;;  %v6338_v12 = vpop.permute.xlu1 %6337 }
 0xffc   : > { %11728 = vpow2.f32 %v6133_v50  ;;  %v6124_v60 = vsub.f32 %v5790_v18, %v6108_v51 }
 0xffe   : > { %v6135_v21 = vmul.f32 1.442695, %v6124_v60 }
 0xfff   : > { %v6114_v52 = vpop.xlane.xlu0 %6113 }
0x1000   : > { %v6126_v57 = vsub.f32 %v5942_v20, %v6114_v52 }
0x1002   : > { %v13267_v59 = vpop.eup %11726  ;;  %v6139_v36 = vmul.f32 1.442695, %v6126_v57 }
0x1003   : > { %v6120_v61 = vpop.xlane.xlu0 %6119  ;;  %v6148_v22 = vsel %vm1604_vm6, %v13267_v59, 0.0 }
0x1004   : > { %11730 = vpow2.f32 %v6139_v36  ;;  %v6128_v15 = vsub.f32 %v6094_v28, %v6120_v61  ;;  %6149 = vadd.xlane.f32.xlu0 %v6148_v22 }
0x1006   : > { %v13271_v62 = vpop.eup %11728  ;;  %v6143_v63 = vmul.f32 1.442695, %v6128_v15 }
0x1007   : > { %v6262_v2 = vpop.permute.xlu0 %6261  ;;  %v6151_v3 = vsel %vm1604_vm6, %v13271_v62, 0.0 }
0x1008   : > { %11732 = vpow2.f32 %v6143_v63  ;;  %11114 = vmatpush3.msra.mxu0 %v6262_v2  ;;  %6152 = vadd.xlane.f32.xlu1 %v6151_v3  ;;  %v10300_v3 = vld [vmem:[%s13796_s6 + $0x2c] sm:$0xf] }
0x1009   : > { %11123 = vmatprep.subr.mxu0 %v12125_v1  ;;  %11734 = vpow2.f32 %v6135_v21  ;;  %v10299_v21 = vld [vmem:[%s13796_s6 + $0x28] sm:$0xf] }
0x100e   : > { %v13276_v4 = vpop.eup %11730 }
0x100f   : > { %v6160_v5 = vsel %vm1604_vm6, %v13276_v4, 0.0 }
0x1010   : > { %6161 = vadd.xlane.f32.xlu0 %v6160_v5 }
0x1012   : > { %v13280_v6 = vpop.eup %11732 }
0x1013   : > { %v6166_v7 = vsel %vm1604_vm6, %v13280_v6, 0.0  ;;  %v11735_v9 = vpop.eup %11734 }
0x1014   : > { %6167 = vadd.xlane.f32.xlu0 %v6166_v7  ;;  %v6154_v11 = vsel %vm1604_vm6, %v11735_v9, 0.0 }
0x1018   : > { %6155 = vadd.xlane.f32.xlu0 %v6154_v11  ;;  %v10302_v11 = vld [vmem:[%s13796_s6 + $0x34] sm:$0xf] }
0x1019   : > { %6565 = vrot.lane.b32.xlu1 %v13173_v54, %s13894_s2 }
0x102c   : > { %v6111_v13 = vpop.xlane.xlu1 %6110 }
0x102d   : > { %v6125_v10 = vsub.f32 %v5866_v34, %v6111_v13 }
0x102e   : > { %6489 = vrot.lane.b32.xlu0 %v13167_v53, %s13894_s2 }
0x102f   : > { %v6137_v14 = vmul.f32 1.442695, %v6125_v10  ;;  %v10304_v10 = vld [vmem:[%s13796_s6 + $0x3c] sm:$0xf] }
0x1030   : > { %v6117_v16 = vpop.xlane.xlu1 %6116 }
0x1031   : > { %11736 = vpow2.f32 %v6137_v14  ;;  %v6127_v18 = vsub.f32 %v13255_v37, %v6117_v16 }
0x1032   : > { %6641 = vrot.lane.b32.xlu0 %v13175_v55, %s13894_s2  ;;  %v5361_v55 = vsel %vm897_vm1, %v13302_v19, 0.0 }
0x1033   : > { %v6141_v17 = vmul.f32 1.442695, %v6127_v18 }
0x1034   : > { %v6414_v26 = vpop.permute.xlu1 %6413 }
0x1035   : > { %11738 = vpow2.f32 %v6141_v17 }
0x103b   : > { %v13292_v23 = vpop.eup %11736 }
0x103c   : > { %v6157_v54 = vsel %vm1604_vm6, %v13292_v23, 0.0 }
0x103d   : > { %6158 = vadd.xlane.f32.xlu1 %v6157_v54  ;;  %v10354_v54 = vld [vmem:[%s13799_s9 + $0x20] sm:$0xff] }
0x103f   : > { %v13296_v20 = vpop.eup %11738 }
0x1040   : > { %v6163_v53 = vsel %vm1604_vm6, %v13296_v20, 0.0 }
0x1041   : > { %6164 = vadd.xlane.f32.xlu1 %v6163_v53 }
0x1051   : > { %5362 = vadd.xlane.f32.xlu0 %v5361_v55 }
0x1052   : > { %6717 = vrot.lane.b32.xlu1 %v13181_v56, %s13894_s2 }
0x1065   : > { %v6147_v27 = vpop.xlane.xlu1 %6146 }
0x1066   : > { %11740 = vrcp.f32 %v6147_v27  ;;  %v10349_v27 = vld [vmem:[%s13798_s8 + $0x20] sm:$0xff] }
0x1070   : > { %v11741_v28 = vpop.eup %11740 }
0x1071   : > { %v6177_v29 = vmul.f32 %v11741_v28, %v13262_v8  ;;  %v10350_v28 = vld [vmem:[%s13798_s8 + $0x28] sm:$0xff] }
0x1073   : > { %11111 = vmatmul.mubr.msk.f32.vlgmr.msra.gmra.mrb[68].mxu1 %vm1604_vm6, %v6177_v29 }
0x1074   : > { %11119 = vmatpush3.msra.mxu1 %v6338_v12  ;;  %11120 = vmatprep.mubr.msk.f32.mxu1 %vm12124_vm0, %v12125_v1 }
0x1075   : > { %11128 = vmatprep.subr.mxu1 %v12125_v1 }
0x1091   : > { %v6150_v35 = vpop.xlane.xlu0 %6149 }
0x1092   : > { %11742 = vrcp.f32 %v6150_v35 }
0x1095   : > { %v6153_v58 = vpop.xlane.xlu1 %6152 }
0x1096   : > { %11744 = vrcp.f32 %v6153_v58 }
0x1099   : > { %v6566_v8 = vpop.permute.xlu1 %6565 }
0x109c   : > { %v11743_v30 = vpop.eup %11742 }
0x109d   : > { %v6178_v56 = vmul.f32 %v11743_v30, %v13267_v59  ;;  %v6162_v31 = vpop.xlane.xlu0 %6161  ;;  %v10297_v59 = vld [vmem:[%s13796_s6 + $0x20] sm:$0xf] }
0x109f   : > { %11116 = vmatmul.mubr.msk.f32.vlgmr.msra.gmra.mrb[60].mxu0 %vm1604_vm6, %v6178_v56  ;;  %v11462_v56 = vpack.c.bf16 %v10350_v28, %v10349_v27 }
0x10a0   : > { %v11745_v33 = vpop.eup %11744  ;;  %11124 = vmatpush3.msra.mxu0 %v6414_v26  ;;  %11125 = vmatprep.mubr.msk.f32.mxu0 %vm12124_vm0, %v12125_v1  ;;  %v10303_v26 = vld [vmem:[%s13796_s6 + $0x38] sm:$0xf] }
0x10a1   : > { %v6179_v34 = vmul.f32 %v11745_v33, %v13271_v62  ;;  %v6168_v37 = vpop.xlane.xlu0 %6167  ;;  %11133 = vmatprep.subr.mxu0 %v12125_v1  ;;  %v10298_v62 = vld [vmem:[%s13796_s6 + $0x24] sm:$0xf]  ;;  %v10351_v33 = vld [vmem:[%s13798_s8 + $0x30] sm:$0xff] }
0x10a3   : > { %11121 = vmatmul.mubr.msk.f32.vlgmr.msra.gmra.mrb[70].mxu1 %vm1604_vm6, %v6179_v34  ;;  %v10352_v34 = vld [vmem:[%s13798_s8 + $0x38] sm:$0xff] }
0x10a4   : > { %11130 = vmatprep.mubr.msk.f32.mxu1 %vm12124_vm0, %v12125_v1 }
0x10a5   : > { %v6156_v39 = vpop.xlane.xlu0 %6155 }
0x10a6   : > { %11746 = vrcp.f32 %v6156_v39  ;;  %v10290_v39 = vld [vmem:[%s13888_s0 + $0x2] ss:$0 sm:$0xff] }
0x10a7   : > { %11748 = vrcp.f32 %v6162_v31 }
0x10a8   : > { %11750 = vrcp.f32 %v6168_v37 }
0x10a9   : > { %v6490_v40 = vpop.permute.xlu0 %6489 }
0x10aa   : > { %11129 = vmatpush3.msra.mxu1 %v6490_v40 }
0x10ab   : > { %11138 = vmatprep.subr.mxu1 %v12125_v1 }
0x10ad   : > { %v6642_v51 = vpop.permute.xlu0 %6641 }
0x10b0   : > { %v11747_v42 = vpop.eup %11746 }
0x10b1   : > { %v6180_v43 = vmul.f32 %v11747_v42, %v11735_v9  ;;  %v11749_v44 = vpop.eup %11748  ;;  %v11465_v42 = vpack.c.bf16 %v10352_v34, %v10351_v33 }
0x10b2   : > { %v6182_v38 = vmul.f32 %v11749_v44, %v13276_v4  ;;  %v11751_v46 = vpop.eup %11750  ;;  %v10291_v44 = vld [vmem:[#allocation8 + $0x2] ss:$0 sm:$0xff] }
0x10b3   : > { %11126 = vmatmul.mubr.msk.f32.vlgmr.msra.gmra.mrb[62].mxu0 %vm1604_vm6, %v6180_v43  ;;  %v6184_v47 = vmul.f32 %v11751_v46, %v13280_v6  ;;  %v10301_v6 = vld [vmem:[%s13796_s6 + $0x30] sm:$0xf] }
0x10b4   : > { %11134 = vmatpush3.msra.mxu0 %v6566_v8  ;;  %11135 = vmatprep.mubr.msk.f32.mxu0 %vm12124_vm0, %v12125_v1 }
0x10b5   : > { %11143 = vmatprep.subr.mxu0 %v12125_v1 }
0x10b7   : > { %11136 = vmatmul.mubr.msk.f32.vlgmr.msra.gmra.mrb[64].mxu0 %vm1604_vm6, %v6182_v38 }
0x10b8   : > { %11145 = vmatprep.mubr.msk.f32.mxu0 %vm12124_vm0, %v12125_v1 }
0x10ca   : > { %v6159_v32 = vpop.xlane.xlu1 %6158 }
0x10cb   : > { %11752 = vrcp.f32 %v6159_v32 }
0x10ce   : > { %v6165_v45 = vpop.xlane.xlu1 %6164 }
0x10cf   : > { %11754 = vrcp.f32 %v6165_v45 }
0x10d2   : > { %v6718_v48 = vpop.permute.xlu1 %6717 }
0x10d3   : > { %11144 = vmatpush3.msra.mxu0 %v6718_v48 }
0x10d4   : > { %11146 = vmatmul.mubr.msk.f32.vlgmr.msra.gmra.mrb[66].mxu0 %vm1604_vm6, %v6184_v47  ;;  %11153 = vmatprep.subr.mxu0 %v12125_v1 }
0x10d5   : > { %v11753_v49 = vpop.eup %11752  ;;  %11155 = vmatprep.mubr.msk.f32.mxu0 %vm12124_vm0, %v12125_v1  ;;  %11154 = vmatpush3.msk.msra.mxu0 %vm2304_vm7, %v10298_v62 }
0x10d6   : > { %v6181_v50 = vmul.f32 %v11753_v49, %v13292_v23  ;;  %11163 = vmatprep.subr.mxu0 %v12125_v1 }
0x10d8   : > { %11131 = vmatmul.mubr.msk.f32.vlgmr.msra.gmra.mrb[72].mxu1 %vm1604_vm6, %v6181_v50 }
0x10d9   : > { %v11755_v52 = vpop.eup %11754  ;;  %11139 = vmatpush3.msra.mxu1 %v6642_v51  ;;  %11140 = vmatprep.mubr.msk.f32.mxu1 %vm12124_vm0, %v12125_v1 }
0x10da   : > { %v6183_v57 = vmul.f32 %v11755_v52, %v13296_v20  ;;  %11148 = vmatprep.subr.mxu1 %v12125_v1  ;;  %v10355_v20 = vld [vmem:[%s13799_s9 + $0x28] sm:$0xff] }
0x10db   : > { %v11468_v53 = vpack.c.bf16 %v10355_v20, %v10354_v54 }
0x10dc   : > { %11141 = vmatmul.mubr.msk.f32.vlgmr.msra.gmra.mrb[74].mxu1 %vm1604_vm6, %v6183_v57 }
0x10dd   : > { %11149 = vmatpush3.msk.msra.mxu1 %vm2304_vm7, %v10297_v59  ;;  %11150 = vmatprep.mubr.msk.f32.mxu1 %vm12124_vm0, %v12125_v1 }
0x10de   : > { %v5363_v60 = vpop.xlane.xlu0 %5362  ;;  %11158 = vmatprep.subr.mxu1 %v12125_v1 }
0x10df   : > { %v5364_v36 = vmul.f32 0.03125, %v5363_v60 }
0x10e1   : > { %v13351_v61 = vsub.f32 %v13302_v19, %v5364_v36  ;;  %v10357_v19 = vld [vmem:[%s13799_s9 + $0x38] sm:$0xff] }
0x10e2   : > { %v11471_v29 = vpack.c.bf16 %v10357_v19, %v10356_v25 }
0x10e3   : > { %v5366_v22 = vmul.f32 %v13351_v61, %v13351_v61 }
0x10e5   : > { %v5367_v15 = vsel %vm897_vm1, %v5366_v22, 0.0 }
0x10e6   : > { %5368 = vadd.xlane.f32.xlu1 %v5367_v15 }
0x1146   : > { %v6257_v63 = vpop.f32.mrb[68].mxu1 }
0x1147   : > { %v11112_v2 = vpop.f32.mrb[69].mxu1  ;;  %11151 = vmatmul.mubr.msk.f32.vlgmr.msra.gmra.mrb[76].mxu1 %vm997_vm4, %v6257_v63 }
0x1148   : > { %11159 = vmatpush3.msk.msra.mxu1 %vm2304_vm7, %v10299_v21  ;;  %11160 = vmatprep.mubr.msk.f32.mxu1 %vm12124_vm0, %v12125_v1 }
0x1149   : > { %11168 = vmatprep.subr.mxu1 %v12125_v1 }
0x1172   : > { %v6333_v4 = vpop.f32.mrb[60].mxu0 }
0x1173   : > { %v11117_v5 = vpop.f32.mrb[61].mxu0  ;;  %11156 = vmatmul.mubr.msk.f32.vlgmr.msra.gmra.mrb[68].mxu0 %vm997_vm4, %v6333_v4  ;;  %v5369_v18 = vpop.xlane.xlu1 %5368 }
0x1174   : > { %11164 = vmatpush3.msk.msra.mxu0 %vm2304_vm7, %v10300_v3  ;;  %11165 = vmatprep.mubr.msk.f32.mxu0 %vm12124_vm0, %v12125_v1  ;;  %v5370_v17 = vmul.f32 0.03125, %v5369_v18 }
0x1175   : > { %11173 = vmatprep.subr.mxu0 %v12125_v1 }
0x1176   : > { %v6409_v7 = vpop.f32.mrb[70].mxu1  ;;  %v5371_v23 = vadd.f32 1e-05, %v5370_v17 }
0x1177   : > { %v11122_v9 = vpop.f32.mrb[71].mxu1  ;;  %11161 = vmatmul.mubr.msk.f32.vlgmr.msra.gmra.mrb[78].mxu1 %vm997_vm4, %v6409_v7 }
0x1178   : > { %11169 = vmatpush3.msk.msra.mxu1 %vm2304_vm7, %v10301_v6  ;;  %11170 = vmatprep.mubr.msk.f32.mxu1 %vm12124_vm0, %v12125_v1  ;;  %11756 = vrsqrt.f32 %v5371_v23 }
0x1179   : > { %11178 = vmatprep.subr.mxu1 %v12125_v1 }
0x1182   : > { %v11757_v35 = vpop.eup %11756 }
0x1183   : > { %v5373_v31 = vmul.f32 %v11757_v35, %v13351_v61  ;;  %v10360_v35 = vld [vmem:[%s13800_s10 + $0x28] sm:$0xff] }
0x1185   : > { %v5380_v43 = vmul.f32 %v10290_v39, %v5373_v31 }
0x1186   : > { %v6485_v12 = vpop.f32.mrb[62].mxu0 }
0x1187   : > { %v11127_v13 = vpop.f32.mrb[63].mxu0  ;;  %11166 = vmatmul.mubr.msk.f32.vlgmr.msra.gmra.mrb[70].mxu0 %vm997_vm4, %v6485_v12  ;;  %v5387_v8 = vadd.f32 %v10291_v44, %v5380_v43 }
0x1188   : > { %11174 = vmatpush3.msk.msra.mxu0 %vm2304_vm7, %v10302_v11  ;;  %11175 = vmatprep.mubr.msk.f32.mxu0 %vm12124_vm0, %v12125_v1 }
0x1189   : > { %11183 = vmatprep.subr.mxu0 %v12125_v1 }
0x118a   : > { %v6637_v14 = vpop.f32.mrb[64].mxu0 }
0x118b   : > { %v11137_v16 = vpop.f32.mrb[65].mxu0  ;;  %11176 = vmatmul.mubr.msk.f32.vlgmr.msra.gmra.mrb[72].mxu0 %vm997_vm4, %v6637_v14 }
0x118c   : > { %11184 = vmatpush3.msk.msra.mxu0 %vm2304_vm7, %v10304_v10  ;;  %11185 = vmatprep.mubr.msk.f32.mxu0 %vm12124_vm0, %v12125_v1  ;;  %v10345_v16 = vld [vmem:[#allocation2 + $0x1] ss:$0 sm:$0xff] }
0x118d   : > { %11467 = vmatprep.subr.bf16.mxu0 %v12123_v0 }
0x11a7   : > { %v6789_v24 = vpop.f32.mrb[66].mxu0 }
0x11a8   : > { %v11147_v55 = vpop.f32.mrb[67].mxu0  ;;  %11186 = vmatmul.mubr.msk.f32.vlgmr.msra.gmra.mrb[74].mxu0 %vm997_vm4, %v6789_v24 }
0x11a9   : > { %11469 = vmatpush3.bf16.msra.mxu0 %v11468_v53  ;;  %11207 = vmatprep.mubr.msk.f32.mxu0 %vm12124_vm0, %v12125_v1 }
0x11aa   : > { %11470 = vmatprep.subr.bf16.mxu0 %v12123_v0 }
0x11ab   : > { %v6561_v58 = vpop.f32.mrb[72].mxu1 }
0x11ac   : > { %v11132_v30 = vpop.f32.mrb[73].mxu1  ;;  %11171 = vmatmul.mubr.msk.f32.vlgmr.msra.gmra.mrb[80].mxu1 %vm997_vm4, %v6561_v58 }
0x11ad   : > { %11179 = vmatpush3.msk.msra.mxu1 %vm2304_vm7, %v10303_v26  ;;  %11180 = vmatprep.mubr.msk.f32.mxu1 %vm12124_vm0, %v12125_v1  ;;  %v10361_v30 = vld [vmem:[%s13800_s10 + $0x30] sm:$0xff] }
0x11ae   : > { %11461 = vmatprep.subr.bf16.mxu1 %v12123_v0  ;;  %11472 = vmatpush3.bf16.msra.mxu0 %v11471_v29  ;;  %v10359_v29 = vld [vmem:[%s13800_s10 + $0x20] sm:$0xff] }
0x11af   : > { %v6713_v37 = vpop.f32.mrb[74].mxu1  ;;  %11221 = vmatprep.subr.mxu0 %v12125_v1  ;;  %v11474_v58 = vpack.c.bf16 %v10360_v35, %v10359_v29 }
0x11b0   : > { %v11142_v40 = vpop.f32.mrb[75].mxu1  ;;  %11181 = vmatmul.mubr.msk.f32.vlgmr.msra.gmra.mrb[82].mxu1 %vm997_vm4, %v6713_v37 }
0x11b1   : > { %11463 = vmatpush3.bf16.msra.mxu1 %v11462_v56  ;;  %11208 = vmatmul.mubr.msk.f32.vlgmr.msra.gmra.mrb[76].mxu0 %vm897_vm1, %v13124_v41  ;;  %v10362_v56 = vld [vmem:[%s13800_s10 + $0x38] sm:$0xff] }
0x11b2   : > { %11464 = vmatprep.subr.bf16.mxu1 %v12123_v0  ;;  %11196 = vmatprep.mubr.msk.f32.mxu1 %vm12124_vm0, %v12125_v1  ;;  %v11477_v31 = vpack.c.bf16 %v10362_v56, %v10361_v30 }
0x11b3   : > { %11223 = vmatprep.mubr.msk.f32.mxu0 %vm12124_vm0, %v12125_v1 }
0x11b5   : > { %11466 = vmatpush3.bf16.msra.mxu1 %v11465_v42 }
0x11b6   : > { %11473 = vmatprep.subr.bf16.mxu1 %v12123_v0 }
0x11b8   : > { %11197 = vmatmul.mubr.msk.f32.vlgmr.msra.gmra.mrb[84].mxu1 %vm897_vm1, %v5387_v8 }
0x11b9   : > { %11218 = vmatprep.mubr.msk.f32.mxu1 %vm12124_vm0, %v12125_v1  ;;  %11475 = vmatpush3.bf16.msra.mxu1 %v11474_v58 }
0x11ba   : > { %11476 = vmatprep.subr.bf16.mxu1 %v12123_v0 }
0x11bd   : > { %11478 = vmatpush3.bf16.msra.mxu1 %v11477_v31 }
0x11be   : > { %11231 = vmatprep.subr.mxu1 %v12125_v1 }
0x121a   : > { %v6865_v38 = vpop.f32.mrb[76].mxu1 }
0x121b   : > { %v11152_v32 = vpop.f32.mrb[77].mxu1  ;;  %v7401_v46 = vsel %vm897_vm1, %v6865_v38, 0.0 }
0x1246   : > { %v6941_v45 = vpop.f32.mrb[68].mxu0 }
0x1247   : > { %v7402_v47 = vsel %vm897_vm1, %v6941_v45, 0.0  ;;  %v11157_v48 = vpop.f32.mrb[69].mxu0 }
0x1248   : > { %v7403_v49 = vadd.f32 %v7402_v47, %v7401_v46 }
0x124a   : > { %v7017_v50 = vpop.f32.mrb[78].mxu1 }
0x124b   : > { %v7404_v51 = vsel %vm897_vm1, %v7017_v50, 0.0  ;;  %v11162_v52 = vpop.f32.mrb[79].mxu1 }
0x124c   : > { %v7405_v57 = vadd.f32 %v7404_v51, %v7403_v49  ;;  %v10347_v49 = vld [vmem:[%s13888_s0 + $0x3] ss:$0 sm:$0xff]  ;;  %v10348_v52 = vld [vmem:[#allocation8 + $0x3] ss:$0 sm:$0xff] }
0x125a   : > { %v7093_v59 = vpop.f32.mrb[70].mxu0 }
0x125b   : > { %v7406_v60 = vsel %vm897_vm1, %v7093_v59, 0.0  ;;  %v11167_v36 = vpop.f32.mrb[71].mxu0 }
0x125c   : > { %v7407_v61 = vadd.f32 %v7406_v60, %v7405_v57 }
0x125e   : > { %v7245_v22 = vpop.f32.mrb[72].mxu0 }
0x125f   : > { %v11177_v15 = vpop.f32.mrb[73].mxu0  ;;  %v7410_v5 = vsel %vm897_vm1, %v7245_v22, 0.0 }
0x127b   : > { %v7397_v62 = vpop.f32.mrb[74].mxu0 }
0x127c   : > { %v11187_v21 = vpop.f32.mrb[75].mxu0  ;;  %v7414_v14 = vsel %vm897_vm1, %v7397_v62, 0.0 }
0x127f   : > { %v7169_v63 = vpop.f32.mrb[80].mxu1 }
0x1280   : > { %v7408_v2 = vsel %vm897_vm1, %v7169_v63, 0.0  ;;  %v11172_v3 = vpop.f32.mrb[81].mxu1 }
0x1281   : > { %v7409_v4 = vadd.f32 %v7408_v2, %v7407_v61 }
0x1283   : > { %v7321_v6 = vpop.f32.mrb[82].mxu1  ;;  %v7411_v7 = vadd.f32 %v7410_v5, %v7409_v4 }
0x1284   : > { %v7412_v9 = vsel %vm897_vm1, %v7321_v6, 0.0  ;;  %v11182_v11 = vpop.f32.mrb[83].mxu1  ;;  %v7604_v12 = vpop.f32.mrb[76].mxu0 }
0x1285   : > { %v7413_v13 = vadd.f32 %v7412_v9, %v7411_v7  ;;  %7702 = vrot.lane.b32.xlu1 %v7604_v12, %s13843_s4  ;;  %11222 = vmatpush3.xpose.msk.msra.mxu0 %vm997_vm4, %v7604_v12  ;;  %v11209_v10 = vpop.f32.mrb[77].mxu0 }
0x1286   : > { %11226 = vmatprep.subr.mxu0 %v12125_v1 }
0x1287   : > { %v7415_v18 = vadd.f32 %v7414_v14, %v7413_v13 }
0x1289   : > { %v7422_v17 = vadd.f32 %v10345_v16, %v7415_v18 }
0x128b   : > { %v7529_v23 = vpop.f32.mrb[84].mxu1  ;;  %v7423_v54 = vadd.f32 %v13124_v41, %v7422_v17 }
0x128c   : > { %7687 = vrot.lane.b32.xlu1 %v7529_v23, %s13843_s4  ;;  %v11198_v20 = vpop.f32.mrb[85].mxu1  ;;  %11224 = vmatmul.mubr.msk.f32.vlgmr.msra.gmra.mrb[78].mxu0 %vm997_vm4, %v7529_v23 }
0x128d   : > { %v7428_v53 = vsel %vm897_vm1, %v7423_v54, 0.0  ;;  %11228 = vmatprep.mubr.msk.f32.mxu0 %vm12124_vm0, %v12125_v1 }
0x128e   : > { %7429 = vadd.xlane.f32.xlu0 %v7428_v53 }
0x1290   : > { %7706 = vrot.lane.b32.xlu1 %v7604_v12, %s12127_s13 }
0x1294   : > { %7708 = vrot.lane.b32.xlu1 %v7604_v12, %s12129_s24 }
0x1298   : > { %7710 = vrot.lane.b32.xlu1 %v7604_v12, %s13890_s30 }
0x129c   : > { %7712 = vrot.lane.b32.xlu1 %v7604_v12, %s13891_s23 }
0x12a0   : > { %7714 = vrot.lane.b32.xlu1 %v7604_v12, %s13892_s5 }
0x12a4   : > { %7699 = vrot.lane.b32.xlu1 %v7529_v23, %s13892_s5  ;;  %7704 = vrot.lane.b32.xlu0 %v7604_v12, %s13895_s22 }
0x12f7   : > { %v7703_v41 = vpop.permute.xlu1 %7702 }
0x12f8   : > { %11227 = vmatpush3.xpose.msk.msra.mxu0 %vm997_vm4, %v7703_v41 }
0x12f9   : > { %11236 = vmatprep.subr.mxu0 %v12125_v1 }
0x12fe   : > { %v7688_v24 = vpop.permute.xlu1 %7687 }
0x12ff   : > { %11229 = vmatmul.mubr.msk.f32.vlgmr.msra.gmra.mrb[80].mxu0 %vm997_vm4, %v7688_v24 }
0x1300   : > { %11238 = vmatprep.mubr.msk.f32.mxu0 %vm12124_vm0, %v12125_v1 }
0x1302   : > { %v7707_v25 = vpop.permute.xlu1 %7706 }
0x1303   : > { %11237 = vmatpush3.xpose.msk.msra.mxu0 %vm997_vm4, %v7707_v25 }
0x1304   : > { %11246 = vmatprep.subr.mxu0 %v12125_v1 }
0x1306   : > { %v7709_v39 = vpop.permute.xlu1 %7708 }
0x130a   : > { %v7711_v44 = vpop.permute.xlu1 %7710 }
0x130e   : > { %v7713_v32 = vpop.permute.xlu1 %7712 }
0x1312   : > { %v7715_v47 = vpop.permute.xlu1 %7714 }
0x1316   : > { %v7700_v59 = vpop.permute.xlu1 %7699 }
0x131b   : > { %v7430_v19 = vpop.xlane.xlu0 %7429 }
0x131c   : > { %v7431_v55 = vmul.f32 0.03125, %v7430_v19 }
0x131e   : > { %v7432_v26 = vsub.f32 %v7423_v54, %v7431_v55 }
0x131f   : > { %v7705_v40 = vpop.permute.xlu0 %7704 }
0x1320   : > { %v7433_v27 = vmul.f32 %v7432_v26, %v7432_v26 }
0x1322   : > { %v7434_v28 = vsel %vm897_vm1, %v7433_v27, 0.0 }
0x1323   : > { %7435 = vadd.xlane.f32.xlu0 %v7434_v28 }
0x1339   : > { %7689 = vrot.lane.b32.xlu0 %v7529_v23, %s13895_s22 }
0x133d   : > { %7691 = vrot.lane.b32.xlu0 %v7529_v23, %s12127_s13 }
0x1341   : > { %7693 = vrot.lane.b32.xlu0 %v7529_v23, %s12129_s24 }
0x1345   : > { %7695 = vrot.lane.b32.xlu0 %v7529_v23, %s13890_s30 }
0x1349   : > { %7697 = vrot.lane.b32.xlu0 %v7529_v23, %s13891_s23 }
0x135f   : > { %v7819_v33 = vpop.f32.mrb[78].mxu0 }
0x1360   : > { %v11225_v34 = vpop.f32.mrb[79].mxu0  ;;  %v8341_v37 = vsel %vm1604_vm6, %v7819_v33, -inf }
0x1368   : > { %8342 = vmax.xlane.f32.xlu0 %v8341_v37 }
0x13b0   : > { %v7436_v42 = vpop.xlane.xlu0 %7435 }
0x13b1   : > { %v7437_v43 = vmul.f32 0.03125, %v7436_v42 }
0x13b3   : > { %v7438_v8 = vadd.f32 1e-05, %v7437_v43 }
0x13b4   : > { %v7690_v38 = vpop.permute.xlu0 %7689 }
0x13b5   : > { %11758 = vrsqrt.f32 %v7438_v8 }
0x13b8   : > { %v7692_v45 = vpop.permute.xlu0 %7691 }
0x13b9   : > { %11239 = vmatmul.mubr.msk.f32.vlgmr.msra.gmra.mrb[82].mxu0 %vm997_vm4, %v7692_v45 }
0x13ba   : > { %11247 = vmatpush3.xpose.msk.msra.mxu0 %vm997_vm4, %v7711_v44  ;;  %11248 = vmatprep.mubr.msk.f32.mxu0 %vm12124_vm0, %v12125_v1 }
0x13bb   : > { %11256 = vmatprep.subr.mxu0 %v12125_v1 }
0x13bc   : > { %v7694_v46 = vpop.permute.xlu0 %7693 }
0x13bf   : > { %v11759_v48 = vpop.eup %11758 }
0x13c0   : > { %v7440_v50 = vmul.f32 %v11759_v48, %v7432_v26  ;;  %v7696_v51 = vpop.permute.xlu0 %7695 }
0x13c1   : > { %11249 = vmatmul.mubr.msk.f32.vlgmr.msra.gmra.mrb[84].mxu0 %vm997_vm4, %v7696_v51 }
0x13c2   : > { %11257 = vmatpush3.xpose.msk.msra.mxu0 %vm997_vm4, %v7715_v47  ;;  %11258 = vmatprep.mubr.msk.f32.mxu0 %vm12124_vm0, %v12125_v1  ;;  %v7447_v57 = vmul.f32 %v10347_v49, %v7440_v50 }
0x13c3   : > { %11266 = vmatprep.subr.mxu0 %v12125_v1 }
0x13c4   : > { %v13519_v60 = vadd.f32 %v10348_v52, %v7447_v57  ;;  %v7698_v36 = vpop.permute.xlu0 %7697 }
0x13c5   : > { %11259 = vmatmul.mubr.msk.f32.vlgmr.msra.gmra.mrb[86].mxu0 %vm997_vm4, %v7700_v59 }
0x13c6   : > { %11219 = vmatmul.mubr.msk.f32.vlgmr.msra.gmra.mrb[86].mxu1 %vm897_vm1, %v13519_v60  ;;  %11268 = vmatprep.mubr.msk.f32.mxu0 %vm12124_vm0, %v12125_v1 }
0x13c7   : > { %11232 = vmatpush3.xpose.msk.msra.mxu1 %vm997_vm4, %v7705_v40  ;;  %11233 = vmatprep.mubr.msk.f32.mxu1 %vm12124_vm0, %v12125_v1 }
0x13c8   : > { %11241 = vmatprep.subr.mxu1 %v12125_v1 }
0x13ca   : > { %11234 = vmatmul.mubr.msk.f32.vlgmr.msra.gmra.mrb[88].mxu1 %vm997_vm4, %v7690_v38 }
0x13cb   : > { %11242 = vmatpush3.xpose.msk.msra.mxu1 %vm997_vm4, %v7709_v39  ;;  %11243 = vmatprep.mubr.msk.f32.mxu1 %vm12124_vm0, %v12125_v1 }
0x13cc   : > { %11251 = vmatprep.subr.mxu1 %v12125_v1 }
0x13ce   : > { %11244 = vmatmul.mubr.msk.f32.vlgmr.msra.gmra.mrb[90].mxu1 %vm997_vm4, %v7694_v46 }
0x13cf   : > { %11252 = vmatpush3.xpose.msk.msra.mxu1 %vm997_vm4, %v7713_v32  ;;  %11253 = vmatprep.mubr.msk.f32.mxu1 %vm12124_vm0, %v12125_v1 }
0x13d0   : > { %11261 = vmatprep.subr.mxu1 %v12125_v1 }
0x13d2   : > { %v7893_v61 = vpop.f32.mrb[80].mxu0  ;;  %11254 = vmatmul.mubr.msk.f32.vlgmr.msra.gmra.mrb[92].mxu1 %vm997_vm4, %v7698_v36 }
0x13d3   : > { %v11230_v22 = vpop.f32.mrb[81].mxu0  ;;  %v8344_v15 = vsel %vm1604_vm6, %v7893_v61, -inf  ;;  %11263 = vmatprep.mubr.msk.f32.mxu1 %vm12124_vm0, %v12125_v1 }
0x13d4   : > { %8345 = vmax.xlane.f32.xlu1 %v8344_v15 }
0x13f5   : > { %v8343_v63 = vpop.xlane.xlu0 %8342 }
0x13f6   : > { %v8365_v3 = vsub.f32 %v7819_v33, %v8343_v63 }
0x13f8   : > { %v8373_v7 = vmul.f32 1.442695, %v8365_v3 }
0x13fa   : > { %11760 = vpow2.f32 %v8373_v7 }
0x1404   : > { %v11761_v19 = vpop.eup %11760 }
0x1405   : > { %v8389_v26 = vsel %vm1604_vm6, %v11761_v19, 0.0 }
0x1461   : > { %v8346_v5 = vpop.xlane.xlu1 %8345 }
0x1462   : > { %v8366_v9 = vsub.f32 %v7893_v61, %v8346_v5 }
0x1464   : > { %v8375_v10 = vmul.f32 1.442695, %v8366_v9 }
0x1466   : > { %11762 = vpow2.f32 %v8375_v10 }
0x1470   : > { %v11763_v27 = vpop.eup %11762 }
0x1471   : > { %v8392_v28 = vsel %vm1604_vm6, %v11763_v27, 0.0 }
0x148c   : > { %v8041_v62 = vpop.f32.mrb[82].mxu0 }
0x148d   : > { %v11240_v21 = vpop.f32.mrb[83].mxu0  ;;  %v8350_v54 = vsel %vm1604_vm6, %v8041_v62, -inf }
0x1494   : > { %v8189_v2 = vpop.f32.mrb[84].mxu0 }
0x1495   : > { %v11250_v4 = vpop.f32.mrb[85].mxu0  ;;  %v8356_v24 = vsel %vm1604_vm6, %v8189_v2, -inf }
0x1498   : > { %v8337_v6 = vpop.f32.mrb[86].mxu0 }
0x1499   : > { %v13544_v11 = vpop.f32.mrb[86].mxu1  ;;  %v11260_v12 = vpop.f32.mrb[87].mxu0  ;;  %v8362_v55 = vsel %vm1604_vm6, %v8337_v6, -inf }
0x149a   : > { %v11220_v13 = vpop.f32.mrb[87].mxu1  ;;  %11262 = vmatpush3.msra.mxu1 %v13544_v11 }
0x149b   : > { %11271 = vmatprep.subr.mxu1 %v12125_v1 }
0x149d   : > { %v7967_v14 = vpop.f32.mrb[88].mxu1 }
0x149e   : > { %v11235_v16 = vpop.f32.mrb[89].mxu1  ;;  %v8347_v18 = vsel %vm1604_vm6, %v7967_v14, -inf }
0x149f   : > { %8348 = vmax.xlane.f32.xlu0 %v8347_v18 }
0x14a1   : > { %v8115_v17 = vpop.f32.mrb[90].mxu1 }
0x14a2   : > { %v11245_v23 = vpop.f32.mrb[91].mxu1  ;;  %v8353_v20 = vsel %vm1604_vm6, %v8115_v17, -inf }
0x14a3   : > { %8351 = vmax.xlane.f32.xlu0 %v8350_v54  ;;  %8354 = vmax.xlane.f32.xlu1 %v8353_v20 }
0x14a5   : > { %v8263_v53 = vpop.f32.mrb[92].mxu1 }
0x14a6   : > { %v11255_v41 = vpop.f32.mrb[93].mxu1  ;;  %v8359_v25 = vsel %vm1604_vm6, %v8263_v53, -inf }
0x14a7   : > { %8357 = vmax.xlane.f32.xlu0 %v8356_v24  ;;  %8360 = vmax.xlane.f32.xlu1 %v8359_v25 }
0x14ab   : > { %8363 = vmax.xlane.f32.xlu0 %v8362_v55  ;;  %8390 = vadd.xlane.f32.xlu1 %v8389_v26 }
0x14af   : > { %8393 = vadd.xlane.f32.xlu0 %v8392_v28 }
0x14bc   : > { %7717 = vrot.lane.b32.xlu1 %v13544_v11, %s13896_s26  ;;  %s13900_s26 = sld [smem:[#allocation40_spill]] }
0x14c0   : > { %7723 = vrot.lane.b32.xlu1 %v13544_v11, %s12127_s13 }
0x14c2   : > { %s13901_s13 = smov %s13900_s26 }
0x14c4   : > { %7726 = vrot.lane.b32.xlu1 %v13544_v11, %s12129_s24  ;;  %s13747_s24 = scalar_lea.hbm %s13900_s26, %s10433_s27 }
0x152c   : > { %v8349_v29 = vpop.xlane.xlu0 %8348 }
0x152d   : > { %v8367_v35 = vsub.f32 %v7967_v14, %v8349_v29  ;;  %v7739_v29 = vld [vmem:[#allocation5 + $0x20] sm:$0xf] }
0x152f   : > { %v8377_v58 = vmul.f32 1.442695, %v8367_v35  ;;  %v7740_v35 = vld [vmem:[#allocation5 + $0x24] sm:$0xf] }
0x1530   : > { %v8352_v30 = vpop.xlane.xlu0 %8351  ;;  %v8355_v56 = vpop.xlane.xlu1 %8354 }
0x1531   : > { %11764 = vpow2.f32 %v8377_v58  ;;  %v8368_v31 = vsub.f32 %v8041_v62, %v8352_v30  ;;  %v8369_v33 = vsub.f32 %v8115_v17, %v8355_v56 }
0x1533   : > { %v8379_v34 = vmul.f32 1.442695, %v8368_v31  ;;  %v8381_v37 = vmul.f32 1.442695, %v8369_v33  ;;  %v7741_v33 = vld [vmem:[#allocation5 + $0x28] sm:$0xf] }
0x1534   : > { %v8358_v39 = vpop.xlane.xlu0 %8357  ;;  %v8361_v40 = vpop.xlane.xlu1 %8360 }
0x1535   : > { %11766 = vpow2.f32 %v8379_v34  ;;  %v8370_v42 = vsub.f32 %v8189_v2, %v8358_v39  ;;  %v8371_v43 = vsub.f32 %v8263_v53, %v8361_v40  ;;  %v7742_v34 = vld [vmem:[#allocation5 + $0x2c] sm:$0xf] }
0x1536   : > { %11768 = vpow2.f32 %v8381_v37  ;;  %v7743_v37 = vld [vmem:[#allocation5 + $0x30] sm:$0xf] }
0x1537   : > { %v8383_v44 = vmul.f32 1.442695, %v8370_v42  ;;  %v8385_v8 = vmul.f32 1.442695, %v8371_v43  ;;  %v7744_v42 = vld [vmem:[#allocation5 + $0x34] sm:$0xf] }
0x1538   : > { %v8364_v38 = vpop.xlane.xlu0 %8363  ;;  %v8391_v32 = vpop.xlane.xlu1 %8390 }
0x1539   : > { %11770 = vpow2.f32 %v8383_v44  ;;  %v8372_v45 = vsub.f32 %v8337_v6, %v8364_v38 }
0x153a   : > { %11772 = vpow2.f32 %v8385_v8  ;;  %v7745_v8 = vld [vmem:[#allocation5 + $0x38] sm:$0xf] }
0x153b   : > { %v11765_v46 = vpop.eup %11764  ;;  %v8387_v47 = vmul.f32 1.442695, %v8372_v45  ;;  %11774 = vrcp.f32 %v8391_v32  ;;  %v7746_v45 = vld [vmem:[#allocation5 + $0x3c] sm:$0xf] }
0x153c   : > { %v8394_v48 = vpop.xlane.xlu0 %8393  ;;  %v7718_v49 = vpop.permute.xlu1 %7717  ;;  %v8395_v50 = vsel %vm1604_vm6, %v11765_v46, 0.0 }
0x153d   : > { %11776 = vpow2.f32 %v8387_v47  ;;  %8396 = vadd.xlane.f32.xlu1 %v8395_v50  ;;  %11267 = vmatpush3.msra.mxu0 %v7718_v49 }
0x153e   : > { %11778 = vrcp.f32 %v8394_v48  ;;  %11276 = vmatprep.subr.mxu0 %v12125_v1 }
0x153f   : > { %v11767_v51 = vpop.eup %11766 }
0x1540   : > { %v11769_v52 = vpop.eup %11768  ;;  %v8398_v57 = vsel %vm1604_vm6, %v11767_v51, 0.0  ;;  %v7724_v5 = vpop.permute.xlu1 %7723 }
0x1541   : > { %8399 = vadd.xlane.f32.xlu0 %v8398_v57  ;;  %v8401_v59 = vsel %vm1604_vm6, %v11769_v52, 0.0 }
0x1542   : > { %8402 = vadd.xlane.f32.xlu1 %v8401_v59 }
0x1543   : > { %v11771_v36 = vpop.eup %11770 }
0x1544   : > { %v11773_v61 = vpop.eup %11772  ;;  %v8404_v22 = vsel %vm1604_vm6, %v11771_v36, 0.0  ;;  %v7727_v6 = vpop.permute.xlu1 %7726 }
0x1545   : > { %v11775_v15 = vpop.eup %11774  ;;  %8405 = vadd.xlane.f32.xlu0 %v8404_v22  ;;  %v8407_v62 = vsel %vm1604_vm6, %v11773_v61, 0.0 }
0x1546   : > { %v8421_v21 = vmul.f32 %v11775_v15, %v11761_v19  ;;  %8408 = vadd.xlane.f32.xlu1 %v8407_v62 }
0x1547   : > { %v11777_v63 = vpop.eup %11776 }
0x1548   : > { %v11779_v2 = vpop.eup %11778  ;;  %11264 = vmatmul.mubr.msk.f32.vlgmr.msra.gmra.mrb[94].mxu1 %vm1604_vm6, %v8421_v21  ;;  %v8410_v3 = vsel %vm1604_vm6, %v11777_v63, 0.0 }
0x1549   : > { %v8422_v4 = vmul.f32 %v11779_v2, %v11763_v27  ;;  %8411 = vadd.xlane.f32.xlu0 %v8410_v3  ;;  %11273 = vmatprep.mubr.msk.f32.mxu1 %vm12124_vm0, %v12125_v1 }
0x154b   : > { %11269 = vmatmul.mubr.msk.f32.vlgmr.msra.gmra.mrb[88].mxu0 %vm1604_vm6, %v8422_v4 }
0x154c   : > { %11277 = vmatpush3.msra.mxu0 %v7724_v5  ;;  %11278 = vmatprep.mubr.msk.f32.mxu0 %vm12124_vm0, %v12125_v1 }
0x154d   : > { %11286 = vmatprep.subr.mxu0 %v12125_v1 }
0x1557   : > { %7732 = vrot.lane.b32.xlu1 %v13544_v11, %s13891_s23  ;;  %s13898_s23 = sld [smem:[#allocation24_spill]] }
0x155f   : > { %7720 = vrot.lane.b32.xlu0 %v13544_v11, %s13895_s22  ;;  %s786_s22 = sand.u32 1, %s13898_s23  }
0x1560   : > { %s10189_s2 = sshll.u32 %s786_s22, 3 }
0x1561   : > { %s788_s29 = scalar_lea.vmem [#allocation16], %s10189_s2  ;;  %s12029_s2 = sshll.u32 %s12136_s3, 4  ;;  %s12030_s2 = int_to_ptr.vmem [resolvable:$false] %s12029_s2 }
0x1562   : > { %s10007_s28 = sshll.u32 %s788_s29, 4  ;;  %s13749_s28 = int_to_ptr.vmem [resolvable:$true] %s10007_s28 }
0x1563   : > { %7729 = vrot.lane.b32.xlu0 %v13544_v11, %s13890_s30  ;;  %s9994_s30 = scalar_lea.sflag [#allocation4], %s786_s22  ;;  %s12025_s23 = scalar_lea.vmem %s13749_s28, 128 }
0x1564   : > { %p12026_p8 = scmp.ne.s32.totalorder %s13749_s28, %s12025_s23  ;;  %p12032_p6 = scmp.lt.s32.totalorder %s13749_s28, %s12030_s2 }
0x1567   : > { %7735 = vrot.lane.b32.xlu0 %v13544_v11, %s13892_s5  ;;  %s13899_s5 = sld [smem:[#allocation29_spill]] }
0x156d   : > { %p13902_p11 = scmp.ne.s32.totalorder %s13899_s5, 0 }
0x156f   : > { %p12027_p5 = pnand %p12026_p8, %p13902_p11 }
0x1571   : > { %p12028_p0 = pneg %p12027_p5 }
0x15ca   : > { %v8397_v7 = vpop.xlane.xlu1 %8396 }
0x15cb   : > { %11780 = vrcp.f32 %v8397_v7 }
0x15ce   : > { %v8400_v9 = vpop.xlane.xlu0 %8399 }
0x15cf   : > { %11782 = vrcp.f32 %v8400_v9  ;;  %v8403_v12 = vpop.xlane.xlu1 %8402 }
0x15d0   : > { %11784 = vrcp.f32 %v8403_v12 }
0x15d2   : > { %v8406_v13 = vpop.xlane.xlu0 %8405 }
0x15d3   : > { %11786 = vrcp.f32 %v8406_v13  ;;  %v8409_v10 = vpop.xlane.xlu1 %8408 }
0x15d4   : > { %11788 = vrcp.f32 %v8409_v10 }
0x15d5   : > { %v11781_v16 = vpop.eup %11780 }
0x15d6   : > { %v8412_v14 = vpop.xlane.xlu0 %8411  ;;  %v8423_v17 = vmul.f32 %v11781_v16, %v11765_v46 }
0x15d7   : > { %11790 = vrcp.f32 %v8412_v14  ;;  %v7733_v19 = vpop.permute.xlu1 %7732 }
0x15d9   : > { %v11783_v18 = vpop.eup %11782 }
0x15da   : > { %v8424_v23 = vmul.f32 %v11783_v18, %v11767_v51  ;;  %v7721_v54 = vpop.permute.xlu0 %7720  ;;  %v11785_v20 = vpop.eup %11784 }
0x15db   : > { %11272 = vmatpush3.msra.mxu1 %v7721_v54  ;;  %v8425_v53 = vmul.f32 %v11785_v20, %v11769_v52 }
0x15dc   : > { %11274 = vmatmul.mubr.msk.f32.vlgmr.msra.gmra.mrb[96].mxu1 %vm1604_vm6, %v8423_v17  ;;  %11279 = vmatmul.mubr.msk.f32.vlgmr.msra.gmra.mrb[90].mxu0 %vm1604_vm6, %v8424_v23 }
0x15dd   : > { %v11787_v11 = vpop.eup %11786  ;;  %11281 = vmatprep.subr.mxu1 %v12125_v1  ;;  %11283 = vmatprep.mubr.msk.f32.mxu1 %vm12124_vm0, %v12125_v1 }
0x15de   : > { %v8426_v41 = vmul.f32 %v11787_v11, %v11771_v36  ;;  %11282 = vmatpush3.msra.mxu1 %v7727_v6  ;;  %v7730_v24 = vpop.permute.xlu0 %7729  ;;  %11288 = vmatprep.mubr.msk.f32.mxu0 %vm12124_vm0, %v12125_v1  ;;  %v11789_v25 = vpop.eup %11788 }
0x15df   : > { %11287 = vmatpush3.msra.mxu0 %v7730_v24  ;;  %11291 = vmatprep.subr.mxu1 %v12125_v1  ;;  %v8427_v26 = vmul.f32 %v11789_v25, %v11773_v61 }
0x15e0   : > { %11284 = vmatmul.mubr.msk.f32.vlgmr.msra.gmra.mrb[98].mxu1 %vm1604_vm6, %v8425_v53  ;;  %11289 = vmatmul.mubr.msk.f32.vlgmr.msra.gmra.mrb[92].mxu0 %vm1604_vm6, %v8426_v41  ;;  %v10404_v41 = vld [vmem:[#allocation7 + $0x1] ss:$0 sm:$0xff] }
0x15e1   : > { %v11791_v55 = vpop.eup %11790  ;;  %11292 = vmatpush3.msra.mxu1 %v7733_v19  ;;  %11296 = vmatprep.subr.mxu0 %v12125_v1 }
0x15e2   : > { %v8428_v27 = vmul.f32 %v11791_v55, %v11777_v63  ;;  %v7736_v28 = vpop.permute.xlu0 %7735  ;;  %11293 = vmatprep.mubr.msk.f32.mxu1 %vm12124_vm0, %v12125_v1  ;;  %11298 = vmatprep.mubr.msk.f32.mxu0 %vm12124_vm0, %v12125_v1 }
0x15e3   : > { %11297 = vmatpush3.msra.mxu0 %v7736_v28  ;;  %11301 = vmatprep.subr.mxu1 %v12125_v1 }
0x15e4   : > { %11294 = vmatmul.mubr.msk.f32.vlgmr.msra.gmra.mrb[100].mxu1 %vm1604_vm6, %v8427_v26  ;;  %11299 = vmatmul.mubr.msk.f32.vlgmr.msra.gmra.mrb[94].mxu0 %vm1604_vm6, %v8428_v27 }
0x15e5   : > { %11302 = vmatpush3.msk.msra.mxu1 %vm2304_vm7, %v7739_v29  ;;  %11303 = vmatprep.mubr.msk.f32.mxu1 %vm12124_vm0, %v12125_v1 }
0x15e6   : > { %11306 = vmatprep.subr.mxu0 %v12125_v1  ;;  %11308 = vmatprep.mubr.msk.f32.mxu0 %vm12124_vm0, %v12125_v1 }
0x15e7   : > { %11307 = vmatpush3.msk.msra.mxu0 %vm2304_vm7, %v7740_v35  ;;  %11311 = vmatprep.subr.mxu1 %v12125_v1 }
0x15e8   : > { %11316 = vmatprep.subr.mxu0 %v12125_v1 }
0x161b   : > { %v8498_v58 = vpop.f32.mrb[94].mxu1 }
0x161c   : > { %v11265_v30 = vpop.f32.mrb[95].mxu1  ;;  %11304 = vmatmul.mubr.msk.f32.vlgmr.msra.gmra.mrb[102].mxu1 %vm997_vm4, %v8498_v58 }
0x161d   : > { %11313 = vmatprep.mubr.msk.f32.mxu1 %vm12124_vm0, %v12125_v1  ;;  %11312 = vmatpush3.msk.msra.mxu1 %vm2304_vm7, %v7741_v33  ;;  %v9676_v30 = vld [vmem:[#allocation10 + $0x20] sm:$0xff]  ;;  %v9678_v33 = vld [vmem:[#allocation10 + $0x30] sm:$0xff] }
0x161e   : > { %v8571_v56 = vpop.f32.mrb[88].mxu0  ;;  %11321 = vmatprep.subr.mxu1 %v12125_v1 }
0x161f   : > { %v11270_v31 = vpop.f32.mrb[89].mxu0  ;;  %11309 = vmatmul.mubr.msk.f32.vlgmr.msra.gmra.mrb[96].mxu0 %vm997_vm4, %v8571_v56  ;;  %v9677_v56 = vld [vmem:[#allocation10 + $0x28] sm:$0xff] }
0x1620   : > { %11318 = vmatprep.mubr.msk.f32.mxu0 %vm12124_vm0, %v12125_v1  ;;  %11317 = vmatpush3.msk.msra.mxu0 %vm2304_vm7, %v7742_v34  ;;  %v11480_v31 = vpack.c.bf16 %v9677_v56, %v9676_v30  ;;  %v9679_v34 = vld [vmem:[#allocation10 + $0x38] sm:$0xff] }
0x1621   : > { %11326 = vmatprep.subr.mxu0 %v12125_v1 }
0x16af   : > { %v8644_v39 = vpop.f32.mrb[96].mxu1  ;;  %v8717_v40 = vpop.f32.mrb[90].mxu0 }
0x16b0   : > { %v11275_v43 = vpop.f32.mrb[97].mxu1  ;;  %v11280_v44 = vpop.f32.mrb[91].mxu0  ;;  %11314 = vmatmul.mubr.msk.f32.vlgmr.msra.gmra.mrb[104].mxu1 %vm997_vm4, %v8644_v39  ;;  %11319 = vmatmul.mubr.msk.f32.vlgmr.msra.gmra.mrb[98].mxu0 %vm997_vm4, %v8717_v40  ;;  %v10411_v39 = vld [vmem:[%s13889_s17 + $0x88] sm:$0xff]  ;;  %v10412_v40 = vld [vmem:[%s13889_s17 + $0x90] sm:$0xff] }
0x16b1   : > { %11322 = vmatpush3.msk.msra.mxu1 %vm2304_vm7, %v7743_v37  ;;  %11323 = vmatprep.mubr.msk.f32.mxu1 %vm12124_vm0, %v12125_v1  ;;  %v11483_v37 = vpack.c.bf16 %v9679_v34, %v9678_v33  ;;  %v10413_v43 = vld [vmem:[%s13889_s17 + $0x98] sm:$0xff]  ;;  %v10429_v33 = vld [vmem:[#allocation8 + $0x5] ss:$0 sm:$0xff] }
0x16b2   : > { %11327 = vmatpush3.msk.msra.mxu0 %vm2304_vm7, %v7744_v42  ;;  %11328 = vmatprep.mubr.msk.f32.mxu0 %vm12124_vm0, %v12125_v1  ;;  %v11489_v44 = vpack.c.bf16 %v10413_v43, %v10412_v40 }
0x16b3   : > { %v8790_v38 = vpop.f32.mrb[98].mxu1  ;;  %v8863_v32 = vpop.f32.mrb[92].mxu0  ;;  %11331 = vmatprep.subr.mxu1 %v12125_v1  ;;  %11336 = vmatprep.subr.mxu0 %v12125_v1 }
0x16b4   : > { %v11285_v46 = vpop.f32.mrb[99].mxu1  ;;  %v11290_v47 = vpop.f32.mrb[93].mxu0  ;;  %11324 = vmatmul.mubr.msk.f32.vlgmr.msra.gmra.mrb[106].mxu1 %vm997_vm4, %v8790_v38  ;;  %11329 = vmatmul.mubr.msk.f32.vlgmr.msra.gmra.mrb[100].mxu0 %vm997_vm4, %v8863_v32  ;;  %v10415_v38 = vld [vmem:[%s13889_s17 + $0xa8] sm:$0xff] }
0x16b5   : > { %11332 = vmatpush3.msk.msra.mxu1 %vm2304_vm7, %v7745_v8  ;;  %11333 = vmatprep.mubr.msk.f32.mxu1 %vm12124_vm0, %v12125_v1  ;;  %v10414_v8 = vld [vmem:[%s13889_s17 + $0xa0] sm:$0xff]  ;;  %v10417_v46 = vld [vmem:[%s13889_s17 + $0xb8] sm:$0xff] }
0x16b6   : > { %11337 = vmatpush3.msk.msra.mxu0 %vm2304_vm7, %v7746_v45  ;;  %11338 = vmatprep.mubr.msk.f32.mxu0 %vm12124_vm0, %v12125_v1  ;;  %v11492_v32 = vpack.c.bf16 %v10415_v38, %v10414_v8  ;;  %v10416_v45 = vld [vmem:[%s13889_s17 + $0xb0] sm:$0xff] }
0x16b7   : > { %v8936_v48 = vpop.f32.mrb[100].mxu1  ;;  %v9009_v49 = vpop.f32.mrb[94].mxu0  ;;  %11479 = vmatprep.subr.bf16.mxu1 %v12123_v0  ;;  %11485 = vmatprep.subr.bf16.mxu0 %v12123_v0  ;;  %v11495_v47 = vpack.c.bf16 %v10417_v46, %v10416_v45 }
0x16b8   : > { %v11295_v50 = vpop.f32.mrb[101].mxu1  ;;  %v11300_v51 = vpop.f32.mrb[95].mxu0  ;;  %11334 = vmatmul.mubr.msk.f32.vlgmr.msra.gmra.mrb[108].mxu1 %vm997_vm4, %v8936_v48  ;;  %11339 = vmatmul.mubr.msk.f32.vlgmr.msra.gmra.mrb[102].mxu0 %vm997_vm4, %v9009_v49  ;;  %v10418_v48 = vld [vmem:[%s13889_s17 + $0xc0] sm:$0xff]  ;;  %v10419_v49 = vld [vmem:[%s13889_s17 + $0xc8] sm:$0xff] }
0x16b9   : > { %11349 = vmatprep.mubr.msk.f32.mxu1 %vm12124_vm0, %v12125_v1  ;;  %11384 = vmatprep.mubr.msk.f32.mxu0 %vm12124_vm0, %v12125_v1  ;;  %v11498_v50 = vpack.c.bf16 %v10419_v49, %v10418_v48  ;;  %v10420_v51 = vld [vmem:[%s13889_s17 + $0xd0] sm:$0xff] }
0x16ba   : > { %11481 = vmatpush3.bf16.msra.mxu1 %v11480_v31  ;;  %v10428_v31 = vld [vmem:[%s13888_s0 + $0x5] ss:$0 sm:$0xff] }
0x16bb   : > { %11482 = vmatprep.subr.bf16.mxu1 %v12123_v0 }
0x16be   : > { %11484 = vmatpush3.bf16.msra.mxu1 %v11483_v37 }
0x16bf   : > { %11509 = vmatprep.subr.bf16.mxu1 %v12123_v0 }
0x16ef   : > { %v9085_v52 = vpop.f32.mrb[102].mxu1 }
0x16f0   : > { %v11305_v57 = vpop.f32.mrb[103].mxu1  ;;  %v9621_v36 = vsel %vm897_vm1, %v9085_v52, 0.0  ;;  %v10421_v52 = vld [vmem:[%s13889_s17 + $0xd8] sm:$0xff] }
0x16f1   : > { %v11501_v57 = vpack.c.bf16 %v10421_v52, %v10420_v51 }
0x16f2   : > { %v9161_v59 = vpop.f32.mrb[96].mxu0 }
0x16f3   : > { %v9622_v61 = vsel %vm897_vm1, %v9161_v59, 0.0  ;;  %v11310_v22 = vpop.f32.mrb[97].mxu0  ;;  %v10422_v59 = vld [vmem:[%s13889_s17 + $0xe0] sm:$0xff] }
0x16f4   : > { %v9623_v15 = vadd.f32 %v9622_v61, %v9621_v36  ;;  %v10423_v36 = vld [vmem:[%s13889_s17 + $0xe8] sm:$0xff] }
0x16f5   : > { %v11504_v61 = vpack.c.bf16 %v10423_v36, %v10422_v59 }
0x1783   : > { %v9237_v62 = vpop.f32.mrb[104].mxu1  ;;  %v9313_v21 = vpop.f32.mrb[98].mxu0 }
0x1784   : > { %v9624_v63 = vsel %vm897_vm1, %v9237_v62, 0.0  ;;  %v11315_v2 = vpop.f32.mrb[105].mxu1  ;;  %v11320_v3 = vpop.f32.mrb[99].mxu0  ;;  %v9626_v5 = vsel %vm897_vm1, %v9313_v21, 0.0 }
0x1785   : > { %v9625_v4 = vadd.f32 %v9624_v63, %v9623_v15  ;;  %v10406_v63 = vld [vmem:[%s13888_s0 + $0x4] ss:$0 sm:$0xff]  ;;  %v10407_v3 = vld [vmem:[#allocation8 + $0x4] ss:$0 sm:$0xff]  ;;  %s12031_s0 = scalar_lea.vmem %s12030_s2, 256 }
0x1786   : > { %p12033_p9 = scmp.lt.s32.totalorder %s12031_s0, %s12025_s23 }
0x1787   : > { %v9627_v6 = vadd.f32 %v9626_v5, %v9625_v4  ;;  %v9389_v7 = vpop.f32.mrb[106].mxu1  ;;  %v9465_v9 = vpop.f32.mrb[100].mxu0 }
0x1788   : > { %v9628_v12 = vsel %vm897_vm1, %v9389_v7, 0.0  ;;  %v11325_v13 = vpop.f32.mrb[107].mxu1  ;;  %v11330_v10 = vpop.f32.mrb[101].mxu0  ;;  %v9630_v16 = vsel %vm897_vm1, %v9465_v9, 0.0  ;;  %v10425_v7 = vld [vmem:[%s13889_s17 + $0xf8] sm:$0xff]  ;;  %p12034_p10 = por %p12033_p9, %p12032_p6 }
0x1789   : > { %v9629_v14 = vadd.f32 %v9628_v12, %v9627_v6  ;;  %v10424_v6 = vld [vmem:[%s13889_s17 + $0xf0] sm:$0xff]  ;;  %v10408_v12 = vld [vmem:[#allocation11 + $0x1] ss:$0 sm:$0xff] }
0x178a   : > { %v11507_v9 = vpack.c.bf16 %v10425_v7, %v10424_v6  ;;  %p12035_p13 = pnand %p12034_p10, %p12028_p0 }
0x178b   : > { %v9631_v18 = vadd.f32 %v9630_v16, %v9629_v14  ;;  %v9541_v17 = vpop.f32.mrb[108].mxu1  ;;  %v9617_v23 = vpop.f32.mrb[102].mxu0 }
0x178c   : > { %v9632_v54 = vsel %vm897_vm1, %v9541_v17, 0.0  ;;  %v11335_v20 = vpop.f32.mrb[109].mxu1  ;;  %v11340_v11 = vpop.f32.mrb[103].mxu0  ;;  %v9634_v24 = vsel %vm897_vm1, %v9617_v23, 0.0 }
0x178d   : > { %v9633_v53 = vadd.f32 %v9632_v54, %v9631_v18  ;;  %v10426_v18 = vld [vmem:[#allocation13 + $0x1] ss:$0 sm:$0xff] }
0x178f   : > { %v9635_v25 = vadd.f32 %v9634_v24, %v9633_v53 }
0x1791   : > { %v9642_v19 = vadd.f32 %v10404_v41, %v9635_v25 }
0x1793   : > { %v9643_v55 = vadd.f32 %v9642_v19, %v13519_v60  ;;  %v10410_v60 = vld [vmem:[%s13889_s17 + $0x80] sm:$0xff] }
0x1794   : > { %v11486_v42 = vpack.c.bf16 %v10411_v39, %v10410_v60  ;;  %v9889_v19 = vld [vmem:[%s13897_s21] sm:$0xff]  ;;  %v10430_v60 = vld [vmem:[#allocation14] ss:$0 sm:$0xff] }
0x1795   : > { %v9648_v26 = vsel %vm897_vm1, %v9643_v55, 0.0 }
0x1796   : > { %9649 = vadd.xlane.f32.xlu1 %v9648_v26  ;;  %11487 = vmatpush3.bf16.msra.mxu0 %v11486_v42 }
0x1797   : > { %11488 = vmatprep.subr.bf16.mxu0 %v12123_v0 }
0x179a   : > { %11490 = vmatpush3.bf16.msra.mxu0 %v11489_v44 }
0x179b   : > { %11491 = vmatprep.subr.bf16.mxu0 %v12123_v0 }
0x179e   : > { %11493 = vmatpush3.bf16.msra.mxu0 %v11492_v32 }
0x179f   : > { %11494 = vmatprep.subr.bf16.mxu0 %v12123_v0 }
0x17a2   : > { %11496 = vmatpush3.bf16.msra.mxu0 %v11495_v47 }
0x17a3   : > { %11497 = vmatprep.subr.bf16.mxu0 %v12123_v0 }
0x17a6   : > { %11499 = vmatpush3.bf16.msra.mxu0 %v11498_v50 }
0x17a7   : > { %11500 = vmatprep.subr.bf16.mxu0 %v12123_v0 }
0x17aa   : > { %11502 = vmatpush3.bf16.msra.mxu0 %v11501_v57 }
0x17ab   : > { %11503 = vmatprep.subr.bf16.mxu0 %v12123_v0 }
0x17ae   : > { %11505 = vmatpush3.bf16.msra.mxu0 %v11504_v61 }
0x17af   : > { %11506 = vmatprep.subr.bf16.mxu0 %v12123_v0 }
0x17b2   : > { %11508 = vmatpush3.bf16.msra.mxu0 %v11507_v9 }
0x1823   : > { %v9650_v27 = vpop.xlane.xlu1 %9649 }
0x1824   : > { %v9651_v28 = vmul.f32 0.03125, %v9650_v27  ;;  %v9891_v27 = vld [vmem:[%s13897_s21 + $0x10] sm:$0xff] }
0x1826   : > { %v9652_v29 = vsub.f32 %v9643_v55, %v9651_v28  ;;  %v9890_v55 = vld [vmem:[%s13897_s21 + $0x8] sm:$0xff]  ;;  %v9892_v28 = vld [vmem:[%s13897_s21 + $0x18] sm:$0xff] }
0x1827   : > { %v11510_v26 = vpack.c.bf16 %v9890_v55, %v9889_v19 }
0x1828   : > { %v9653_v35 = vmul.f32 %v9652_v29, %v9652_v29 }
0x182a   : > { %v9654_v58 = vsel %vm897_vm1, %v9653_v35, 0.0 }
0x182b   : > { %9655 = vadd.xlane.f32.xlu0 %v9654_v58 }
0x18b8   : > { %v9656_v22 = vpop.xlane.xlu0 %9655 }
0x18b9   : > { %v9657_v15 = vmul.f32 0.03125, %v9656_v22 }
0x18bb   : > { %v9658_v62 = vadd.f32 1e-05, %v9657_v15 }
0x18bd   : > { %11792 = vrsqrt.f32 %v9658_v62 }
0x18c7   : > { %v11793_v21 = vpop.eup %11792 }
0x18c8   : > { %v9660_v2 = vmul.f32 %v11793_v21, %v9652_v29  ;;  %v11513_v29 = vpack.c.bf16 %v9892_v28, %v9891_v27 }
0x18ca   : > { %v9667_v4 = vmul.f32 %v10406_v63, %v9660_v2 }
0x18cc   : > { %v9674_v5 = vadd.f32 %v10407_v3, %v9667_v4 }
0x18ce   : > { %11350 = vmatmul.mubr.msk.f32.vlgmr.msra.gmra.mrb[110].mxu1 %vm897_vm1, %v9674_v5 }
0x18cf   : > { %11395 = vmatprep.mubr.msk.f32.mxu1 %vm12124_vm0, %v12125_v1  ;;  %11511 = vmatpush3.bf16.msra.mxu1 %v11510_v26 }
0x18d0   : > { %11512 = vmatprep.subr.bf16.mxu1 %v12123_v0 }
0x18d3   : > { %11514 = vmatpush3.bf16.msra.mxu1 %v11513_v29 }
0x19a1   : > { %v9757_v13 = vpop.f32.mrb[110].mxu1 }
0x19a2   : > { %v9758_v10 = vadd.f32 %v10408_v12, %v9757_v13  ;;  %v11351_v14 = vpop.f32.mrb[111].mxu1 }
0x19a4   : > { %v9761_v16 = vmax.f32 %v9758_v10, 0.0 }
0x19a6   : > { %11385 = vmatmul.mubr.f32.vlgmr.msra.gmra.mrb[104].mxu0 %v9761_v16 }
0x1a79   : > { %v9853_v17 = vpop.f32.mrb[104].mxu0 }
0x1a7a   : > { %v9854_v23 = vadd.f32 %v10426_v18, %v9853_v17  ;;  %v11386_v1 = vpop.f32.mrb[105].mxu0 }
0x1a7c   : > { %v9857_v54 = vadd.f32 %v9854_v23, %v9674_v5 }
0x1a7e   : > { %v9862_v20 = vsel %vm897_vm1, %v9857_v54, 0.0 }
0x1a7f   : > { %9863 = vadd.xlane.f32.xlu0 %v9862_v20 }
0x1b0c   : > { %v9864_v11 = vpop.xlane.xlu0 %9863 }
0x1b0d   : > { %v9865_v53 = vmul.f32 0.03125, %v9864_v11 }
0x1b0f   : > { %v9866_v41 = vsub.f32 %v9857_v54, %v9865_v53 }
0x1b11   : > { %v9867_v24 = vmul.f32 %v9866_v41, %v9866_v41 }
0x1b13   : > { %v9868_v25 = vsel %vm897_vm1, %v9867_v24, 0.0 }
0x1b14   : > { %9869 = vadd.xlane.f32.xlu1 %v9868_v25 }
0x1ba1   : > { %v9870_v35 = vpop.xlane.xlu1 %9869 }
0x1ba2   : > { %v9871_v58 = vmul.f32 0.03125, %v9870_v35 }
0x1ba4   : > { %v9872_v30 = vadd.f32 1e-05, %v9871_v58 }
0x1ba6   : > { %11794 = vrsqrt.f32 %v9872_v30 }
0x1bb0   : > { %v11795_v56 = vpop.eup %11794 }
0x1bb1   : > { %v9874_v0 = vmul.f32 %v11795_v56, %v9866_v41 }
0x1bb3   : > { %v9881_v34 = vmul.f32 %v10428_v31, %v9874_v0 }
0x1bb5   : > { %v9888_v37 = vadd.f32 %v10429_v33, %v9881_v34 }
0x1bb7   : > { %11396 = vmatmul.mubr.msk.f32.vlgmr.msra.gmra.mrb[112].mxu1 %vm897_vm1, %v9888_v37 }
0x1c8a   : > { %v9969_v39 = vpop.f32.mrb[112].mxu1 }
0x1c8b   : > { %v9970_v40 = vadd.f32 %v10430_v60, %v9969_v39  ;;  %v11397_v42 = vpop.f32.mrb[113].mxu1 }
0x1c8d   : > { %v9973_v43 = vsel %vm816_vm2, %v9970_v40, -inf }
0x1c8e   : > { %v9974_v44 = vrot.slane %v9973_v43, 4 }
0x1c90   : > { %v9975_v8 = vmax.f32 %v9973_v43, %v9974_v44 }
0x1c92   : > { %v9976_v38 = vrot.slane %v9975_v8, 2 }
0x1c94   : > { %v9977_v32 = vmax.f32 %v9975_v8, %v9976_v38 }
0x1c96   : > { %v9978_v45 = vrot.slane %v9977_v32, 1 }
0x1c98   : > { %v9979_v46 = vmax.f32 %v9977_v32, %v9978_v45 }
0x1c9a   : > { %v9980_v47 = vsub.f32 %v9970_v40, %v9979_v46 }
0x1c9c   : > { %v9981_v48 = vmul.f32 1.442695, %v9980_v47 }
0x1c9e   : > { %11796 = vpow2.f32 %v9981_v48 }
0x1ca8   : > { %v11797_v49 = vpop.eup %11796 }
0x1ca9   : > { %v9983_v50 = vsel %vm816_vm2, %v11797_v49, 0.0 }
0x1caa   : > { %v9984_v51 = vrot.slane %v9983_v50, 4 }
0x1cac   : > { %v9985_v52 = vadd.f32 %v9984_v51, %v9983_v50 }
0x1cae   : > { %v9986_v57 = vrot.slane %v9985_v52, 2 }
0x1cb0   : > { %v9987_v59 = vadd.f32 %v9986_v57, %v9985_v52 }
0x1cb2   : > { %v9988_v36 = vrot.slane %v9987_v59, 1 }
0x1cb4   : > { %v9989_v61 = vadd.f32 %v9988_v36, %v9987_v59 }
0x1cb6   : > { %11798 = vrcp.f32 %v9989_v61 }
0x1cc0   : > { %v11799_v22 = vpop.eup %11798 }
0x1cc1   : > { %v9991_v15 = vmul.f32 %v11799_v22, %v11797_v49 }
0x1cc3   : > { %9992 = vst.msk [vmem:[%s788_s29] sm:$0xff] %vm816_vm2, %v9991_v15 }
0x1cc4   : > { %12038 = shalt.err (!%p12035_p13)
}
0x1cc5   : > { %s12039_s22 = scalar_lea.hbm %s13747_s24, 128  ;;  %s12043_s4 = scalar_lea.hbm %s13901_s13, 256 }
0x1cc6   : > { %p12040_p12 = scmp.ne.s32.totalorder %s13747_s24, %s12039_s22  ;;  %p12044_p3 = scmp.lt.u32.totalorder %s13747_s24, %s13901_s13 }
0x1cc7   : > { %p12045_p4 = scmp.lt.u32.totalorder %s12043_s4, %s12039_s22  ;;  %p12047_p8 = scmp.lt.u32.totalorder %s12039_s22, %s13747_s24 }
0x1cc8   : > { %p12041_p1 = pnand %p12040_p12, %p13902_p11 }
0x1cc9   : > { %p12046_p7 = por %p12045_p4, %p12044_p3 }
0x1cca   : > { %p12042_p2 = pneg %p12041_p1 }
0x1ccb   : > { %p12048_p5 = por %p12047_p8, %p12046_p7 }
0x1ccd   : > { %p12049_p0 = pnand %p12048_p5, %p12042_p2 }
0x1ccf   : > { %12052 = shalt.err (!%p12049_p0)
}
0x1cd0   : > { %11547 = dma.vmem_to_hbm [thread:$0]  (%p13902_p11), %s13749_s28, 128, %s13747_s24, %s9994_s30  }
0x1cd1 PF: > { %s13903_s0 = sld [smem:[#allocation26_spill]]  ;;  %s13904_s23 = sld [smem:[#allocation23_spill]] }
0x1cd2   : > { %s13905_s3 = sld [smem:[#allocation30_spill]] }
0x1cd7   : > { %p11594_p6 = scmp.ge.s32.totalorder %s13903_s0, 2  ;;  %s10019_s2 = sand.u32 1, %s13904_s23  }
0x1cd8   : > { %p13906_p9 = scmp.ne.s32.totalorder %s13905_s3, 0  ;;  %s10020_s27 = scalar_lea.sflag [#allocation4], %s10019_s2 }
0x1cda   : > { %p11575_p10 = pnand %p11594_p6, %p13906_p9 }
0x1cdc   : > { %12090 = dma.done.wait (!%p11575_p10), %s10020_s27, 128  }
0x1cdd   : > { %12092 = vsyncadd (!%p11575_p10), %s10020_s27, 4294967168  ;;  %s13907_s27 = sld [smem:[#allocation27_spill]]  ;;  %s13908_s2 = sld [smem:[#allocation24_spill]] }
0x1cde   : > { %s13909_s25 = sld [smem:[#allocation25_spill]]  ;;  %s13910_s26 = sld [smem:[#allocation28_spill]] }
0x1ce3   : > { %p36_p13 = scmp.ge.s32.totalorder %s13907_s27, 4  }
0x1ce5   :  { %38 = sbr.rel (!%p36_p13) target bundleno = 19 (0x13), region = 200 }
0x1cec   :  { %10025 = vsyncpa [#allocation3], 1 }
0x1ced   :  { %10027 = vsyncpa [#allocation3 + $0x1], 1 }
0x1cee   :  { %10028 = vsyncpa [#allocation6], 1 }
0x1cef   :  { %10029 = vsyncpa [#allocation9], 1 }
0x1cf0   :  { %10030 = vsyncpa [#allocation12], 1 }
0x1cf1   :  { %10031 = vsyncpa [#allocation15], 1 }
0x1cf2   :  { %10032 = vsyncpa [#allocation4], 1 }
0x1cf3   :  { %10034 = vsyncpa [#allocation4 + $0x1], 1 }

</bundles_post_ra>
